<compile_context>
chip_gen: v6e
topology: v6e:2x2x1
jax: 0.10.0
libtpu: 0.0.40
codegen_flags: <defaults>
</compile_context>

<pallas_src>
import functools
import math

import jax
import jax.numpy as jnp
from jax.experimental import pallas as pl
from jax.experimental.pallas import tpu as pltpu

NEG_SLOPE = 0.2


def _round_up(v, m):
    return ((v + m - 1) // m) * m


def _conv3x3_lrelu_kernel(x_ref, w_ref, b_ref, o_ref, *, wp, m_out):
    """Implicit-GEMM 3x3 conv + bias + LeakyReLU for one image.

    x_ref : (Lg, Cin)        guard-padded, spatially flattened input (f32)
    w_ref : (9, Cin, CoutP)  per-tap weight matrices (bf16), VMEM resident
    b_ref : (1, CoutP)       bias (f32)
    o_ref : (m_out, CoutP)   flat output (f32), lane-dense (CoutP = 128)
    """
    cout_p = o_ref.shape[-1]
    acc = jnp.zeros((m_out, cout_p), jnp.float32)
    for ki in range(3):
        for kj in range(3):
            off = ki * wp + kj                      # static flat tap offset
            a = x_ref[pl.ds(off, m_out), :].astype(jnp.bfloat16)
            acc += jnp.dot(a, w_ref[3 * ki + kj],
                           preferred_element_type=jnp.float32)
    y = acc + b_ref[...]
    y = jnp.where(y >= 0, y, NEG_SLOPE * y)          # fused LeakyReLU(0.2)
    o_ref[...] = y.astype(o_ref.dtype)


def initial_conv_layer(x_nchw, w_oihw, bias):
    """PyTorch InitialConvLayer forward: conv2d(3->64, k3, s1, p1) + LeakyReLU(0.2)."""
    n, cin, h, w = x_nchw.shape
    cout = w_oihw.shape[0]
    hp, wp = h + 2, w + 2
    l = hp * wp                                      # padded-image pixel count
    lr = _round_up(l, 8)                             # output rows (sublane multiple)
    guard = wp + 1                                   # max |tap offset|
    lg = _round_up(lr + 2 * guard, 8)                # guarded flat length
    cout_p = _round_up(max(cout, 128), 128)          # lane-dense output width

    # NCHW -> NHWC, zero-pad spatially, flatten spatial dims (channel minor),
    # then add guard rows so every shifted tap window stays in-bounds.
    x_nhwc = jnp.transpose(x_nchw, (0, 2, 3, 1)).astype(jnp.float32)
    x_pad = jnp.pad(x_nhwc, ((0, 0), (1, 1), (1, 1), (0, 0)))
    x_flat = x_pad.reshape(n, l, cin)
    x_flat = jnp.pad(x_flat, ((0, 0), (guard, lg - guard - l), (0, 0)))

    # (Cout, Cin, 3, 3) -> (9 taps, Cin, CoutP) bf16 for the MXU.
    w_taps = jnp.transpose(w_oihw, (2, 3, 1, 0)).reshape(9, cin, cout)
    w_taps = jnp.pad(w_taps, ((0, 0), (0, 0), (0, cout_p - cout)))
    w_taps = w_taps.astype(jnp.bfloat16)
    b_row = jnp.pad(bias.astype(jnp.float32),
                    (0, cout_p - cout)).reshape(1, cout_p)

    out_flat = pl.pallas_call(
        functools.partial(_conv3x3_lrelu_kernel, wp=wp, m_out=lr),
        out_shape=jax.ShapeDtypeStruct((n, lr, cout_p), jnp.float32),
        grid=(n,),
        in_specs=[
            pl.BlockSpec((None, lg, cin), lambda b: (b, 0, 0)),     # activations
            pl.BlockSpec((9, cin, cout_p), lambda b: (0, 0, 0)),    # weights (resident)
            pl.BlockSpec((1, cout_p), lambda b: (0, 0)),            # bias
        ],
        out_specs=pl.BlockSpec((None, lr, cout_p), lambda b: (b, 0, 0)),
        compiler_params=pltpu.CompilerParams(
            dimension_semantics=("parallel",),
            vmem_limit_bytes=32 * 1024 * 1024,
        ),
    )(x_flat, w_taps, b_row)

    # Drop padded rows/channels, un-flatten, crop the valid interior, back to NCHW.
    y = out_flat[:, :l, :cout].reshape(n, hp, wp, cout)[:, 1:h + 1, 1:w + 1, :]
    return jnp.transpose(y, (0, 3, 1, 2))


def _reference(x_nchw, w_oihw, bias):
    y = jax.lax.conv_general_dilated(
        x_nchw, w_oihw, window_strides=(1, 1), padding=((1, 1), (1, 1)),
        dimension_numbers=("NCHW", "OIHW", "NCHW"))
    y = y + bias.reshape(1, -1, 1, 1)
    return jnp.where(y >= 0, y, NEG_SLOPE * y)


if __name__ == "__main__":
    root = jax.random.PRNGKey(0)
    kx, kw, kb = jax.random.split(root, 3)

    n, cin, h, w, cout = 2, 3, 16, 16, 64
    x = jax.random.normal(kx, (n, cin, h, w), jnp.float32)
    bound = 1.0 / math.sqrt(cin * 3 * 3)              # PyTorch default conv init
    weight = jax.random.uniform(kw, (cout, cin, 3, 3), jnp.float32, -bound, bound)
    bias = jax.random.uniform(kb, (cout,), jnp.float32, -bound, bound)

    out = jax.jit(initial_conv_layer)(x, weight, bias)
    out = jax.block_until_ready(out)

    assert out.shape == (n, cout, h, w), out.shape
    assert bool(jnp.all(jnp.isfinite(out)))

    ref = _reference(x, weight, bias)
    max_err = float(jnp.max(jnp.abs(out - ref)))
    assert max_err < 0.1, f"max abs error vs XLA conv reference: {max_err}"

    print("KERNEL_OK")
</pallas_src>

<mosaic_0001>
module attributes {stable_mosaic.version = 11 : i64} {
  func.func @_conv3x3_lrelu_kernel(%arg0: i32, %arg1: memref<1x368x3xf32, #tpu.memory_space<vmem>>, %arg2: memref<9x3x128xbf16, #tpu.memory_space<vmem>>, %arg3: memref<1x128xf32, #tpu.memory_space<vmem>>, %arg4: memref<1x328x128xf32, #tpu.memory_space<vmem>>) attributes {dimension_semantics = [#tpu.dimension_semantics<parallel>], iteration_bounds = array<i64: 2>, scalar_prefetch = 0 : i64, scratch_operands = 0 : i64, tpu.core_type = #tpu.core_type<tc>, window_params = [{transform_indices = @transform_0, window_bounds = array<i64: 1, 368, 3>}, {pipeline_mode = #tpu.pipeline_mode<synchronous>, transform_indices = @transform_1, window_bounds = array<i64: 9, 3, 128>}, {pipeline_mode = #tpu.pipeline_mode<synchronous>, transform_indices = @transform_2, window_bounds = array<i64: 1, 128>}, {transform_indices = @transform_3, window_bounds = array<i64: 1, 328, 128>}]} {
    %cst = arith.constant 0.000000e+00 : f32
    %0 = vector.broadcast %cst : f32 to vector<328x128xf32>
    %c0 = arith.constant 0 : index
    %c0_0 = arith.constant 0 : index
    %c0_1 = arith.constant 0 : index
    %1 = vector.load %arg1[%c0, %c0_0, %c0_1] : memref<1x368x3xf32, #tpu.memory_space<vmem>>, vector<1x328x3xf32>
    %2 = vector.shape_cast %1 : vector<1x328x3xf32> to vector<328x3xf32>
    %3 = arith.truncf %2 : vector<328x3xf32> to vector<328x3xbf16>
    %c0_2 = arith.constant 0 : index
    %c0_3 = arith.constant 0 : index
    %c0_4 = arith.constant 0 : index
    %4 = vector.load %arg2[%c0_2, %c0_3, %c0_4] : memref<9x3x128xbf16, #tpu.memory_space<vmem>>, vector<1x3x128xbf16>
    %5 = vector.shape_cast %4 : vector<1x3x128xbf16> to vector<3x128xbf16>
    %cst_5 = arith.constant dense<0.000000e+00> : vector<328x128xf32>
    %6 = tpu.matmul %3, %5, %cst_5 {dimension_numbers = #tpu.dot_dimension_numbers<[1], [0], [0], [1], [0, 0, 1, 1], [], []>} : vector<328x3xbf16>, vector<3x128xbf16>, vector<328x128xf32> -> vector<328x128xf32>
    %7 = arith.addf %0, %6 : vector<328x128xf32>
    %c0_6 = arith.constant 0 : index
    %c1 = arith.constant 1 : index
    %c0_7 = arith.constant 0 : index
    %8 = vector.load %arg1[%c0_6, %c1, %c0_7] : memref<1x368x3xf32, #tpu.memory_space<vmem>>, vector<1x328x3xf32>
    %9 = vector.shape_cast %8 : vector<1x328x3xf32> to vector<328x3xf32>
    %10 = arith.truncf %9 : vector<328x3xf32> to vector<328x3xbf16>
    %c1_8 = arith.constant 1 : index
    %c0_9 = arith.constant 0 : index
    %c0_10 = arith.constant 0 : index
    %11 = vector.load %arg2[%c1_8, %c0_9, %c0_10] : memref<9x3x128xbf16, #tpu.memory_space<vmem>>, vector<1x3x128xbf16>
    %12 = vector.shape_cast %11 : vector<1x3x128xbf16> to vector<3x128xbf16>
    %cst_11 = arith.constant dense<0.000000e+00> : vector<328x128xf32>
    %13 = tpu.matmul %10, %12, %cst_11 {dimension_numbers = #tpu.dot_dimension_numbers<[1], [0], [0], [1], [0, 0, 1, 1], [], []>} : vector<328x3xbf16>, vector<3x128xbf16>, vector<328x128xf32> -> vector<328x128xf32>
    %14 = arith.addf %7, %13 : vector<328x128xf32>
    %c0_12 = arith.constant 0 : index
    %c2 = arith.constant 2 : index
    %c0_13 = arith.constant 0 : index
    %15 = vector.load %arg1[%c0_12, %c2, %c0_13] : memref<1x368x3xf32, #tpu.memory_space<vmem>>, vector<1x328x3xf32>
    %16 = vector.shape_cast %15 : vector<1x328x3xf32> to vector<328x3xf32>
    %17 = arith.truncf %16 : vector<328x3xf32> to vector<328x3xbf16>
    %c2_14 = arith.constant 2 : index
    %c0_15 = arith.constant 0 : index
    %c0_16 = arith.constant 0 : index
    %18 = vector.load %arg2[%c2_14, %c0_15, %c0_16] : memref<9x3x128xbf16, #tpu.memory_space<vmem>>, vector<1x3x128xbf16>
    %19 = vector.shape_cast %18 : vector<1x3x128xbf16> to vector<3x128xbf16>
    %cst_17 = arith.constant dense<0.000000e+00> : vector<328x128xf32>
    %20 = tpu.matmul %17, %19, %cst_17 {dimension_numbers = #tpu.dot_dimension_numbers<[1], [0], [0], [1], [0, 0, 1, 1], [], []>} : vector<328x3xbf16>, vector<3x128xbf16>, vector<328x128xf32> -> vector<328x128xf32>
    %21 = arith.addf %14, %20 : vector<328x128xf32>
    %c0_18 = arith.constant 0 : index
    %c18 = arith.constant 18 : index
    %c0_19 = arith.constant 0 : index
    %22 = vector.load %arg1[%c0_18, %c18, %c0_19] : memref<1x368x3xf32, #tpu.memory_space<vmem>>, vector<1x328x3xf32>
    %23 = vector.shape_cast %22 : vector<1x328x3xf32> to vector<328x3xf32>
    %24 = arith.truncf %23 : vector<328x3xf32> to vector<328x3xbf16>
    %c3 = arith.constant 3 : index
    %c0_20 = arith.constant 0 : index
    %c0_21 = arith.constant 0 : index
    %25 = vector.load %arg2[%c3, %c0_20, %c0_21] : memref<9x3x128xbf16, #tpu.memory_space<vmem>>, vector<1x3x128xbf16>
    %26 = vector.shape_cast %25 : vector<1x3x128xbf16> to vector<3x128xbf16>
    %cst_22 = arith.constant dense<0.000000e+00> : vector<328x128xf32>
    %27 = tpu.matmul %24, %26, %cst_22 {dimension_numbers = #tpu.dot_dimension_numbers<[1], [0], [0], [1], [0, 0, 1, 1], [], []>} : vector<328x3xbf16>, vector<3x128xbf16>, vector<328x128xf32> -> vector<328x128xf32>
    %28 = arith.addf %21, %27 : vector<328x128xf32>
    %c0_23 = arith.constant 0 : index
    %c19 = arith.constant 19 : index
    %c0_24 = arith.constant 0 : index
    %29 = vector.load %arg1[%c0_23, %c19, %c0_24] : memref<1x368x3xf32, #tpu.memory_space<vmem>>, vector<1x328x3xf32>
    %30 = vector.shape_cast %29 : vector<1x328x3xf32> to vector<328x3xf32>
    %31 = arith.truncf %30 : vector<328x3xf32> to vector<328x3xbf16>
    %c4 = arith.constant 4 : index
    %c0_25 = arith.constant 0 : index
    %c0_26 = arith.constant 0 : index
    %32 = vector.load %arg2[%c4, %c0_25, %c0_26] : memref<9x3x128xbf16, #tpu.memory_space<vmem>>, vector<1x3x128xbf16>
    %33 = vector.shape_cast %32 : vector<1x3x128xbf16> to vector<3x128xbf16>
    %cst_27 = arith.constant dense<0.000000e+00> : vector<328x128xf32>
    %34 = tpu.matmul %31, %33, %cst_27 {dimension_numbers = #tpu.dot_dimension_numbers<[1], [0], [0], [1], [0, 0, 1, 1], [], []>} : vector<328x3xbf16>, vector<3x128xbf16>, vector<328x128xf32> -> vector<328x128xf32>
    %35 = arith.addf %28, %34 : vector<328x128xf32>
    %c0_28 = arith.constant 0 : index
    %c20 = arith.constant 20 : index
    %c0_29 = arith.constant 0 : index
    %36 = vector.load %arg1[%c0_28, %c20, %c0_29] : memref<1x368x3xf32, #tpu.memory_space<vmem>>, vector<1x328x3xf32>
    %37 = vector.shape_cast %36 : vector<1x328x3xf32> to vector<328x3xf32>
    %38 = arith.truncf %37 : vector<328x3xf32> to vector<328x3xbf16>
    %c5 = arith.constant 5 : index
    %c0_30 = arith.constant 0 : index
    %c0_31 = arith.constant 0 : index
    %39 = vector.load %arg2[%c5, %c0_30, %c0_31] : memref<9x3x128xbf16, #tpu.memory_space<vmem>>, vector<1x3x128xbf16>
    %40 = vector.shape_cast %39 : vector<1x3x128xbf16> to vector<3x128xbf16>
    %cst_32 = arith.constant dense<0.000000e+00> : vector<328x128xf32>
    %41 = tpu.matmul %38, %40, %cst_32 {dimension_numbers = #tpu.dot_dimension_numbers<[1], [0], [0], [1], [0, 0, 1, 1], [], []>} : vector<328x3xbf16>, vector<3x128xbf16>, vector<328x128xf32> -> vector<328x128xf32>
    %42 = arith.addf %35, %41 : vector<328x128xf32>
    %c0_33 = arith.constant 0 : index
    %c36 = arith.constant 36 : index
    %c0_34 = arith.constant 0 : index
    %43 = vector.load %arg1[%c0_33, %c36, %c0_34] : memref<1x368x3xf32, #tpu.memory_space<vmem>>, vector<1x328x3xf32>
    %44 = vector.shape_cast %43 : vector<1x328x3xf32> to vector<328x3xf32>
    %45 = arith.truncf %44 : vector<328x3xf32> to vector<328x3xbf16>
    %c6 = arith.constant 6 : index
    %c0_35 = arith.constant 0 : index
    %c0_36 = arith.constant 0 : index
    %46 = vector.load %arg2[%c6, %c0_35, %c0_36] : memref<9x3x128xbf16, #tpu.memory_space<vmem>>, vector<1x3x128xbf16>
    %47 = vector.shape_cast %46 : vector<1x3x128xbf16> to vector<3x128xbf16>
    %cst_37 = arith.constant dense<0.000000e+00> : vector<328x128xf32>
    %48 = tpu.matmul %45, %47, %cst_37 {dimension_numbers = #tpu.dot_dimension_numbers<[1], [0], [0], [1], [0, 0, 1, 1], [], []>} : vector<328x3xbf16>, vector<3x128xbf16>, vector<328x128xf32> -> vector<328x128xf32>
    %49 = arith.addf %42, %48 : vector<328x128xf32>
    %c0_38 = arith.constant 0 : index
    %c37 = arith.constant 37 : index
    %c0_39 = arith.constant 0 : index
    %50 = vector.load %arg1[%c0_38, %c37, %c0_39] : memref<1x368x3xf32, #tpu.memory_space<vmem>>, vector<1x328x3xf32>
    %51 = vector.shape_cast %50 : vector<1x328x3xf32> to vector<328x3xf32>
    %52 = arith.truncf %51 : vector<328x3xf32> to vector<328x3xbf16>
    %c7 = arith.constant 7 : index
    %c0_40 = arith.constant 0 : index
    %c0_41 = arith.constant 0 : index
    %53 = vector.load %arg2[%c7, %c0_40, %c0_41] : memref<9x3x128xbf16, #tpu.memory_space<vmem>>, vector<1x3x128xbf16>
    %54 = vector.shape_cast %53 : vector<1x3x128xbf16> to vector<3x128xbf16>
    %cst_42 = arith.constant dense<0.000000e+00> : vector<328x128xf32>
    %55 = tpu.matmul %52, %54, %cst_42 {dimension_numbers = #tpu.dot_dimension_numbers<[1], [0], [0], [1], [0, 0, 1, 1], [], []>} : vector<328x3xbf16>, vector<3x128xbf16>, vector<328x128xf32> -> vector<328x128xf32>
    %56 = arith.addf %49, %55 : vector<328x128xf32>
    %c0_43 = arith.constant 0 : index
    %c38 = arith.constant 38 : index
    %c0_44 = arith.constant 0 : index
    %57 = vector.load %arg1[%c0_43, %c38, %c0_44] : memref<1x368x3xf32, #tpu.memory_space<vmem>>, vector<1x328x3xf32>
    %58 = vector.shape_cast %57 : vector<1x328x3xf32> to vector<328x3xf32>
    %59 = arith.truncf %58 : vector<328x3xf32> to vector<328x3xbf16>
    %c8 = arith.constant 8 : index
    %c0_45 = arith.constant 0 : index
    %c0_46 = arith.constant 0 : index
    %60 = vector.load %arg2[%c8, %c0_45, %c0_46] : memref<9x3x128xbf16, #tpu.memory_space<vmem>>, vector<1x3x128xbf16>
    %61 = vector.shape_cast %60 : vector<1x3x128xbf16> to vector<3x128xbf16>
    %cst_47 = arith.constant dense<0.000000e+00> : vector<328x128xf32>
    %62 = tpu.matmul %59, %61, %cst_47 {dimension_numbers = #tpu.dot_dimension_numbers<[1], [0], [0], [1], [0, 0, 1, 1], [], []>} : vector<328x3xbf16>, vector<3x128xbf16>, vector<328x128xf32> -> vector<328x128xf32>
    %63 = arith.addf %56, %62 : vector<328x128xf32>
    %c0_48 = arith.constant 0 : index
    %c0_49 = arith.constant 0 : index
    %64 = vector.load %arg3[%c0_48, %c0_49] : memref<1x128xf32, #tpu.memory_space<vmem>>, vector<1x128xf32>
    %65 = vector.broadcast %64 : vector<1x128xf32> to vector<328x128xf32>
    %66 = arith.addf %63, %65 : vector<328x128xf32>
    %cst_50 = arith.constant 0.000000e+00 : f32
    %67 = vector.broadcast %cst_50 : f32 to vector<328x128xf32>
    %68 = arith.cmpf oge, %66, %67 : vector<328x128xf32>
    %cst_51 = arith.constant 2.000000e-01 : f32
    %69 = vector.broadcast %cst_51 : f32 to vector<328x128xf32>
    %70 = arith.mulf %69, %66 : vector<328x128xf32>
    %71 = arith.select %68, %66, %70 : vector<328x128xi1>, vector<328x128xf32>
    %c0_52 = arith.constant 0 : index
    %c0_53 = arith.constant 0 : index
    %c0_54 = arith.constant 0 : index
    %72 = vector.load %arg4[%c0_52, %c0_53, %c0_54] : memref<1x328x128xf32, #tpu.memory_space<vmem>>, vector<1x328x128xf32>
    %73 = vector.shape_cast %72 : vector<1x328x128xf32> to vector<328x128xf32>
    %74 = vector.shape_cast %71 : vector<328x128xf32> to vector<1x328x128xf32>
    tpu.vector_store %arg4[%c0_52, %c0_53, %c0_54], %74 {strides = array<i32>} : memref<1x328x128xf32, #tpu.memory_space<vmem>>, vector<1x328x128xf32>,
    return
  }
  func.func @transform_0(%arg0: i32) -> (i32, i32, i32) {
    %c0_i32 = arith.constant 0 : i32
    %c0_i32_0 = arith.constant 0 : i32
    %c0_i32_1 = arith.constant 0 : i32
    return %arg0, %c0_i32, %c0_i32_0 : i32, i32, i32
  }
  func.func @transform_1(%arg0: i32) -> (i32, i32, i32) {
    %c0_i32 = arith.constant 0 : i32
    %c0_i32_0 = arith.constant 0 : i32
    %c0_i32_1 = arith.constant 0 : i32
    %c0_i32_2 = arith.constant 0 : i32
    return %c0_i32, %c0_i32_0, %c0_i32_1 : i32, i32, i32
  }
  func.func @transform_2(%arg0: i32) -> (i32, i32) {
    %c0_i32 = arith.constant 0 : i32
    %c0_i32_0 = arith.constant 0 : i32
    %c0_i32_1 = arith.constant 0 : i32
    return %c0_i32, %c0_i32_0 : i32, i32
  }
  func.func @transform_3(%arg0: i32) -> (i32, i32, i32) {
    %c0_i32 = arith.constant 0 : i32
    %c0_i32_0 = arith.constant 0 : i32
    %c0_i32_1 = arith.constant 0 : i32
    return %arg0, %c0_i32, %c0_i32_0 : i32, i32, i32
  }
}

</mosaic_0001>

<bundles_post_ra>
// kernel: initial_conv_layer.1
= control target key start
LH: loop header
LB: loop body
LE: loop exit
PB: predicated region body
PF: predicated region fallthrough
CT: control target
= control target key end

     0   :  { %s4925_s12 = smov 0   ;;  %s6516_s0 = inlined_call_operand.vmem [shape: f32[2,368,3], index: 0, kind: input, shape index: {}]   ;;  %s6517_s1 = inlined_call_operand.vmem [shape: bf16[9,3,128], index: 1, kind: input, shape index: {}]   ;;  %s6518_s2 = inlined_call_operand.vmem [shape: f32[1,128], index: 2, kind: input, shape index: {}]   ;;  %s6519_s3 = inlined_call_operand.vmem [shape: f32[2,328,128], index: 3, kind: output, shape index: {}]  }
   0x1 LB: > { %s3700_s13 = sadd.s32 4294967295, %s4900_s12   ;;  %p3704_p0 = scmp.ge.s32.totalorder %s4900_s12, 1  ;;  %s4900_s12 = sphi %s4925_s12, %s13_s12  }
   0x2   : > { %p137_p1 = scmp.lt.s32.totalorder %s4900_s12, 3 }
   0x4   : > { %p138_p2 = pnand %p3704_p0, %p137_p1 }
   0x6   : > { %141 = sbr.rel (%p138_p2) target bundleno = 974 (0x3ce), region = 32 }
   0xb   : > { %v3707_v0 = vld [vmem:[%s6517_s1 + $0x2] sm:$0x3]  ;;  %vm363_vm0 = vcmask 1040384   ;;  %vm364_vm1 = vcmask 1041408   ;;  %v4902_v1 = vmov 0.0   ;;  %v4903_v2 = vmov 65535  }
   0xc   : > { %4105 = vmatprep.subr.bf16.mxu0 %v4902_v1  ;;  %4879 = vmatprep.subr.bf16.mxu1 %v4902_v1  ;;  %v365_v3 = vsel %vm363_vm0, 4294967295, %v4903_v2  ;;  %p161_p3 = scmp.lt.s32.totalorder %s3700_s13, 1  ;;  %vm4904_vm2 = vmmov 0   ;;  %v3750_v6 = vld [vmem:[%s6517_s1 + $0x4] sm:$0x3]  ;;  %vm299_vm3 = vcmask 23552  }
   0xd   : > { %v4938_v4 = vsel %vm364_vm1, %v365_v3, 0  ;;  %4107 = vmatprep.mubr.msk.bf16.mxu0 %vm4904_vm2, %v4902_v1  ;;  %4151 = vmatprep.mubr.msk.bf16.mxu1 %vm4904_vm2, %v4902_v1  ;;  %v234_v7 = vld [vmem:[%s6517_s1] sm:$0x3] }
   0xe   : > { %6522 = vst [vmem:[#allocation2_spill] sm:$0xff] %v4938_v4  ;;  %v368_v5 = vand.u32 %v3707_v0, %v4938_v4  ;;  %s6543_s13 = smov (!%p161_p3, %s3700_s13), 1  ;;  %v964_v11 = vand.u32 %v3750_v6, %v4938_v4  ;;  %v634_v14 = vand.u32 %v4938_v4, %v234_v7 }
   0xf   : > { %s4881_s16 = smul.u32 368, %s6543_s13 }
  0x10   : > { %4106 = vmatpush3.bf16.msra.mxu0 %v368_v5  ;;  %4880 = vmatpush3.bf16.msra.mxu1 %v368_v5  ;;  %s4882_s11 = smul.u32 328, %s6543_s13 }
  0x11   : > { %4277 = vmatprep.subr.bf16.mxu0 %v4902_v1  ;;  %4191 = vmatprep.subr.bf16.mxu1 %v4902_v1  ;;  %s4959_s23 = scalar_lea.vmem %s6516_s0, %s4881_s16 }
  0x12   : > { %v235_v8 = vld [vmem:[%s4959_s23 + $0x1] sm:$0xff]  ;;  %v236_v9 = vld [vmem:[%s4959_s23 + $0x9] sm:$0xff]  ;;  %v257_v10 = vld [vmem:[%s4959_s23 + $0xb1] sm:$0xff]  ;;  %s6391_s16 = scalar_lea.vmem %s6519_s3, %s4882_s11 }
  0x13   : > { %v276_v12 = vpack.c.bf16 %v236_v9, %v235_v8  ;;  %v258_v13 = vld [vmem:[%s4959_s23 + $0xb9] sm:$0xff]  ;;  %v237_v16 = vld [vmem:[%s4959_s23 + $0x11] sm:$0xff]  ;;  %v259_v18 = vld [vmem:[%s4959_s23 + $0xc1] sm:$0xff] }
  0x14   : > { %v287_v15 = vpack.c.bf16 %v258_v13, %v257_v10  ;;  %v238_v17 = vld [vmem:[%s4959_s23 + $0x19] sm:$0xff]  ;;  %v260_v19 = vld [vmem:[%s4959_s23 + $0xc9] sm:$0xff]  ;;  %v239_v22 = vld [vmem:[%s4959_s23 + $0x21] sm:$0xff] }
  0x15   : > { %4108 = vmatmul.mubr.msk.bf16.vlgmr.msra.gmra.mxu0 %vm299_vm3, %v276_v12  ;;  %v277_v20 = vpack.c.bf16 %v238_v17, %v237_v16  ;;  %v288_v21 = vpack.c.bf16 %v260_v19, %v259_v18  ;;  %v240_v23 = vld [vmem:[%s4959_s23 + $0x29] sm:$0xff]  ;;  %v261_v24 = vld [vmem:[%s4959_s23 + $0xd1] sm:$0xff]  ;;  %v262_v25 = vld [vmem:[%s4959_s23 + $0xd9] sm:$0xff] }
  0x16   : > { %4152 = vmatmul.mubr.msk.bf16.vlgmr.msra.gmra.mxu1 %vm299_vm3, %v287_v15  ;;  %4278 = vmatpush3.bf16.msra.mxu0 %v964_v11  ;;  %v278_v26 = vpack.c.bf16 %v240_v23, %v239_v22  ;;  %v289_v27 = vpack.c.bf16 %v262_v25, %v261_v24  ;;  %v241_v28 = vld [vmem:[%s4959_s23 + $0x31] sm:$0xff]  ;;  %v242_v29 = vld [vmem:[%s4959_s23 + $0x39] sm:$0xff]  ;;  %v263_v30 = vld [vmem:[%s4959_s23 + $0xe1] sm:$0xff] }
  0x17   : > { %4192 = vmatpush3.bf16.msra.mxu1 %v634_v14  ;;  %4111 = vmatprep.mubr.msk.bf16.mxu0 %vm4904_vm2, %v4902_v1  ;;  %v264_v31 = vld [vmem:[%s4959_s23 + $0xe9] sm:$0xff]  ;;  %v279_v32 = vpack.c.bf16 %v242_v29, %v241_v28  ;;  %v243_v34 = vld [vmem:[%s4959_s23 + $0x41] sm:$0xff]  ;;  %v265_v36 = vld [vmem:[%s4959_s23 + $0xf1] sm:$0xff] }
  0x18   : > { %4155 = vmatprep.mubr.msk.bf16.mxu1 %vm4904_vm2, %v4902_v1  ;;  %4363 = vmatprep.subr.bf16.mxu1 %v4902_v1  ;;  %v290_v33 = vpack.c.bf16 %v264_v31, %v263_v30  ;;  %v244_v35 = vld [vmem:[%s4959_s23 + $0x49] sm:$0xff]  ;;  %v266_v37 = vld [vmem:[%s4959_s23 + $0xf9] sm:$0xff]  ;;  %v245_v40 = vld [vmem:[%s4959_s23 + $0x51] sm:$0xff] }
  0x19   : > { %4449 = vmatprep.subr.bf16.mxu0 %v4902_v1  ;;  %v280_v38 = vpack.c.bf16 %v244_v35, %v243_v34  ;;  %v291_v39 = vpack.c.bf16 %v266_v37, %v265_v36  ;;  %v246_v41 = vld [vmem:[%s4959_s23 + $0x59] sm:$0xff]  ;;  %v267_v42 = vld [vmem:[%s4959_s23 + $0x101] sm:$0xff]  ;;  %v268_v43 = vld [vmem:[%s4959_s23 + $0x109] sm:$0xff] }
  0x1a   : > { %v281_v44 = vpack.c.bf16 %v246_v41, %v245_v40  ;;  %v292_v45 = vpack.c.bf16 %v268_v43, %v267_v42  ;;  %v247_v46 = vld [vmem:[%s4959_s23 + $0x61] sm:$0xff]  ;;  %v248_v47 = vld [vmem:[%s4959_s23 + $0x69] sm:$0xff]  ;;  %v269_v48 = vld [vmem:[%s4959_s23 + $0x111] sm:$0xff] }
  0x1b   : > { %v270_v49 = vld [vmem:[%s4959_s23 + $0x119] sm:$0xff]  ;;  %v282_v50 = vpack.c.bf16 %v248_v47, %v247_v46  ;;  %v249_v52 = vld [vmem:[%s4959_s23 + $0x71] sm:$0xff]  ;;  %v271_v54 = vld [vmem:[%s4959_s23 + $0x121] sm:$0xff] }
  0x1c   : > { %v293_v51 = vpack.c.bf16 %v270_v49, %v269_v48  ;;  %v250_v53 = vld [vmem:[%s4959_s23 + $0x79] sm:$0xff]  ;;  %v272_v55 = vld [vmem:[%s4959_s23 + $0x129] sm:$0xff]  ;;  %v251_v58 = vld [vmem:[%s4959_s23 + $0x81] sm:$0xff] }
  0x1d   : > { %4112 = vmatmul.mubr.msk.bf16.gmra.mxu0 %vm299_vm3, %v277_v20  ;;  %v283_v56 = vpack.c.bf16 %v250_v53, %v249_v52  ;;  %v294_v57 = vpack.c.bf16 %v272_v55, %v271_v54  ;;  %v252_v59 = vld [vmem:[%s4959_s23 + $0x89] sm:$0xff]  ;;  %v273_v60 = vld [vmem:[%s4959_s23 + $0x131] sm:$0xff]  ;;  %v274_v61 = vld [vmem:[%s4959_s23 + $0x139] sm:$0xff] }
  0x1e   : > { %4156 = vmatmul.mubr.msk.bf16.gmra.mxu1 %vm299_vm3, %v288_v21  ;;  %4115 = vmatprep.mubr.msk.bf16.mxu0 %vm4904_vm2, %v4902_v1  ;;  %v284_v62 = vpack.c.bf16 %v252_v59, %v251_v58  ;;  %v295_v63 = vpack.c.bf16 %v274_v61, %v273_v60  ;;  %v253_v0 = vld [vmem:[%s4959_s23 + $0x91] sm:$0xff]  ;;  %v254_v2 = vld [vmem:[%s4959_s23 + $0x99] sm:$0xff]  ;;  %v275_v3 = vld [vmem:[%s4959_s23 + $0x141] sm:$0xff] }
  0x1f   : > { %4159 = vmatprep.mubr.msk.bf16.mxu1 %vm4904_vm2, %v4902_v1  ;;  %v285_v5 = vpack.c.bf16 %v254_v2, %v253_v0  ;;  %v296_v6 = vpack.c.bf16 %v275_v3, %v275_v3  ;;  %v255_v7 = vld [vmem:[%s4959_s23 + $0xa1] sm:$0xff]  ;;  %v256_v8 = vld [vmem:[%s4959_s23 + $0xa9] sm:$0xff]  ;;  %v175_v18 = vld [vmem:[%s4959_s23 + $0x18] sm:$0xff] }
  0x20   : > { %v172_v9 = vld [vmem:[%s4959_s23] sm:$0xff]  ;;  %v173_v10 = vld [vmem:[%s4959_s23 + $0x8] sm:$0xff]  ;;  %v286_v12 = vpack.c.bf16 %v256_v8, %v255_v7  ;;  %v174_v17 = vld [vmem:[%s4959_s23 + $0x10] sm:$0xff] }
  0x21   : > { %v3772_v11 = vld [vmem:[%s6517_s1 + $0x6] sm:$0x3]  ;;  %v213_v13 = vpack.c.bf16 %v173_v10, %v172_v9  ;;  %v837_v16 = vld [vmem:[%s4959_s23 + $0xa] sm:$0xff]  ;;  %v3794_v19 = vld [vmem:[%s6517_s1 + $0x8] sm:$0x3]  ;;  %v214_v21 = vpack.c.bf16 %v175_v18, %v174_v17 }
  0x22   : > { %v1335_v14 = vand.u32 %v3772_v11, %v4938_v4  ;;  %v836_v15 = vld [vmem:[%s4959_s23 + $0x2] sm:$0xff]  ;;  %v1706_v22 = vand.u32 %v3794_v19, %v4938_v4  ;;  %v838_v23 = vld [vmem:[%s4959_s23 + $0x12] sm:$0xff]  ;;  %v839_v24 = vld [vmem:[%s4959_s23 + $0x1a] sm:$0xff] }
  0x23   : > { %v877_v20 = vpack.c.bf16 %v837_v16, %v836_v15  ;;  %v176_v25 = vld [vmem:[%s4959_s23 + $0x20] sm:$0xff]  ;;  %v841_v30 = vld [vmem:[%s4959_s23 + $0x2a] sm:$0xff]  ;;  %v842_v35 = vld [vmem:[%s4959_s23 + $0x32] sm:$0xff] }
  0x24   : > { %v840_v29 = vld [vmem:[%s4959_s23 + $0x22] sm:$0xff]  ;;  %v178_v31 = vld [vmem:[%s4959_s23 + $0x30] sm:$0xff]  ;;  %v843_v36 = vld [vmem:[%s4959_s23 + $0x3a] sm:$0xff] }
  0x25   : > { %4116 = vmatmul.mubr.msk.bf16.gmra.mxu0 %vm299_vm3, %v278_v26  ;;  %v177_v26 = vld [vmem:[%s4959_s23 + $0x28] sm:$0xff]  ;;  %v180_v37 = vld [vmem:[%s4959_s23 + $0x40] sm:$0xff]  ;;  %v182_v43 = vld [vmem:[%s4959_s23 + $0x50] sm:$0xff] }
  0x26   : > { %4160 = vmatmul.mubr.msk.bf16.gmra.mxu1 %vm299_vm3, %v289_v27  ;;  %4119 = vmatprep.mubr.msk.bf16.mxu0 %vm4904_vm2, %v4902_v1  ;;  %v5098_v27 = vpack.c.bf16 %v839_v24, %v838_v23  ;;  %v215_v28 = vpack.c.bf16 %v177_v26, %v176_v25  ;;  %v844_v41 = vld [vmem:[%s4959_s23 + $0x42] sm:$0xff]  ;;  %v845_v42 = vld [vmem:[%s4959_s23 + $0x4a] sm:$0xff]  ;;  %v846_v47 = vld [vmem:[%s4959_s23 + $0x52] sm:$0xff] }
  0x27   : > { %4163 = vmatprep.mubr.msk.bf16.mxu1 %vm4904_vm2, %v4902_v1  ;;  %v847_v48 = vld [vmem:[%s4959_s23 + $0x5a] sm:$0xff]  ;;  %v848_v53 = vld [vmem:[%s4959_s23 + $0x62] sm:$0xff]  ;;  %v849_v54 = vld [vmem:[%s4959_s23 + $0x6a] sm:$0xff] }
  0x28   : > { %v184_v49 = vld [vmem:[%s4959_s23 + $0x60] sm:$0xff]  ;;  %v186_v55 = vld [vmem:[%s4959_s23 + $0x70] sm:$0xff]  ;;  %v195_v18 = vld [vmem:[%s4959_s23 + $0xb8] sm:$0xff] }
  0x29   : > { %v850_v59 = vld [vmem:[%s4959_s23 + $0x72] sm:$0xff]  ;;  %v851_v60 = vld [vmem:[%s4959_s23 + $0x7a] sm:$0xff]  ;;  %v852_v2 = vld [vmem:[%s4959_s23 + $0x82] sm:$0xff] }
  0x2a   : > { %v188_v61 = vld [vmem:[%s4959_s23 + $0x80] sm:$0xff]  ;;  %v853_v3 = vld [vmem:[%s4959_s23 + $0x8a] sm:$0xff]  ;;  %v854_v9 = vld [vmem:[%s4959_s23 + $0x92] sm:$0xff] }
  0x2b   : > { %v5189_v7 = vpack.c.bf16 %v853_v3, %v852_v2  ;;  %v855_v10 = vld [vmem:[%s4959_s23 + $0x9a] sm:$0xff]  ;;  %v856_v15 = vld [vmem:[%s4959_s23 + $0xa2] sm:$0xff]  ;;  %v857_v16 = vld [vmem:[%s4959_s23 + $0xaa] sm:$0xff] }
  0x2c   : > { %v192_v11 = vld [vmem:[%s4959_s23 + $0xa0] sm:$0xff]  ;;  %v194_v17 = vld [vmem:[%s4959_s23 + $0xb0] sm:$0xff]  ;;  %v5215_v19 = vpack.c.bf16 %v857_v16, %v856_v15  ;;  %v197_v24 = vld [vmem:[%s4959_s23 + $0xc8] sm:$0xff] }
  0x2d   : > { %4120 = vmatmul.mubr.msk.bf16.gmra.mxu0 %vm299_vm3, %v279_v32  ;;  %v179_v32 = vld [vmem:[%s4959_s23 + $0x38] sm:$0xff]  ;;  %v196_v23 = vld [vmem:[%s4959_s23 + $0xc0] sm:$0xff]  ;;  %v205_v3 = vld [vmem:[%s4959_s23 + $0x108] sm:$0xff] }
  0x2e   : > { %4164 = vmatmul.mubr.msk.bf16.gmra.mxu1 %vm299_vm3, %v290_v33  ;;  %4123 = vmatprep.mubr.msk.bf16.mxu0 %vm4904_vm2, %v4902_v1  ;;  %v5111_v33 = vpack.c.bf16 %v841_v30, %v840_v29  ;;  %v216_v34 = vpack.c.bf16 %v179_v32, %v178_v31  ;;  %v225_v26 = vpack.c.bf16 %v197_v24, %v196_v23  ;;  %v861_v29 = vld [vmem:[%s4959_s23 + $0xca] sm:$0xff]  ;;  %v199_v31 = vld [vmem:[%s4959_s23 + $0xd8] sm:$0xff]  ;;  %v204_v2 = vld [vmem:[%s4959_s23 + $0x100] sm:$0xff] }
  0x2f   : > { %4167 = vmatprep.mubr.msk.bf16.mxu1 %vm4904_vm2, %v4902_v1  ;;  %v198_v30 = vld [vmem:[%s4959_s23 + $0xd0] sm:$0xff]  ;;  %v868_v16 = vld [vmem:[%s4959_s23 + $0x102] sm:$0xff] }
  0x35   : > { %4124 = vmatmul.mubr.msk.bf16.gmra.mxu0 %vm299_vm3, %v280_v38  ;;  %v181_v38 = vld [vmem:[%s4959_s23 + $0x48] sm:$0xff] }
  0x36   : > { %4168 = vmatmul.mubr.msk.bf16.gmra.mxu1 %vm299_vm3, %v291_v39  ;;  %4127 = vmatprep.mubr.msk.bf16.mxu0 %vm4904_vm2, %v4902_v1  ;;  %v5124_v39 = vpack.c.bf16 %v843_v36, %v842_v35  ;;  %v217_v40 = vpack.c.bf16 %v181_v38, %v180_v37  ;;  %v862_v35 = vld [vmem:[%s4959_s23 + $0xd2] sm:$0xff]  ;;  %v863_v36 = vld [vmem:[%s4959_s23 + $0xda] sm:$0xff]  ;;  %v201_v38 = vld [vmem:[%s4959_s23 + $0xe8] sm:$0xff] }
  0x37   : > { %4171 = vmatprep.mubr.msk.bf16.mxu1 %vm4904_vm2, %v4902_v1  ;;  %v200_v37 = vld [vmem:[%s4959_s23 + $0xe0] sm:$0xff] }
  0x3d   : > { %4128 = vmatmul.mubr.msk.bf16.gmra.mxu0 %vm299_vm3, %v281_v44  ;;  %v183_v44 = vld [vmem:[%s4959_s23 + $0x58] sm:$0xff] }
  0x3e   : > { %4172 = vmatmul.mubr.msk.bf16.gmra.mxu1 %vm299_vm3, %v292_v45  ;;  %4131 = vmatprep.mubr.msk.bf16.mxu0 %vm4904_vm2, %v4902_v1  ;;  %v5137_v45 = vpack.c.bf16 %v845_v42, %v844_v41  ;;  %v218_v46 = vpack.c.bf16 %v183_v44, %v182_v43  ;;  %v227_v41 = vpack.c.bf16 %v201_v38, %v200_v37  ;;  %v864_v44 = vld [vmem:[%s4959_s23 + $0xe2] sm:$0xff] }
  0x3f   : > { %4175 = vmatprep.mubr.msk.bf16.mxu1 %vm4904_vm2, %v4902_v1  ;;  %v208_v38 = vld [vmem:[%s4959_s23 + $0x120] sm:$0xff] }
  0x45   : > { %4132 = vmatmul.mubr.msk.bf16.gmra.mxu0 %vm299_vm3, %v282_v50  ;;  %v185_v50 = vld [vmem:[%s4959_s23 + $0x68] sm:$0xff] }
  0x46   : > { %4176 = vmatmul.mubr.msk.bf16.gmra.mxu1 %vm299_vm3, %v293_v51  ;;  %4135 = vmatprep.mubr.msk.bf16.mxu0 %vm4904_vm2, %v4902_v1  ;;  %v5150_v51 = vpack.c.bf16 %v847_v48, %v846_v47  ;;  %v219_v52 = vpack.c.bf16 %v185_v50, %v184_v49  ;;  %v202_v48 = vld [vmem:[%s4959_s23 + $0xf0] sm:$0xff]  ;;  %v203_v49 = vld [vmem:[%s4959_s23 + $0xf8] sm:$0xff] }
  0x47   : > { %4179 = vmatprep.mubr.msk.bf16.mxu1 %vm4904_vm2, %v4902_v1 }
  0x4d   : > { %4136 = vmatmul.mubr.msk.bf16.gmra.mxu0 %vm299_vm3, %v283_v56  ;;  %v187_v56 = vld [vmem:[%s4959_s23 + $0x78] sm:$0xff] }
  0x4e   : > { %4180 = vmatmul.mubr.msk.bf16.gmra.mxu1 %vm299_vm3, %v294_v57  ;;  %4139 = vmatprep.mubr.msk.bf16.mxu0 %vm4904_vm2, %v4902_v1  ;;  %v5163_v57 = vpack.c.bf16 %v849_v54, %v848_v53  ;;  %v220_v58 = vpack.c.bf16 %v187_v56, %v186_v55  ;;  %v228_v55 = vpack.c.bf16 %v203_v49, %v202_v48 }
  0x4f   : > { %4183 = vmatprep.mubr.msk.bf16.mxu1 %vm4904_vm2, %v4902_v1 }
  0x55   : > { %4140 = vmatmul.mubr.msk.bf16.gmra.mxu0 %vm299_vm3, %v284_v62  ;;  %v189_v62 = vld [vmem:[%s4959_s23 + $0x88] sm:$0xff] }
  0x56   : > { %4184 = vmatmul.mubr.msk.bf16.gmra.mxu1 %vm299_vm3, %v295_v63  ;;  %4143 = vmatprep.mubr.msk.bf16.mxu0 %vm4904_vm2, %v4902_v1  ;;  %v5176_v63 = vpack.c.bf16 %v851_v60, %v850_v59  ;;  %v221_v0 = vpack.c.bf16 %v189_v62, %v188_v61  ;;  %v866_v61 = vld [vmem:[%s4959_s23 + $0xf2] sm:$0xff]  ;;  %v867_v62 = vld [vmem:[%s4959_s23 + $0xfa] sm:$0xff] }
  0x57   : > { %4187 = vmatprep.mubr.msk.bf16.mxu1 %vm4904_vm2, %v4902_v1 }
  0x5d   : > { %4144 = vmatmul.mubr.msk.bf16.gmra.mxu0 %vm299_vm3, %v285_v5  ;;  %v190_v5 = vld [vmem:[%s4959_s23 + $0x90] sm:$0xff] }
  0x5e   : > { %4188 = vmatmul.mubr.msk.bf16.gmra.mxu1 %vm299_vm3, %v296_v6  ;;  %4147 = vmatprep.mubr.msk.bf16.mxu0 %vm4904_vm2, %v4902_v1  ;;  %v191_v6 = vld [vmem:[%s4959_s23 + $0x98] sm:$0xff] }
  0x5f   : > { %4193 = vmatprep.mubr.msk.bf16.mxu1 %vm4904_vm2, %v4902_v1  ;;  %v222_v8 = vpack.c.bf16 %v191_v6, %v190_v5 }
  0x65   : > { %4148 = vmatmul.mubr.msk.bf16.gmra.mxu0 %vm299_vm3, %v286_v12  ;;  %v193_v12 = vld [vmem:[%s4959_s23 + $0xa8] sm:$0xff] }
  0x66   : > { %4194 = vmatmul.mubr.msk.bf16.vlgmr.msra.gmra.mxu1 %vm299_vm3, %v213_v13  ;;  %4279 = vmatprep.mubr.msk.bf16.mxu0 %vm4904_vm2, %v4902_v1  ;;  %v5202_v13 = vpack.c.bf16 %v855_v10, %v854_v9  ;;  %v229_v10 = vpack.c.bf16 %v205_v3, %v204_v2  ;;  %v210_v2 = vld [vmem:[%s4959_s23 + $0x130] sm:$0xff]  ;;  %v211_v3 = vld [vmem:[%s4959_s23 + $0x138] sm:$0xff] }
  0x67   : > { %4364 = vmatpush3.bf16.msra.mxu1 %v1335_v14  ;;  %4197 = vmatprep.mubr.msk.bf16.mxu1 %vm4904_vm2, %v4902_v1  ;;  %v223_v14 = vpack.c.bf16 %v193_v12, %v192_v11 }
  0x68   : > { %4535 = vmatprep.subr.bf16.mxu1 %v4902_v1 }
  0x6d   : > { %4280 = vmatmul.mubr.msk.bf16.vlgmr.msra.gmra.mxu0 %vm299_vm3, %v877_v20  ;;  %v224_v20 = vpack.c.bf16 %v195_v18, %v194_v17  ;;  %v869_v17 = vld [vmem:[%s4959_s23 + $0x10a] sm:$0xff] }
  0x6e   : > { %4198 = vmatmul.mubr.msk.bf16.gmra.mxu1 %vm299_vm3, %v214_v21  ;;  %4450 = vmatpush3.bf16.msra.mxu0 %v1706_v22  ;;  %v858_v21 = vld [vmem:[%s4959_s23 + $0xb2] sm:$0xff]  ;;  %v859_v22 = vld [vmem:[%s4959_s23 + $0xba] sm:$0xff]  ;;  %v5315_v24 = vpack.c.bf16 %v869_v17, %v868_v16  ;;  %v232_v16 = vpack.c.bf16 %v211_v3, %v210_v2  ;;  %v3816_v2 = vld [vmem:[%s6517_s1 + $0xa] sm:$0x3] }
  0x6f   : > { %4201 = vmatprep.mubr.msk.bf16.mxu1 %vm4904_vm2, %v4902_v1  ;;  %4283 = vmatprep.mubr.msk.bf16.mxu0 %vm4904_vm2, %v4902_v1  ;;  %v5228_v25 = vpack.c.bf16 %v859_v22, %v858_v21  ;;  %v207_v21 = vld [vmem:[%s4959_s23 + $0x118] sm:$0xff] }
  0x70   : > { %4621 = vmatprep.subr.bf16.mxu0 %v4902_v1 }
  0x75   : > { %4284 = vmatmul.mubr.msk.bf16.gmra.mxu0 %vm299_vm3, %v5098_v27 }
  0x76   : > { %4202 = vmatmul.mubr.msk.bf16.gmra.mxu1 %vm299_vm3, %v215_v28  ;;  %4287 = vmatprep.mubr.msk.bf16.mxu0 %vm4904_vm2, %v4902_v1  ;;  %v860_v28 = vld [vmem:[%s4959_s23 + $0xc2] sm:$0xff] }
  0x77   : > { %4205 = vmatprep.mubr.msk.bf16.mxu1 %vm4904_vm2, %v4902_v1  ;;  %v5241_v32 = vpack.c.bf16 %v861_v29, %v860_v28 }
  0x7d   : > { %4288 = vmatmul.mubr.msk.bf16.gmra.mxu0 %vm299_vm3, %v5111_v33 }
  0x7e   : > { %4206 = vmatmul.mubr.msk.bf16.gmra.mxu1 %vm299_vm3, %v216_v34  ;;  %4291 = vmatprep.mubr.msk.bf16.mxu0 %vm4904_vm2, %v4902_v1  ;;  %v226_v34 = vpack.c.bf16 %v199_v31, %v198_v30 }
  0x7f   : > { %4209 = vmatprep.mubr.msk.bf16.mxu1 %vm4904_vm2, %v4902_v1 }
  0x85   : > { %4292 = vmatmul.mubr.msk.bf16.gmra.mxu0 %vm299_vm3, %v5124_v39 }
  0x86   : > { %4210 = vmatmul.mubr.msk.bf16.gmra.mxu1 %vm299_vm3, %v217_v40  ;;  %4295 = vmatprep.mubr.msk.bf16.mxu0 %vm4904_vm2, %v4902_v1  ;;  %v5254_v40 = vpack.c.bf16 %v863_v36, %v862_v35  ;;  %v870_v35 = vld [vmem:[%s4959_s23 + $0x112] sm:$0xff]  ;;  %v871_v36 = vld [vmem:[%s4959_s23 + $0x11a] sm:$0xff] }
  0x87   : > { %4213 = vmatprep.mubr.msk.bf16.mxu1 %vm4904_vm2, %v4902_v1 }
  0x8d   : > { %4296 = vmatmul.mubr.msk.bf16.gmra.mxu0 %vm299_vm3, %v5137_v45 }
  0x8e   : > { %4214 = vmatmul.mubr.msk.bf16.gmra.mxu1 %vm299_vm3, %v218_v46  ;;  %4299 = vmatprep.mubr.msk.bf16.mxu0 %vm4904_vm2, %v4902_v1  ;;  %v865_v46 = vld [vmem:[%s4959_s23 + $0xea] sm:$0xff] }
  0x8f   : > { %4217 = vmatprep.mubr.msk.bf16.mxu1 %vm4904_vm2, %v4902_v1  ;;  %v5273_v53 = vpack.c.bf16 %v865_v46, %v864_v44 }
  0x95   : > { %4300 = vmatmul.mubr.msk.bf16.gmra.mxu0 %vm299_vm3, %v5150_v51 }
  0x96   : > { %4218 = vmatmul.mubr.msk.bf16.gmra.mxu1 %vm299_vm3, %v219_v52  ;;  %4303 = vmatprep.mubr.msk.bf16.mxu0 %vm4904_vm2, %v4902_v1 }
  0x97   : > { %4221 = vmatprep.mubr.msk.bf16.mxu1 %vm4904_vm2, %v4902_v1 }
  0x9d   : > { %4304 = vmatmul.mubr.msk.bf16.gmra.mxu0 %vm299_vm3, %v5163_v57 }
  0x9e   : > { %4222 = vmatmul.mubr.msk.bf16.gmra.mxu1 %vm299_vm3, %v220_v58  ;;  %4307 = vmatprep.mubr.msk.bf16.mxu0 %vm4904_vm2, %v4902_v1 }
  0x9f   : > { %4225 = vmatprep.mubr.msk.bf16.mxu1 %vm4904_vm2, %v4902_v1 }
  0xa5   : > { %4308 = vmatmul.mubr.msk.bf16.gmra.mxu0 %vm299_vm3, %v5176_v63 }
  0xa6   : > { %4226 = vmatmul.mubr.msk.bf16.gmra.mxu1 %vm299_vm3, %v221_v0  ;;  %4311 = vmatprep.mubr.msk.bf16.mxu0 %vm4904_vm2, %v4902_v1 }
  0xa7   : > { %4229 = vmatprep.mubr.msk.bf16.mxu1 %vm4904_vm2, %v4902_v1 }
  0xad   : > { %4312 = vmatmul.mubr.msk.bf16.gmra.mxu0 %vm299_vm3, %v5189_v7 }
  0xae   : > { %4230 = vmatmul.mubr.msk.bf16.gmra.mxu1 %vm299_vm3, %v222_v8  ;;  %4315 = vmatprep.mubr.msk.bf16.mxu0 %vm4904_vm2, %v4902_v1  ;;  %v5294_v8 = vpack.c.bf16 %v867_v62, %v866_v61  ;;  %v872_v61 = vld [vmem:[%s4959_s23 + $0x122] sm:$0xff]  ;;  %v873_v62 = vld [vmem:[%s4959_s23 + $0x12a] sm:$0xff] }
  0xaf   : > { %4233 = vmatprep.mubr.msk.bf16.mxu1 %vm4904_vm2, %v4902_v1 }
  0xb5   : > { %4316 = vmatmul.mubr.msk.bf16.gmra.mxu0 %vm299_vm3, %v5202_v13 }
  0xb6   : > { %4234 = vmatmul.mubr.msk.bf16.gmra.mxu1 %vm299_vm3, %v223_v14  ;;  %4319 = vmatprep.mubr.msk.bf16.mxu0 %vm4904_vm2, %v4902_v1 }
  0xb7   : > { %4237 = vmatprep.mubr.msk.bf16.mxu1 %vm4904_vm2, %v4902_v1 }
  0xbd   : > { %4320 = vmatmul.mubr.msk.bf16.gmra.mxu0 %vm299_vm3, %v5215_v19 }
  0xbe   : > { %4238 = vmatmul.mubr.msk.bf16.gmra.mxu1 %vm299_vm3, %v224_v20  ;;  %4323 = vmatprep.mubr.msk.bf16.mxu0 %vm4904_vm2, %v4902_v1  ;;  %v206_v20 = vld [vmem:[%s4959_s23 + $0x110] sm:$0xff] }
  0xbf   : > { %4241 = vmatprep.mubr.msk.bf16.mxu1 %vm4904_vm2, %v4902_v1  ;;  %v230_v28 = vpack.c.bf16 %v207_v21, %v206_v20 }
  0xc5   : > { %4324 = vmatmul.mubr.msk.bf16.gmra.mxu0 %vm299_vm3, %v5228_v25 }
  0xc6   : > { %4242 = vmatmul.mubr.msk.bf16.gmra.mxu1 %vm299_vm3, %v225_v26  ;;  %4327 = vmatprep.mubr.msk.bf16.mxu0 %vm4904_vm2, %v4902_v1 }
  0xc7   : > { %4245 = vmatprep.mubr.msk.bf16.mxu1 %vm4904_vm2, %v4902_v1 }
  0xcd   : > { %4328 = vmatmul.mubr.msk.bf16.gmra.mxu0 %vm299_vm3, %v5241_v32 }
  0xce   : > { %4246 = vmatmul.mubr.msk.bf16.gmra.mxu1 %vm299_vm3, %v226_v34  ;;  %4331 = vmatprep.mubr.msk.bf16.mxu0 %vm4904_vm2, %v4902_v1 }
  0xcf   : > { %4249 = vmatprep.mubr.msk.bf16.mxu1 %vm4904_vm2, %v4902_v1 }
  0xd5   : > { %v5256_v42 = vpop.f32.mrf.mxu0  ;;  %4332 = vmatmul.mubr.msk.bf16.gmra.mxu0 %vm299_vm3, %v5254_v40 }
  0xd6   : > { %v5260_v43 = vpop.f32.mrf.mxu1  ;;  %4250 = vmatmul.mubr.msk.bf16.gmra.mxu1 %vm299_vm3, %v227_v41  ;;  %4335 = vmatprep.mubr.msk.bf16.mxu0 %vm4904_vm2, %v4902_v1  ;;  %v209_v41 = vld [vmem:[%s4959_s23 + $0x128] sm:$0xff] }
  0xd7   : > { %v4109_v47 = vpop.f32.mrf.mxu0  ;;  %4253 = vmatprep.mubr.msk.bf16.mxu1 %vm4904_vm2, %v4902_v1  ;;  %v231_v49 = vpack.c.bf16 %v209_v41, %v208_v38 }
  0xd8   : > { %v4153_v50 = vpop.f32.mrf.mxu1  ;;  %v5336_v47 = vpack.c.bf16 %v871_v36, %v870_v35 }
  0xd9   : > { %v5271_v52 = vpop.f32.mrf.mxu0 }
  0xda   : > { %v5275_v54 = vpop.f32.mrf.mxu1 }
  0xdb   : > { %v4110_v56 = vpop.f32.mrf.mxu0 }
  0xdc   : > { %v4154_v58 = vpop.f32.mrf.mxu1 }
  0xdd   : > { %v5277_v59 = vpop.f32.mrf.mxu0  ;;  %4336 = vmatmul.mubr.msk.bf16.gmra.mxu0 %vm299_vm3, %v5273_v53 }
  0xde   : > { %v5281_v60 = vpop.f32.mrf.mxu1  ;;  %4254 = vmatmul.mubr.msk.bf16.gmra.mxu1 %vm299_vm3, %v228_v55  ;;  %4339 = vmatprep.mubr.msk.bf16.mxu0 %vm4904_vm2, %v4902_v1 }
  0xdf   : > { %v4113_v0 = vpop.f32.mrf.mxu0  ;;  %4257 = vmatprep.mubr.msk.bf16.mxu1 %vm4904_vm2, %v4902_v1 }
  0xe0   : > { %v4157_v5 = vpop.f32.mrf.mxu1 }
  0xe1   : > { %v5292_v6 = vpop.f32.mrf.mxu0 }
  0xe2   : > { %v5296_v9 = vpop.f32.mrf.mxu1 }
  0xe3   : > { %v4114_v11 = vpop.f32.mrf.mxu0 }
  0xe4   : > { %v4158_v12 = vpop.f32.mrf.mxu1  ;;  %v5357_v11 = vpack.c.bf16 %v873_v62, %v872_v61  ;;  %v5391_v61 = vld [vmem:[%s4959_s23 + $0x142] sm:$0xff] }
  0xe5   : > { %v5298_v14 = vpop.f32.mrf.mxu0  ;;  %4340 = vmatmul.mubr.msk.bf16.gmra.mxu0 %vm299_vm3, %v5294_v8 }
  0xe6   : > { %v5302_v15 = vpop.f32.mrf.mxu1  ;;  %4258 = vmatmul.mubr.msk.bf16.gmra.mxu1 %vm299_vm3, %v229_v10  ;;  %4343 = vmatprep.mubr.msk.bf16.mxu0 %vm4904_vm2, %v4902_v1 }
  0xe7   : > { %v4117_v18 = vpop.f32.mrf.mxu0  ;;  %4261 = vmatprep.mubr.msk.bf16.mxu1 %vm4904_vm2, %v4902_v1 }
  0xe8   : > { %v4161_v22 = vpop.f32.mrf.mxu1 }
  0xe9   : > { %v5313_v23 = vpop.f32.mrf.mxu0  ;;  %v874_v22 = vld [vmem:[%s4959_s23 + $0x132] sm:$0xff] }
  0xea   : > { %v5317_v26 = vpop.f32.mrf.mxu1 }
  0xeb   : > { %v4118_v29 = vpop.f32.mrf.mxu0 }
  0xec   : > { %v4162_v30 = vpop.f32.mrf.mxu1 }
  0xed   : > { %v5319_v31 = vpop.f32.mrf.mxu0  ;;  %4344 = vmatmul.mubr.msk.bf16.gmra.mxu0 %vm299_vm3, %v5315_v24  ;;  %v212_v30 = vld [vmem:[%s4959_s23 + $0x140] sm:$0xff] }
  0xee   : > { %v5323_v34 = vpop.f32.mrf.mxu1  ;;  %4262 = vmatmul.mubr.msk.bf16.gmra.mxu1 %vm299_vm3, %v230_v28  ;;  %4347 = vmatprep.mubr.msk.bf16.mxu0 %vm4904_vm2, %v4902_v1  ;;  %v875_v28 = vld [vmem:[%s4959_s23 + $0x13a] sm:$0xff]  ;;  %v233_v41 = vpack.c.bf16 %v212_v30, %v212_v30 }
  0xef   : > { %v4121_v37 = vpop.f32.mrf.mxu0  ;;  %4265 = vmatprep.mubr.msk.bf16.mxu1 %vm4904_vm2, %v4902_v1  ;;  %v1578_v30 = vld [vmem:[%s4959_s23 + $0x13] sm:$0xff] }
  0xf0   : > { %v4165_v44 = vpop.f32.mrf.mxu1  ;;  %v5377_v37 = vpack.c.bf16 %v875_v28, %v874_v22 }
  0xf1   : > { %v5334_v46 = vpop.f32.mrf.mxu0 }
  0xf2   : > { %v5338_v48 = vpop.f32.mrf.mxu1 }
  0xf3   : > { %v4122_v50 = vpop.f32.mrf.mxu0 }
  0xf4   : > { %v4166_v55 = vpop.f32.mrf.mxu1 }
  0xf5   : > { %v5340_v56 = vpop.f32.mrf.mxu0  ;;  %4348 = vmatmul.mubr.msk.bf16.gmra.mxu0 %vm299_vm3, %v5336_v47 }
  0xf6   : > { %v5344_v58 = vpop.f32.mrf.mxu1  ;;  %4266 = vmatmul.mubr.msk.bf16.gmra.mxu1 %vm299_vm3, %v231_v49  ;;  %4351 = vmatprep.mubr.msk.bf16.mxu0 %vm4904_vm2, %v4902_v1 }
  0xf7   : > { %v4125_v0 = vpop.f32.mrf.mxu0  ;;  %4269 = vmatprep.mubr.msk.bf16.mxu1 %vm4904_vm2, %v4902_v1 }
  0xf8   : > { %v4169_v5 = vpop.f32.mrf.mxu1 }
  0xf9   : > { %v5355_v10 = vpop.f32.mrf.mxu0  ;;  %v897_v5 = vpack.c.bf16 %v5391_v61, %v5391_v61 }
  0xfa   : > { %v5359_v12 = vpop.f32.mrf.mxu1 }
  0xfb   : > { %v4126_v17 = vpop.f32.mrf.mxu0 }
  0xfc   : > { %v4170_v18 = vpop.f32.mrf.mxu1 }
  0xfd   : > { %v5361_v20 = vpop.f32.mrf.mxu0  ;;  %4352 = vmatmul.mubr.msk.bf16.gmra.mxu0 %vm299_vm3, %v5357_v11  ;;  %v2077_v18 = vand.u32 %v3816_v2, %v4938_v4 }
  0xfe   : > { %v5365_v21 = vpop.f32.mrf.mxu1  ;;  %4270 = vmatmul.mubr.msk.bf16.gmra.mxu1 %vm299_vm3, %v232_v16  ;;  %4355 = vmatprep.mubr.msk.bf16.mxu0 %vm4904_vm2, %v4902_v1 }
  0xff   : > { %v4129_v29 = vpop.f32.mrf.mxu0  ;;  %4273 = vmatprep.mubr.msk.bf16.mxu1 %vm4904_vm2, %v4902_v1 }
 0x100   : > { %v4173_v35 = vpop.f32.mrf.mxu1 }
 0x101   : > { %v5375_v36 = vpop.f32.mrf.mxu0  ;;  %v1579_v35 = vld [vmem:[%s4959_s23 + $0x1b] sm:$0xff] }
 0x102   : > { %v5379_v38 = vpop.f32.mrf.mxu1 }
 0x103   : > { %6523 = vst [vmem:[#allocation3_spill] sm:$0xff] %v5379_v38  ;;  %v4130_v44 = vpop.f32.mrf.mxu0 }
 0x104   : > { %v4174_v49 = vpop.f32.mrf.mxu1  ;;  %v3838_v44 = vld [vmem:[%s6517_s1 + $0xc] sm:$0x3] }
 0x105   : > { %v5381_v50 = vpop.f32.mrf.mxu0  ;;  %4356 = vmatmul.mubr.msk.bf16.gmra.mxu0 %vm299_vm3, %v5377_v37  ;;  %v2448_v2 = vand.u32 %v3838_v44, %v4938_v4 }
 0x106   : > { %v5385_v55 = vpop.f32.mrf.mxu1  ;;  %4274 = vmatmul.mubr.msk.bf16.gmra.mxu1 %vm299_vm3, %v233_v41  ;;  %4359 = vmatprep.mubr.msk.bf16.mxu0 %vm4904_vm2, %v4902_v1 }
 0x107   : > { %6524 = vst [vmem:[#allocation4_spill] sm:$0xff] %v5385_v55  ;;  %v4133_v62 = vpop.f32.mrf.mxu0  ;;  %4365 = vmatprep.mubr.msk.bf16.mxu1 %vm4904_vm2, %v4902_v1 }
 0x108   : > { %v4177_v0 = vpop.f32.mrf.mxu1  ;;  %v1619_v62 = vpack.c.bf16 %v1579_v35, %v1578_v30 }
 0x109   : > { %v5398_v3 = vpop.f32.mrf.mxu0 }
 0x10a   : > { %v5402_v16 = vpop.f32.mrf.mxu1 }
 0x10b   : > { %6525 = vst [vmem:[#allocation5_spill] sm:$0xff] %v5402_v16  ;;  %v4134_v17 = vpop.f32.mrf.mxu0 }
 0x10c   : > { %v4178_v22 = vpop.f32.mrf.mxu1 }
 0x10d   : > { %v5405_v28 = vpop.f32.mrf.mxu0  ;;  %4360 = vmatmul.mubr.msk.bf16.gmra.mxu0 %vm299_vm3, %v897_v5 }
 0x10e   : > { %v5408_v29 = vpop.f32.mrf.mxu1  ;;  %4366 = vmatmul.mubr.msk.bf16.vlgmr.msra.gmra.mxu1 %vm299_vm3, %v5098_v27  ;;  %4451 = vmatprep.mubr.msk.bf16.mxu0 %vm4904_vm2, %v4902_v1 }
 0x10f   : > { %6526 = vst [vmem:[#allocation6_spill] sm:$0xff] %v5408_v29  ;;  %v4137_v41 = vpop.f32.mrf.mxu0  ;;  %4536 = vmatpush3.bf16.msra.mxu1 %v2077_v18  ;;  %4369 = vmatprep.mubr.msk.bf16.mxu1 %vm4904_vm2, %v4902_v1  ;;  %v1585_v29 = vld [vmem:[%s4959_s23 + $0x4b] sm:$0xff] }
 0x110   : > { %v4181_v49 = vpop.f32.mrf.mxu1  ;;  %4707 = vmatprep.subr.bf16.mxu1 %v4902_v1  ;;  %v1580_v41 = vld [vmem:[%s4959_s23 + $0x23] sm:$0xff] }
 0x111   : > { %v5422_v27 = vpop.f32.mrf.mxu0  ;;  %v1581_v49 = vld [vmem:[%s4959_s23 + $0x2b] sm:$0xff] }
 0x112   : > { %v5424_v0 = vpop.f32.mrf.mxu1 }
 0x113   : > { %6527 = vst [vmem:[#allocation7_spill] sm:$0xff] %v5424_v0  ;;  %v4138_v5 = vpop.f32.mrf.mxu0 }
 0x114   : > { %v4182_v17 = vpop.f32.mrf.mxu1 }
 0x115   : > { %v5427_v18 = vpop.f32.mrf.mxu0  ;;  %4452 = vmatmul.mubr.msk.bf16.vlgmr.msra.gmra.mxu0 %vm299_vm3, %v1619_v62  ;;  %v1620_v62 = vpack.c.bf16 %v1581_v49, %v1580_v41  ;;  %v1583_v41 = vld [vmem:[%s4959_s23 + $0x3b] sm:$0xff] }
 0x116   : > { %v5430_v22 = vpop.f32.mrf.mxu1  ;;  %4370 = vmatmul.mubr.msk.bf16.gmra.mxu1 %vm299_vm3, %v5111_v33  ;;  %4622 = vmatpush3.bf16.msra.mxu0 %v2448_v2 }
 0x117   : > { %6528 = vst [vmem:[#allocation8_spill] sm:$0xff] %v5430_v22  ;;  %v4141_v30 = vpop.f32.mrf.mxu0  ;;  %4373 = vmatprep.mubr.msk.bf16.mxu1 %vm4904_vm2, %v4902_v1  ;;  %4455 = vmatprep.mubr.msk.bf16.mxu0 %vm4904_vm2, %v4902_v1 }
 0x118   : > { %v4185_v35 = vpop.f32.mrf.mxu1  ;;  %4793 = vmatprep.subr.bf16.mxu0 %v4902_v1 }
 0x119   : > { %v5441_v44 = vpop.f32.mrf.mxu0  ;;  %v1582_v35 = vld [vmem:[%s4959_s23 + $0x33] sm:$0xff] }
 0x11a   : > { %v5443_v5 = vpop.f32.mrf.mxu1 }
 0x11b   : > { %6529 = vst [vmem:[#allocation9_spill] sm:$0xff] %v5443_v5  ;;  %v4142_v33 = vpop.f32.mrf.mxu0 }
 0x11c   : > { %v4186_v2 = vpop.f32.mrf.mxu1 }
 0x11d   : > { %v5445_v17 = vpop.f32.mrf.mxu0  ;;  %4456 = vmatmul.mubr.msk.bf16.gmra.mxu0 %vm299_vm3, %v1620_v62  ;;  %v1621_v62 = vpack.c.bf16 %v1583_v41, %v1582_v35 }
 0x11e   : > { %v5448_v30 = vpop.f32.mrf.mxu1  ;;  %4374 = vmatmul.mubr.msk.bf16.gmra.mxu1 %vm299_vm3, %v5124_v39  ;;  %4459 = vmatprep.mubr.msk.bf16.mxu0 %vm4904_vm2, %v4902_v1 }
 0x11f   : > { %6530 = vst [vmem:[#allocation10_spill] sm:$0xff] %v5448_v30  ;;  %v4145_v49 = vpop.f32.mrf.mxu0  ;;  %4377 = vmatprep.mubr.msk.bf16.mxu1 %vm4904_vm2, %v4902_v1 }
 0x120   : > { %v4189_v33 = vpop.f32.mrf.mxu1  ;;  %v1584_v49 = vld [vmem:[%s4959_s23 + $0x43] sm:$0xff] }
 0x121   : > { %v5458_v2 = vpop.f32.mrf.mxu0 }
 0x122   : > { %v567_v5 = vpop.f32.mrf.mxu1 }
 0x123   : > { %v4146_v30 = vpop.f32.mrf.mxu0 }
 0x124   : > { %v4190_v22 = vpop.f32.mrf.mxu1  ;;  %v1622_v30 = vpack.c.bf16 %v1585_v29, %v1584_v49 }
 0x125   : > { %v5460_v0 = vpop.f32.mrf.mxu0  ;;  %4460 = vmatmul.mubr.msk.bf16.gmra.mxu0 %vm299_vm3, %v1621_v62 }
 0x126   : > { %v670_v39 = vpop.f32.mrf.mxu1  ;;  %4378 = vmatmul.mubr.msk.bf16.gmra.mxu1 %vm299_vm3, %v5137_v45  ;;  %4463 = vmatprep.mubr.msk.bf16.mxu0 %vm4904_vm2, %v4902_v1 }
 0x127   : > { %v4149_v33 = vpop.f32.mrf.mxu0  ;;  %4381 = vmatprep.mubr.msk.bf16.mxu1 %vm4904_vm2, %v4902_v1  ;;  %v671_v62 = vadd.f32 %v670_v39, %v5256_v42 }
 0x128   : > { %v4195_v22 = vpop.f32.mrf.mxu1  ;;  %v1586_v33 = vld [vmem:[%s4959_s23 + $0x53] sm:$0xff] }
 0x129   : > { %v5471_v5 = vpop.f32.mrf.mxu0  ;;  %v1587_v22 = vld [vmem:[%s4959_s23 + $0x5b] sm:$0xff] }
 0x12a   : > { %v673_v35 = vpop.f32.mrf.mxu1 }
 0x12b   : > { %v4150_v41 = vpop.f32.mrf.mxu0  ;;  %v674_v42 = vadd.f32 %v673_v35, %v5271_v52  ;;  %v1588_v52 = vld [vmem:[%s4959_s23 + $0x63] sm:$0xff]  ;;  %v1589_v35 = vld [vmem:[%s4959_s23 + $0x6b] sm:$0xff] }
 0x12c   : > { %v4196_v45 = vpop.f32.mrf.mxu1 }
 0x12d   : > { %v1000_v16 = vpop.f32.mrf.mxu0  ;;  %4464 = vmatmul.mubr.msk.bf16.gmra.mxu0 %vm299_vm3, %v1622_v30 }
 0x12e   : > { %v678_v55 = vpop.f32.mrf.mxu1  ;;  %v5475_v4 = vadd.f32 %v1000_v16, %v671_v62  ;;  %4382 = vmatmul.mubr.msk.bf16.gmra.mxu1 %vm299_vm3, %v5150_v51  ;;  %4467 = vmatprep.mubr.msk.bf16.mxu0 %vm4904_vm2, %v4902_v1  ;;  %v1623_v16 = vpack.c.bf16 %v1587_v22, %v1586_v33 }
 0x12f   : > { %v4281_v29 = vpop.f32.mrf.mxu0  ;;  %4385 = vmatprep.mubr.msk.bf16.mxu1 %vm4904_vm2, %v4902_v1  ;;  %v679_v62 = vadd.f32 %v678_v55, %v5277_v59 }
 0x130   : > { %6531 = vst [vmem:[#allocation11_spill] sm:$0xff] %v5475_v4  ;;  %v4199_v39 = vpop.f32.mrf.mxu1 }
 0x131   : > { %v1003_v49 = vpop.f32.mrf.mxu0 }
 0x132   : > { %v681_v30 = vpop.f32.mrf.mxu1  ;;  %v5486_v41 = vadd.f32 %v1003_v49, %v674_v42 }
 0x133   : > { %v4282_v51 = vpop.f32.mrf.mxu0  ;;  %v682_v59 = vadd.f32 %v681_v30, %v5292_v6  ;;  %v1590_v6 = vld [vmem:[%s4959_s23 + $0x73] sm:$0xff]  ;;  %v1591_v30 = vld [vmem:[%s4959_s23 + $0x7b] sm:$0xff] }
 0x134   : > { %v4200_v45 = vpop.f32.mrf.mxu1 }
 0x135   : > { %v1008_v4 = vpop.f32.mrf.mxu0  ;;  %4468 = vmatmul.mubr.msk.bf16.gmra.mxu0 %vm299_vm3, %v1623_v16 }
 0x136   : > { %v686_v29 = vpop.f32.mrf.mxu1  ;;  %v5490_v38 = vadd.f32 %v1008_v4, %v679_v62  ;;  %4386 = vmatmul.mubr.msk.bf16.gmra.mxu1 %vm299_vm3, %v5163_v57  ;;  %4471 = vmatprep.mubr.msk.bf16.mxu0 %vm4904_vm2, %v4902_v1  ;;  %v1624_v4 = vpack.c.bf16 %v1589_v35, %v1588_v52 }
 0x137   : > { %v4285_v33 = vpop.f32.mrf.mxu0  ;;  %4389 = vmatprep.mubr.msk.bf16.mxu1 %vm4904_vm2, %v4902_v1  ;;  %v687_v49 = vadd.f32 %v686_v29, %v5298_v14 }
 0x138   : > { %v4203_v55 = vpop.f32.mrf.mxu1  ;;  %v1625_v33 = vpack.c.bf16 %v1591_v30, %v1590_v6 }
 0x139   : > { %v1011_v22 = vpop.f32.mrf.mxu0 }
 0x13a   : > { %v689_v42 = vpop.f32.mrf.mxu1  ;;  %v5501_v39 = vadd.f32 %v1011_v22, %v682_v59 }
 0x13b   : > { %v4286_v57 = vpop.f32.mrf.mxu0  ;;  %v690_v14 = vadd.f32 %v689_v42, %v5313_v23  ;;  %v1592_v23 = vld [vmem:[%s4959_s23 + $0x83] sm:$0xff]  ;;  %v1593_v42 = vld [vmem:[%s4959_s23 + $0x8b] sm:$0xff] }
 0x13c   : > { %v4204_v16 = vpop.f32.mrf.mxu1  ;;  %v1626_v30 = vpack.c.bf16 %v1593_v42, %v1592_v23 }
 0x13d   : > { %v1016_v51 = vpop.f32.mrf.mxu0  ;;  %4472 = vmatmul.mubr.msk.bf16.gmra.mxu0 %vm299_vm3, %v1624_v4 }
 0x13e   : > { %v694_v62 = vpop.f32.mrf.mxu1  ;;  %v5505_v45 = vadd.f32 %v1016_v51, %v687_v49  ;;  %4390 = vmatmul.mubr.msk.bf16.gmra.mxu1 %vm299_vm3, %v5176_v63  ;;  %4475 = vmatprep.mubr.msk.bf16.mxu0 %vm4904_vm2, %v4902_v1 }
 0x13f   : > { %v4289_v52 = vpop.f32.mrf.mxu0  ;;  %4393 = vmatprep.mubr.msk.bf16.mxu1 %vm4904_vm2, %v4902_v1  ;;  %v695_v22 = vadd.f32 %v694_v62, %v5319_v31 }
 0x140   : > { %v4207_v29 = vpop.f32.mrf.mxu1 }
 0x141   : > { %v1019_v35 = vpop.f32.mrf.mxu0 }
 0x142   : > { %v697_v59 = vpop.f32.mrf.mxu1  ;;  %v5516_v55 = vadd.f32 %v1019_v35, %v690_v14 }
 0x143   : > { %v4290_v63 = vpop.f32.mrf.mxu0  ;;  %v698_v31 = vadd.f32 %v697_v59, %v5334_v46  ;;  %v1594_v46 = vld [vmem:[%s4959_s23 + $0x93] sm:$0xff]  ;;  %v1595_v59 = vld [vmem:[%s4959_s23 + $0x9b] sm:$0xff] }
 0x144   : > { %v4208_v4 = vpop.f32.mrf.mxu1  ;;  %v1627_v23 = vpack.c.bf16 %v1595_v59, %v1594_v46 }
 0x145   : > { %v1024_v57 = vpop.f32.mrf.mxu0  ;;  %4476 = vmatmul.mubr.msk.bf16.gmra.mxu0 %vm299_vm3, %v1625_v33 }
 0x146   : > { %v702_v49 = vpop.f32.mrf.mxu1  ;;  %v5520_v16 = vadd.f32 %v1024_v57, %v695_v22  ;;  %4394 = vmatmul.mubr.msk.bf16.gmra.mxu1 %vm299_vm3, %v5189_v7  ;;  %4479 = vmatprep.mubr.msk.bf16.mxu0 %vm4904_vm2, %v4902_v1 }
 0x147   : > { %v4293_v51 = vpop.f32.mrf.mxu0  ;;  %4397 = vmatprep.mubr.msk.bf16.mxu1 %vm4904_vm2, %v4902_v1  ;;  %v703_v29 = vadd.f32 %v702_v49, %v5340_v56 }
 0x148   : > { %v4211_v62 = vpop.f32.mrf.mxu1 }
 0x149   : > { %v1027_v6 = vpop.f32.mrf.mxu0 }
 0x14a   : > { %v705_v52 = vpop.f32.mrf.mxu1  ;;  %v5531_v14 = vadd.f32 %v1027_v6, %v698_v31 }
 0x14b   : > { %v4294_v7 = vpop.f32.mrf.mxu0  ;;  %v706_v56 = vadd.f32 %v705_v52, %v5355_v10  ;;  %v1596_v10 = vld [vmem:[%s4959_s23 + $0xa3] sm:$0xff]  ;;  %v1597_v52 = vld [vmem:[%s4959_s23 + $0xab] sm:$0xff] }
 0x14c   : > { %v4212_v35 = vpop.f32.mrf.mxu1 }
 0x14d   : > { %v1032_v33 = vpop.f32.mrf.mxu0  ;;  %4480 = vmatmul.mubr.msk.bf16.gmra.mxu0 %vm299_vm3, %v1626_v30 }
 0x14e   : > { %v710_v63 = vpop.f32.mrf.mxu1  ;;  %v5535_v22 = vadd.f32 %v1032_v33, %v703_v29  ;;  %4398 = vmatmul.mubr.msk.bf16.gmra.mxu1 %vm299_vm3, %v5202_v13  ;;  %4483 = vmatprep.mubr.msk.bf16.mxu0 %vm4904_vm2, %v4902_v1 }
 0x14f   : > { %v4297_v4 = vpop.f32.mrf.mxu0  ;;  %4401 = vmatprep.mubr.msk.bf16.mxu1 %vm4904_vm2, %v4902_v1  ;;  %v711_v31 = vadd.f32 %v710_v63, %v5361_v20  ;;  %v1628_v63 = vpack.c.bf16 %v1597_v52, %v1596_v10 }
 0x150   : > { %v4215_v57 = vpop.f32.mrf.mxu1 }
 0x151   : > { %v1035_v49 = vpop.f32.mrf.mxu0 }
 0x152   : > { %v713_v42 = vpop.f32.mrf.mxu1  ;;  %v5546_v51 = vadd.f32 %v1035_v49, %v706_v56 }
 0x153   : > { %v4298_v13 = vpop.f32.mrf.mxu0  ;;  %v714_v20 = vadd.f32 %v713_v42, %v5375_v36  ;;  %v1598_v36 = vld [vmem:[%s4959_s23 + $0xb3] sm:$0xff]  ;;  %v1599_v42 = vld [vmem:[%s4959_s23 + $0xbb] sm:$0xff] }
 0x154   : > { %v4216_v62 = vpop.f32.mrf.mxu1 }
 0x155   : > { %v1040_v6 = vpop.f32.mrf.mxu0  ;;  %4484 = vmatmul.mubr.msk.bf16.gmra.mxu0 %vm299_vm3, %v1627_v23 }
 0x156   : > { %v718_v30 = vpop.f32.mrf.mxu1  ;;  %v5550_v7 = vadd.f32 %v1040_v6, %v711_v31  ;;  %4402 = vmatmul.mubr.msk.bf16.gmra.mxu1 %vm299_vm3, %v5215_v19  ;;  %4487 = vmatprep.mubr.msk.bf16.mxu0 %vm4904_vm2, %v4902_v1  ;;  %v1629_v6 = vpack.c.bf16 %v1599_v42, %v1598_v36 }
 0x157   : > { %v4301_v29 = vpop.f32.mrf.mxu0  ;;  %4405 = vmatprep.mubr.msk.bf16.mxu1 %vm4904_vm2, %v4902_v1  ;;  %v719_v4 = vadd.f32 %v718_v30, %v5381_v50 }
 0x158   : > { %v4219_v35 = vpop.f32.mrf.mxu1 }
 0x159   : > { %v1043_v33 = vpop.f32.mrf.mxu0 }
 0x15a   : > { %v721_v46 = vpop.f32.mrf.mxu1  ;;  %v5561_v59 = vadd.f32 %v1043_v33, %v714_v20 }
 0x15b   : > { %v4302_v19 = vpop.f32.mrf.mxu0  ;;  %v722_v50 = vadd.f32 %v721_v46, %v5398_v3  ;;  %v1600_v3 = vld [vmem:[%s4959_s23 + $0xc3] sm:$0xff] }
 0x15c   : > { %v4220_v56 = vpop.f32.mrf.mxu1 }
 0x15d   : > { %v1048_v57 = vpop.f32.mrf.mxu0  ;;  %4488 = vmatmul.mubr.msk.bf16.gmra.mxu0 %vm299_vm3, %v1628_v63  ;;  %v1601_v63 = vld [vmem:[%s4959_s23 + $0xcb] sm:$0xff] }
 0x15e   : > { %v726_v49 = vpop.f32.mrf.mxu1  ;;  %v5565_v23 = vadd.f32 %v1048_v57, %v719_v4  ;;  %4406 = vmatmul.mubr.msk.bf16.gmra.mxu1 %vm299_vm3, %v5228_v25  ;;  %4491 = vmatprep.mubr.msk.bf16.mxu0 %vm4904_vm2, %v4902_v1  ;;  %v1630_v56 = vpack.c.bf16 %v1601_v63, %v1600_v3 }
 0x15f   : > { %v4305_v13 = vpop.f32.mrf.mxu0  ;;  %4409 = vmatprep.mubr.msk.bf16.mxu1 %vm4904_vm2, %v4902_v1  ;;  %v727_v52 = vadd.f32 %v726_v49, %v5405_v28 }
 0x160   : > { %v4223_v31 = vpop.f32.mrf.mxu1 }
 0x161   : > { %v1051_v62 = vpop.f32.mrf.mxu0 }
 0x162   : > { %v729_v30 = vpop.f32.mrf.mxu1  ;;  %v5576_v10 = vadd.f32 %v1051_v62, %v722_v50  ;;  %v1603_v62 = vld [vmem:[%s4959_s23 + $0xdb] sm:$0xff] }
 0x163   : > { %v4306_v25 = vpop.f32.mrf.mxu0  ;;  %v730_v28 = vadd.f32 %v729_v30, %v5422_v27  ;;  %v1602_v27 = vld [vmem:[%s4959_s23 + $0xd3] sm:$0xff] }
 0x164   : > { %v4224_v29 = vpop.f32.mrf.mxu1 }
 0x165   : > { %v1056_v20 = vpop.f32.mrf.mxu0  ;;  %4492 = vmatmul.mubr.msk.bf16.gmra.mxu0 %vm299_vm3, %v1629_v6 }
 0x166   : > { %v734_v35 = vpop.f32.mrf.mxu1  ;;  %v5580_v33 = vadd.f32 %v1056_v20, %v727_v52  ;;  %4410 = vmatmul.mubr.msk.bf16.gmra.mxu1 %vm299_vm3, %v5241_v32  ;;  %4495 = vmatprep.mubr.msk.bf16.mxu0 %vm4904_vm2, %v4902_v1  ;;  %v1631_v52 = vpack.c.bf16 %v1603_v62, %v1602_v27 }
 0x167   : > { %v4309_v46 = vpop.f32.mrf.mxu0  ;;  %4413 = vmatprep.mubr.msk.bf16.mxu1 %vm4904_vm2, %v4902_v1  ;;  %v735_v36 = vadd.f32 %v734_v35, %v5427_v18 }
 0x168   : > { %v4227_v19 = vpop.f32.mrf.mxu1 }
 0x169   : > { %v1059_v4 = vpop.f32.mrf.mxu0  ;;  %v1605_v19 = vld [vmem:[%s4959_s23 + $0xeb] sm:$0xff] }
 0x16a   : > { %v737_v57 = vpop.f32.mrf.mxu1  ;;  %v5591_v49 = vadd.f32 %v1059_v4, %v730_v28 }
 0x16b   : > { %v4310_v32 = vpop.f32.mrf.mxu0  ;;  %v738_v18 = vadd.f32 %v737_v57, %v5441_v44  ;;  %v1604_v44 = vld [vmem:[%s4959_s23 + $0xe3] sm:$0xff] }
 0x16c   : > { %v4228_v42 = vpop.f32.mrf.mxu1  ;;  %v1632_v32 = vpack.c.bf16 %v1605_v19, %v1604_v44 }
 0x16d   : > { %v1064_v13 = vpop.f32.mrf.mxu0  ;;  %4496 = vmatmul.mubr.msk.bf16.gmra.mxu0 %vm299_vm3, %v1630_v56 }
 0x16e   : > { %v742_v50 = vpop.f32.mrf.mxu1  ;;  %v5595_v31 = vadd.f32 %v1064_v13, %v735_v36  ;;  %4414 = vmatmul.mubr.msk.bf16.gmra.mxu1 %vm299_vm3, %v5254_v40  ;;  %4499 = vmatprep.mubr.msk.bf16.mxu0 %vm4904_vm2, %v4902_v1 }
 0x16f   : > { %v4313_v6 = vpop.f32.mrf.mxu0  ;;  %4417 = vmatprep.mubr.msk.bf16.mxu1 %vm4904_vm2, %v4902_v1  ;;  %v743_v35 = vadd.f32 %v742_v50, %v5445_v17 }
 0x170   : > { %v4231_v30 = vpop.f32.mrf.mxu1 }
 0x171   : > { %v1067_v25 = vpop.f32.mrf.mxu0 }
 0x172   : > { %v745_v29 = vpop.f32.mrf.mxu1  ;;  %v5606_v20 = vadd.f32 %v1067_v25, %v738_v18  ;;  %v1607_v18 = vld [vmem:[%s4959_s23 + $0xfb] sm:$0xff] }
 0x173   : > { %v4314_v40 = vpop.f32.mrf.mxu0  ;;  %v746_v17 = vadd.f32 %v745_v29, %v5458_v2  ;;  %v1606_v2 = vld [vmem:[%s4959_s23 + $0xf3] sm:$0xff] }
 0x174   : > { %v4232_v3 = vpop.f32.mrf.mxu1  ;;  %v1633_v29 = vpack.c.bf16 %v1607_v18, %v1606_v2  ;;  %v1611_v18 = vld [vmem:[%s4959_s23 + $0x11b] sm:$0xff] }
 0x175   : > { %v1072_v63 = vpop.f32.mrf.mxu0  ;;  %4500 = vmatmul.mubr.msk.bf16.gmra.mxu0 %vm299_vm3, %v1631_v52 }
 0x176   : > { %v750_v46 = vpop.f32.mrf.mxu1  ;;  %v5610_v28 = vadd.f32 %v1072_v63, %v743_v35  ;;  %4418 = vmatmul.mubr.msk.bf16.gmra.mxu1 %vm299_vm3, %v5273_v53  ;;  %4503 = vmatprep.mubr.msk.bf16.mxu0 %vm4904_vm2, %v4902_v1 }
 0x177   : > { %v4317_v4 = vpop.f32.mrf.mxu0  ;;  %4421 = vmatprep.mubr.msk.bf16.mxu1 %vm4904_vm2, %v4902_v1  ;;  %v751_v13 = vadd.f32 %v750_v46, %v5460_v0 }
 0x178   : > { %v4235_v56 = vpop.f32.mrf.mxu1  ;;  %v1609_v4 = vld [vmem:[%s4959_s23 + $0x10b] sm:$0xff] }
 0x179   : > { %v1075_v57 = vpop.f32.mrf.mxu0 }
 0x17a   : > { %v753_v36 = vpop.f32.mrf.mxu1  ;;  %v5621_v42 = vadd.f32 %v1075_v57, %v746_v17 }
 0x17b   : > { %v4318_v53 = vpop.f32.mrf.mxu0  ;;  %v754_v0 = vadd.f32 %v753_v36, %v5471_v5  ;;  %v1608_v5 = vld [vmem:[%s4959_s23 + $0x103] sm:$0xff] }
 0x17c   : > { %v4236_v50 = vpop.f32.mrf.mxu1 }
 0x17d   : > { %v1080_v27 = vpop.f32.mrf.mxu0  ;;  %4504 = vmatmul.mubr.msk.bf16.gmra.mxu0 %vm299_vm3, %v1632_v32  ;;  %v1634_v32 = vpack.c.bf16 %v1609_v4, %v1608_v5  ;;  %v1613_v5 = vld [vmem:[%s4959_s23 + $0x12b] sm:$0xff] }
 0x17e   : > { %v758_v62 = vpop.f32.mrf.mxu1  ;;  %v5625_v6 = vadd.f32 %v1080_v27, %v751_v13  ;;  %4422 = vmatmul.mubr.msk.bf16.gmra.mxu1 %vm299_vm3, %v5294_v8  ;;  %4507 = vmatprep.mubr.msk.bf16.mxu0 %vm4904_vm2, %v4902_v1 }
 0x17f   : > { %v4321_v30 = vpop.f32.mrf.mxu0  ;;  %4425 = vmatprep.mubr.msk.bf16.mxu1 %vm4904_vm2, %v4902_v1  ;;  %v759_v3 = vadd.f32 %v758_v62, %v5260_v43 }
 0x180   : > { %v4239_v25 = vpop.f32.mrf.mxu1 }
 0x181   : > { %v1083_v52 = vpop.f32.mrf.mxu0 }
 0x182   : > { %v761_v40 = vpop.f32.mrf.mxu1  ;;  %v5636_v35 = vadd.f32 %v1083_v52, %v754_v0 }
 0x183   : > { %v4322_v8 = vpop.f32.mrf.mxu0  ;;  %v762_v43 = vadd.f32 %v761_v40, %v5275_v54  ;;  %v1610_v54 = vld [vmem:[%s4959_s23 + $0x113] sm:$0xff] }
 0x184   : > { %v4240_v63 = vpop.f32.mrf.mxu1  ;;  %v1635_v52 = vpack.c.bf16 %v1611_v18, %v1610_v54 }
 0x185   : > { %v1088_v46 = vpop.f32.mrf.mxu0  ;;  %4508 = vmatmul.mubr.msk.bf16.gmra.mxu0 %vm299_vm3, %v1633_v29 }
 0x186   : > { %v766_v44 = vpop.f32.mrf.mxu1  ;;  %v5640_v19 = vadd.f32 %v1088_v46, %v759_v3  ;;  %4426 = vmatmul.mubr.msk.bf16.gmra.mxu1 %vm299_vm3, %v5315_v24  ;;  %4511 = vmatprep.mubr.msk.bf16.mxu0 %vm4904_vm2, %v4902_v1 }
 0x187   : > { %v4325_v17 = vpop.f32.mrf.mxu0  ;;  %4429 = vmatprep.mubr.msk.bf16.mxu1 %vm4904_vm2, %v4902_v1  ;;  %v767_v13 = vadd.f32 %v766_v44, %v5281_v60 }
 0x188   : > { %v4243_v56 = vpop.f32.mrf.mxu1 }
 0x189   : > { %v1091_v57 = vpop.f32.mrf.mxu0 }
 0x18a   : > { %v769_v36 = vpop.f32.mrf.mxu1  ;;  %v5651_v53 = vadd.f32 %v1091_v57, %v762_v43 }
 0x18b   : > { %v4326_v24 = vpop.f32.mrf.mxu0  ;;  %v770_v60 = vadd.f32 %v769_v36, %v5296_v9  ;;  %v1612_v9 = vld [vmem:[%s4959_s23 + $0x123] sm:$0xff] }
 0x18c   : > { %v4244_v50 = vpop.f32.mrf.mxu1  ;;  %v1636_v56 = vpack.c.bf16 %v1613_v5, %v1612_v9  ;;  %v1617_v9 = vld [vmem:[%s4959_s23 + $0x14b] sm:$0xff] }
 0x18d   : > { %v1096_v27 = vpop.f32.mrf.mxu0  ;;  %4512 = vmatmul.mubr.msk.bf16.gmra.mxu0 %vm299_vm3, %v1634_v32 }
 0x18e   : > { %v774_v62 = vpop.f32.mrf.mxu1  ;;  %v5655_v2 = vadd.f32 %v1096_v27, %v767_v13  ;;  %4430 = vmatmul.mubr.msk.bf16.gmra.mxu1 %vm299_vm3, %v5336_v47  ;;  %4515 = vmatprep.mubr.msk.bf16.mxu0 %vm4904_vm2, %v4902_v1 }
 0x18f   : > { %v4329_v30 = vpop.f32.mrf.mxu0  ;;  %4433 = vmatprep.mubr.msk.bf16.mxu1 %vm4904_vm2, %v4902_v1  ;;  %v775_v8 = vadd.f32 %v774_v62, %v5302_v15  ;;  %v1615_v62 = vld [vmem:[%s4959_s23 + $0x13b] sm:$0xff] }
 0x190   : > { %v4247_v0 = vpop.f32.mrf.mxu1 }
 0x191   : > { %v1099_v25 = vpop.f32.mrf.mxu0 }
 0x192   : > { %v777_v29 = vpop.f32.mrf.mxu1  ;;  %v5666_v40 = vadd.f32 %v1099_v25, %v770_v60 }
 0x193   : > { %v4330_v47 = vpop.f32.mrf.mxu0  ;;  %v778_v15 = vadd.f32 %v777_v29, %v5317_v26  ;;  %v1614_v26 = vld [vmem:[%s4959_s23 + $0x133] sm:$0xff] }
 0x194   : > { %v4248_v3 = vpop.f32.mrf.mxu1  ;;  %v1637_v0 = vpack.c.bf16 %v1615_v62, %v1614_v26 }
 0x195   : > { %v1104_v63 = vpop.f32.mrf.mxu0  ;;  %4516 = vmatmul.mubr.msk.bf16.gmra.mxu0 %vm299_vm3, %v1635_v52 }
 0x196   : > { %v782_v46 = vpop.f32.mrf.mxu1  ;;  %v5670_v44 = vadd.f32 %v1104_v63, %v775_v8  ;;  %4434 = vmatmul.mubr.msk.bf16.gmra.mxu1 %vm299_vm3, %v5357_v11  ;;  %4519 = vmatprep.mubr.msk.bf16.mxu0 %vm4904_vm2, %v4902_v1 }
 0x197   : > { %v4333_v4 = vpop.f32.mrf.mxu0  ;;  %4437 = vmatprep.mubr.msk.bf16.mxu1 %vm4904_vm2, %v4902_v1  ;;  %v783_v36 = vadd.f32 %v782_v46, %v5323_v34  ;;  %v1246_v34 = vld [vmem:[%s4959_s23 + $0x14a] sm:$0xff] }
 0x198   : > { %v4251_v17 = vpop.f32.mrf.mxu1  ;;  %v1267_v52 = vpack.c.bf16 %v1246_v34, %v5391_v61  ;;  %v1616_v46 = vld [vmem:[%s4959_s23 + $0x143] sm:$0xff]  ;;  %v1247_v61 = vld [vmem:[%s4959_s23 + $0x152] sm:$0xff] }
 0x199   : > { %v1107_v43 = vpop.f32.mrf.mxu0  ;;  %v1638_v17 = vpack.c.bf16 %v1617_v9, %v1616_v46  ;;  %v1950_v34 = vld [vmem:[%s4959_s23 + $0x1c] sm:$0xff]  ;;  %v6534_v46 = vld [vmem:[#allocation4_spill] sm:$0xff] }
 0x19a   : > { %v785_v57 = vpop.f32.mrf.mxu1  ;;  %v5681_v32 = vadd.f32 %v1107_v43, %v778_v15 }
 0x19b   : > { %v4334_v11 = vpop.f32.mrf.mxu0  ;;  %v786_v18 = vadd.f32 %v785_v57, %v5338_v48  ;;  %v1268_v57 = vpack.c.bf16 %v1247_v61, %v1247_v61 }
 0x19c   : > { %v4252_v24 = vpop.f32.mrf.mxu1 }
 0x19d   : > { %v1112_v13 = vpop.f32.mrf.mxu0  ;;  %4520 = vmatmul.mubr.msk.bf16.gmra.mxu0 %vm299_vm3, %v1636_v56 }
 0x19e   : > { %v790_v50 = vpop.f32.mrf.mxu1  ;;  %v5685_v27 = vadd.f32 %v1112_v13, %v783_v36  ;;  %4438 = vmatmul.mubr.msk.bf16.gmra.mxu1 %vm299_vm3, %v5377_v37  ;;  %4523 = vmatprep.mubr.msk.bf16.mxu0 %vm4904_vm2, %v4902_v1 }
 0x19f   : > { %v4337_v54 = vpop.f32.mrf.mxu0  ;;  %4441 = vmatprep.mubr.msk.bf16.mxu1 %vm4904_vm2, %v4902_v1  ;;  %v791_v47 = vadd.f32 %v790_v50, %v5344_v58 }
 0x1a0   : > { %v4255_v30 = vpop.f32.mrf.mxu1  ;;  %v1949_v54 = vld [vmem:[%s4959_s23 + $0x14] sm:$0xff] }
 0x1a1   : > { %v1115_v60 = vpop.f32.mrf.mxu0 }
 0x1a2   : > { %v793_v25 = vpop.f32.mrf.mxu1  ;;  %v5697_v37 = vadd.f32 %v1115_v60, %v786_v18  ;;  %v3860_v60 = vld [vmem:[%s6517_s1 + $0xe] sm:$0x3] }
 0x1a3   : > { %v4338_v29 = vpop.f32.mrf.mxu0  ;;  %v794_v58 = vadd.f32 %v793_v25, %v5359_v12  ;;  %v1618_v12 = vld [vmem:[%s4959_s23 + $0x153] sm:$0xff] }
 0x1a4   : > { %v4256_v8 = vpop.f32.mrf.mxu1  ;;  %v1639_v25 = vpack.c.bf16 %v1618_v12, %v1618_v12 }
 0x1a5   : > { %v1120_v3 = vpop.f32.mrf.mxu0  ;;  %4524 = vmatmul.mubr.msk.bf16.gmra.mxu0 %vm299_vm3, %v1637_v0 }
 0x1a6   : > { %v798_v63 = vpop.f32.mrf.mxu1  ;;  %v5702_v48 = vadd.f32 %v1120_v3, %v791_v47  ;;  %4442 = vmatmul.mubr.msk.bf16.gmra.mxu1 %vm299_vm3, %v1267_v52  ;;  %4527 = vmatprep.mubr.msk.bf16.mxu0 %vm4904_vm2, %v4902_v1  ;;  %v1990_v47 = vpack.c.bf16 %v1950_v34, %v1949_v54  ;;  %v6533_v3 = vld [vmem:[#allocation2_spill] sm:$0xff] }
 0x1a7   : > { %v4341_v5 = vpop.f32.mrf.mxu0  ;;  %4445 = vmatprep.mubr.msk.bf16.mxu1 %vm4904_vm2, %v4902_v1  ;;  %v799_v36 = vadd.f32 %v798_v63, %v5365_v21  ;;  %v6532_v21 = vld [vmem:[#allocation3_spill] sm:$0xff]  ;;  %v2819_v63 = vand.u32 %v3860_v60, %v6533_v3 }
 0x1a8   : > { %v4259_v4 = vpop.f32.mrf.mxu1 }
 0x1a9   : > { %v1123_v15 = vpop.f32.mrf.mxu0 }
 0x1aa   : > { %v801_v43 = vpop.f32.mrf.mxu1  ;;  %v5713_v56 = vadd.f32 %v1123_v15, %v794_v58  ;;  %v1951_v15 = vld [vmem:[%s4959_s23 + $0x24] sm:$0xff] }
 0x1ab   : > { %v4342_v11 = vpop.f32.mrf.mxu0  ;;  %v802_v18 = vadd.f32 %v801_v43, %v6532_v21  ;;  %v6536_v21 = vld [vmem:[#allocation6_spill] sm:$0xff] }
 0x1ac   : > { %v4260_v24 = vpop.f32.mrf.mxu1  ;;  %v6535_v11 = vld [vmem:[#allocation5_spill] sm:$0xff] }
 0x1ad   : > { %v1128_v13 = vpop.f32.mrf.mxu0  ;;  %4528 = vmatmul.mubr.msk.bf16.gmra.mxu0 %vm299_vm3, %v1638_v17  ;;  %v1952_v17 = vld [vmem:[%s4959_s23 + $0x2c] sm:$0xff] }
 0x1ae   : > { %v806_v50 = vpop.f32.mrf.mxu1  ;;  %v5717_v26 = vadd.f32 %v1128_v13, %v799_v36  ;;  %4446 = vmatmul.mubr.msk.bf16.gmra.mxu1 %vm299_vm3, %v1268_v57  ;;  %4531 = vmatprep.mubr.msk.bf16.mxu0 %vm4904_vm2, %v4902_v1  ;;  %v3882_v57 = vld [vmem:[%s6517_s1 + $0x10] sm:$0x3] }
 0x1af   : > { %v4345_v62 = vpop.f32.mrf.mxu0  ;;  %4537 = vmatprep.mubr.msk.bf16.mxu1 %vm4904_vm2, %v4902_v1  ;;  %v807_v9 = vadd.f32 %v806_v50, %v6534_v46  ;;  %v1991_v50 = vpack.c.bf16 %v1952_v17, %v1951_v15  ;;  %v3190_v54 = vand.u32 %v3882_v57, %v6533_v3  ;;  %v6537_v3 = vld [vmem:[#allocation7_spill] sm:$0xff]  ;;  %v6538_v17 = vld [vmem:[#allocation8_spill] sm:$0xff] }
 0x1b0   : > { %v4263_v30 = vpop.f32.mrf.mxu1 }
 0x1b1   : > { %v1131_v0 = vpop.f32.mrf.mxu0 }
 0x1b2   : > { %v809_v52 = vpop.f32.mrf.mxu1  ;;  %v5731_v29 = vadd.f32 %v1131_v0, %v802_v18 }
 0x1b3   : > { %v4346_v8 = vpop.f32.mrf.mxu0  ;;  %v810_v36 = vadd.f32 %v809_v52, %v6535_v11  ;;  %v1953_v52 = vld [vmem:[%s4959_s23 + $0x34] sm:$0xff] }
 0x1b4   : > { %v4264_v5 = vpop.f32.mrf.mxu1 }
 0x1b5   : > { %v1136_v61 = vpop.f32.mrf.mxu0  ;;  %4532 = vmatmul.mubr.msk.bf16.gmra.mxu0 %vm299_vm3, %v1639_v25 }
 0x1b6   : > { %v814_v58 = vpop.f32.mrf.mxu1  ;;  %v5736_v4 = vadd.f32 %v1136_v61, %v807_v9  ;;  %4538 = vmatmul.mubr.msk.bf16.vlgmr.msra.gmra.mxu1 %vm299_vm3, %v1990_v47  ;;  %4623 = vmatprep.mubr.msk.bf16.mxu0 %vm4904_vm2, %v4902_v1  ;;  %v1954_v47 = vld [vmem:[%s4959_s23 + $0x3c] sm:$0xff] }
 0x1b7   : > { %v4349_v43 = vpop.f32.mrf.mxu0  ;;  %4708 = vmatpush3.bf16.msra.mxu1 %v2819_v63  ;;  %4541 = vmatprep.mubr.msk.bf16.mxu1 %vm4904_vm2, %v4902_v1  ;;  %v815_v18 = vadd.f32 %v814_v58, %v6536_v21  ;;  %v1992_v5 = vpack.c.bf16 %v1954_v47, %v1953_v52  ;;  %v6540_v47 = vld [vmem:[#allocation10_spill] sm:$0xff] }
 0x1b8   : > { %v4267_v24 = vpop.f32.mrf.mxu1 }
 0x1b9   : > { %v1139_v13 = vpop.f32.mrf.mxu0 }
 0x1ba   : > { %v817_v12 = vpop.f32.mrf.mxu1  ;;  %v5749_v62 = vadd.f32 %v1139_v13, %v810_v36  ;;  %v1955_v13 = vld [vmem:[%s4959_s23 + $0x44] sm:$0xff] }
 0x1bb   : > { %v4350_v34 = vpop.f32.mrf.mxu0  ;;  %v818_v63 = vadd.f32 %v817_v12, %v6537_v3 }
 0x1bc   : > { %v4268_v30 = vpop.f32.mrf.mxu1 }
 0x1bd   : > { %v1144_v60 = vpop.f32.mrf.mxu0  ;;  %4624 = vmatmul.mubr.msk.bf16.vlgmr.msra.gmra.mxu0 %vm299_vm3, %v1991_v50 }
 0x1be   : > { %v822_v0 = vpop.f32.mrf.mxu1  ;;  %v5754_v25 = vadd.f32 %v1144_v60, %v815_v18  ;;  %4542 = vmatmul.mubr.msk.bf16.gmra.mxu1 %vm299_vm3, %v1991_v50  ;;  %4794 = vmatpush3.bf16.msra.mxu0 %v3190_v54  ;;  %v1956_v50 = vld [vmem:[%s4959_s23 + $0x4c] sm:$0xff]  ;;  %v6539_v54 = vld [vmem:[#allocation9_spill] sm:$0xff] }
 0x1bf   : > { %v4353_v8 = vpop.f32.mrf.mxu0  ;;  %4545 = vmatprep.mubr.msk.bf16.mxu1 %vm4904_vm2, %v4902_v1  ;;  %4627 = vmatprep.mubr.msk.bf16.mxu0 %vm4904_vm2, %v4902_v1  ;;  %v823_v43 = vadd.f32 %v822_v0, %v6538_v17  ;;  %v1993_v30 = vpack.c.bf16 %v1956_v50, %v1955_v13 }
 0x1c0   : > { %v4271_v46 = vpop.f32.mrf.mxu1 }
 0x1c1   : > { %v1147_v9 = vpop.f32.mrf.mxu0 }
 0x1c2   : > { %v825_v61 = vpop.f32.mrf.mxu1  ;;  %v5764_v58 = vadd.f32 %v1147_v9, %v818_v63 }
 0x1c3   : > { %v4354_v15 = vpop.f32.mrf.mxu0  ;;  %v826_v34 = vadd.f32 %v825_v61, %v6539_v54  ;;  %v1958_v61 = vld [vmem:[%s4959_s23 + $0x5c] sm:$0xff] }
 0x1c4   : > { %v4272_v57 = vpop.f32.mrf.mxu1  ;;  %v6541_v15 = vld [vmem:[#allocation11_spill] sm:$0xff] }
 0x1c5   : > { %v1152_v11 = vpop.f32.mrf.mxu0  ;;  %4628 = vmatmul.mubr.msk.bf16.gmra.mxu0 %vm299_vm3, %v1992_v5 }
 0x1c6   : > { %v830_v36 = vpop.f32.mrf.mxu1  ;;  %v5768_v24 = vadd.f32 %v1152_v11, %v823_v43  ;;  %4546 = vmatmul.mubr.msk.bf16.gmra.mxu1 %vm299_vm3, %v1992_v5  ;;  %4631 = vmatprep.mubr.msk.bf16.mxu0 %vm4904_vm2, %v4902_v1  ;;  %v1957_v5 = vld [vmem:[%s4959_s23 + $0x54] sm:$0xff] }
 0x1c7   : > { %v4357_v12 = vpop.f32.mrf.mxu0  ;;  %4549 = vmatprep.mubr.msk.bf16.mxu1 %vm4904_vm2, %v4902_v1  ;;  %v831_v8 = vadd.f32 %v830_v36, %v6540_v47  ;;  %v1994_v36 = vpack.c.bf16 %v1958_v61, %v1957_v5 }
 0x1c8   : > { %v4275_v21 = vpop.f32.mrf.mxu1 }
 0x1c9   : > { %v1155_v18 = vpop.f32.mrf.mxu0 }
 0x1ca   : > { %v833_v60 = vpop.f32.mrf.mxu1  ;;  %v5778_v0 = vadd.f32 %v1155_v18, %v826_v34 }
 0x1cb   : > { %v4358_v52 = vpop.f32.mrf.mxu0  ;;  %v1960_v60 = vld [vmem:[%s4959_s23 + $0x6c] sm:$0xff] }
 0x1cc   : > { %v4276_v3 = vpop.f32.mrf.mxu1 }
 0x1cd   : > { %v1160_v63 = vpop.f32.mrf.mxu0  ;;  %4632 = vmatmul.mubr.msk.bf16.gmra.mxu0 %vm299_vm3, %v1993_v30 }
 0x1ce   : > { %v5782_v46 = vadd.f32 %v1160_v63, %v831_v8  ;;  %v1371_v9 = vpop.f32.mrf.mxu1  ;;  %4550 = vmatmul.mubr.msk.bf16.gmra.mxu1 %vm299_vm3, %v1993_v30  ;;  %4635 = vmatprep.mubr.msk.bf16.mxu0 %vm4904_vm2, %v4902_v1  ;;  %v1959_v30 = vld [vmem:[%s4959_s23 + $0x64] sm:$0xff] }
 0x1cf   : > { %v1537_v17 = vadd.f32 %v1371_v9, %v6541_v15  ;;  %v4361_v43 = vpop.f32.mrf.mxu0  ;;  %4553 = vmatprep.mubr.msk.bf16.mxu1 %vm4904_vm2, %v4902_v1  ;;  %v1995_v3 = vpack.c.bf16 %v1960_v60, %v1959_v30 }
 0x1d0   : > { %v4367_v57 = vpop.f32.mrf.mxu1 }
 0x1d1   : > { %v1163_v11 = vpop.f32.mrf.mxu0  ;;  %v1961_v57 = vld [vmem:[%s4959_s23 + $0x74] sm:$0xff] }
 0x1d2   : > { %v1374_v13 = vpop.f32.mrf.mxu1  ;;  %v1962_v11 = vld [vmem:[%s4959_s23 + $0x7c] sm:$0xff] }
 0x1d3   : > { %v1538_v50 = vadd.f32 %v1374_v13, %v5486_v41  ;;  %v4362_v12 = vpop.f32.mrf.mxu0 }
 0x1d4   : > { %v4368_v54 = vpop.f32.mrf.mxu1  ;;  %v1996_v12 = vpack.c.bf16 %v1962_v11, %v1961_v57 }
 0x1d5   : > { %v1742_v34 = vpop.f32.mrf.mxu0  ;;  %4636 = vmatmul.mubr.msk.bf16.gmra.mxu0 %vm299_vm3, %v1994_v36 }
 0x1d6   : > { %v1379_v21 = vpop.f32.mrf.mxu1  ;;  %v5794_v18 = vadd.f32 %v1742_v34, %v1537_v17  ;;  %4554 = vmatmul.mubr.msk.bf16.gmra.mxu1 %vm299_vm3, %v1994_v36  ;;  %4639 = vmatprep.mubr.msk.bf16.mxu0 %vm4904_vm2, %v4902_v1 }
 0x1d7   : > { %v1539_v52 = vadd.f32 %v1379_v21, %v5490_v38  ;;  %v4453_v47 = vpop.f32.mrf.mxu0  ;;  %4557 = vmatprep.mubr.msk.bf16.mxu1 %vm4904_vm2, %v4902_v1 }
 0x1d8   : > { %v4371_v41 = vpop.f32.mrf.mxu1 }
 0x1d9   : > { %v1745_v8 = vpop.f32.mrf.mxu0  ;;  %v1963_v41 = vld [vmem:[%s4959_s23 + $0x84] sm:$0xff] }
 0x1da   : > { %v1382_v63 = vpop.f32.mrf.mxu1  ;;  %v5804_v9 = vadd.f32 %v1745_v8, %v1538_v50  ;;  %v1964_v8 = vld [vmem:[%s4959_s23 + $0x8c] sm:$0xff] }
 0x1db   : > { %v1540_v5 = vadd.f32 %v1382_v63, %v5501_v39  ;;  %v4454_v61 = vpop.f32.mrf.mxu0 }
 0x1dc   : > { %v4372_v15 = vpop.f32.mrf.mxu1  ;;  %v1997_v61 = vpack.c.bf16 %v1964_v8, %v1963_v41 }
 0x1dd   : > { %v1750_v17 = vpop.f32.mrf.mxu0  ;;  %4640 = vmatmul.mubr.msk.bf16.gmra.mxu0 %vm299_vm3, %v1995_v3 }
 0x1de   : > { %v1387_v38 = vpop.f32.mrf.mxu1  ;;  %v5808_v43 = vadd.f32 %v1750_v17, %v1539_v52  ;;  %4558 = vmatmul.mubr.msk.bf16.gmra.mxu1 %vm299_vm3, %v1995_v3  ;;  %4643 = vmatprep.mubr.msk.bf16.mxu0 %vm4904_vm2, %v4902_v1 }
 0x1df   : > { %v1541_v36 = vadd.f32 %v1387_v38, %v5505_v45  ;;  %v4457_v13 = vpop.f32.mrf.mxu0  ;;  %4561 = vmatprep.mubr.msk.bf16.mxu1 %vm4904_vm2, %v4902_v1 }
 0x1e0   : > { %v4375_v39 = vpop.f32.mrf.mxu1 }
 0x1e1   : > { %v1753_v50 = vpop.f32.mrf.mxu0  ;;  %v1965_v39 = vld [vmem:[%s4959_s23 + $0x94] sm:$0xff] }
 0x1e2   : > { %v1390_v54 = vpop.f32.mrf.mxu1  ;;  %v5818_v34 = vadd.f32 %v1753_v50, %v1540_v5  ;;  %v1966_v50 = vld [vmem:[%s4959_s23 + $0x9c] sm:$0xff] }
 0x1e3   : > { %v1542_v21 = vadd.f32 %v1390_v54, %v5516_v55  ;;  %v4458_v30 = vpop.f32.mrf.mxu0 }
 0x1e4   : > { %v4376_v60 = vpop.f32.mrf.mxu1  ;;  %v1998_v30 = vpack.c.bf16 %v1966_v50, %v1965_v39 }
 0x1e5   : > { %v1758_v52 = vpop.f32.mrf.mxu0  ;;  %4644 = vmatmul.mubr.msk.bf16.gmra.mxu0 %vm299_vm3, %v1996_v12 }
 0x1e6   : > { %v1395_v45 = vpop.f32.mrf.mxu1  ;;  %v5822_v47 = vadd.f32 %v1758_v52, %v1541_v36  ;;  %4562 = vmatmul.mubr.msk.bf16.gmra.mxu1 %vm299_vm3, %v1996_v12  ;;  %4647 = vmatprep.mubr.msk.bf16.mxu0 %vm4904_vm2, %v4902_v1 }
 0x1e7   : > { %v1543_v3 = vadd.f32 %v1395_v45, %v5520_v16  ;;  %v4461_v63 = vpop.f32.mrf.mxu0  ;;  %4565 = vmatprep.mubr.msk.bf16.mxu1 %vm4904_vm2, %v4902_v1 }
 0x1e8   : > { %v4379_v55 = vpop.f32.mrf.mxu1 }
 0x1e9   : > { %v1761_v5 = vpop.f32.mrf.mxu0  ;;  %v1967_v55 = vld [vmem:[%s4959_s23 + $0xa4] sm:$0xff] }
 0x1ea   : > { %v1398_v15 = vpop.f32.mrf.mxu1  ;;  %v5832_v17 = vadd.f32 %v1761_v5, %v1542_v21  ;;  %v1968_v5 = vld [vmem:[%s4959_s23 + $0xac] sm:$0xff] }
 0x1eb   : > { %v1544_v38 = vadd.f32 %v1398_v15, %v5531_v14  ;;  %v4462_v57 = vpop.f32.mrf.mxu0 }
 0x1ec   : > { %v4380_v11 = vpop.f32.mrf.mxu1  ;;  %v1999_v57 = vpack.c.bf16 %v1968_v5, %v1967_v55 }
 0x1ed   : > { %v1766_v36 = vpop.f32.mrf.mxu0  ;;  %4648 = vmatmul.mubr.msk.bf16.gmra.mxu0 %vm299_vm3, %v1997_v61 }
 0x1ee   : > { %v1403_v16 = vpop.f32.mrf.mxu1  ;;  %v5836_v13 = vadd.f32 %v1766_v36, %v1543_v3  ;;  %4566 = vmatmul.mubr.msk.bf16.gmra.mxu1 %vm299_vm3, %v1997_v61  ;;  %4651 = vmatprep.mubr.msk.bf16.mxu0 %vm4904_vm2, %v4902_v1 }
 0x1ef   : > { %v1545_v12 = vadd.f32 %v1403_v16, %v5535_v22  ;;  %v4465_v54 = vpop.f32.mrf.mxu0  ;;  %4569 = vmatprep.mubr.msk.bf16.mxu1 %vm4904_vm2, %v4902_v1 }
 0x1f0   : > { %v4383_v14 = vpop.f32.mrf.mxu1 }
 0x1f1   : > { %v1769_v21 = vpop.f32.mrf.mxu0  ;;  %v1969_v14 = vld [vmem:[%s4959_s23 + $0xb4] sm:$0xff] }
 0x1f2   : > { %v1406_v60 = vpop.f32.mrf.mxu1  ;;  %v5846_v52 = vadd.f32 %v1769_v21, %v1544_v38  ;;  %v1970_v21 = vld [vmem:[%s4959_s23 + $0xbc] sm:$0xff] }
 0x1f3   : > { %v1546_v45 = vadd.f32 %v1406_v60, %v5546_v51  ;;  %v4466_v41 = vpop.f32.mrf.mxu0 }
 0x1f4   : > { %v4384_v8 = vpop.f32.mrf.mxu1  ;;  %v2000_v41 = vpack.c.bf16 %v1970_v21, %v1969_v14 }
 0x1f5   : > { %v1774_v3 = vpop.f32.mrf.mxu0  ;;  %4652 = vmatmul.mubr.msk.bf16.gmra.mxu0 %vm299_vm3, %v1998_v30 }
 0x1f6   : > { %v1411_v22 = vpop.f32.mrf.mxu1  ;;  %v5850_v63 = vadd.f32 %v1774_v3, %v1545_v12  ;;  %4570 = vmatmul.mubr.msk.bf16.gmra.mxu1 %vm299_vm3, %v1998_v30  ;;  %4655 = vmatprep.mubr.msk.bf16.mxu0 %vm4904_vm2, %v4902_v1 }
 0x1f7   : > { %v1547_v61 = vadd.f32 %v1411_v22, %v5550_v7  ;;  %v4469_v15 = vpop.f32.mrf.mxu0  ;;  %4573 = vmatprep.mubr.msk.bf16.mxu1 %vm4904_vm2, %v4902_v1 }
 0x1f8   : > { %v4387_v51 = vpop.f32.mrf.mxu1 }
 0x1f9   : > { %v1777_v38 = vpop.f32.mrf.mxu0  ;;  %v1971_v51 = vld [vmem:[%s4959_s23 + $0xc4] sm:$0xff] }
 0x1fa   : > { %v1414_v11 = vpop.f32.mrf.mxu1  ;;  %v5860_v36 = vadd.f32 %v1777_v38, %v1546_v45  ;;  %v1972_v38 = vld [vmem:[%s4959_s23 + $0xcc] sm:$0xff] }
 0x1fb   : > { %v1548_v16 = vadd.f32 %v1414_v11, %v5561_v59  ;;  %v4470_v39 = vpop.f32.mrf.mxu0 }
 0x1fc   : > { %v4388_v50 = vpop.f32.mrf.mxu1  ;;  %v2001_v39 = vpack.c.bf16 %v1972_v38, %v1971_v51 }
 0x1fd   : > { %v1782_v12 = vpop.f32.mrf.mxu0  ;;  %4656 = vmatmul.mubr.msk.bf16.gmra.mxu0 %vm299_vm3, %v1999_v57 }
 0x1fe   : > { %v1419_v7 = vpop.f32.mrf.mxu1  ;;  %v5864_v54 = vadd.f32 %v1782_v12, %v1547_v61  ;;  %4574 = vmatmul.mubr.msk.bf16.gmra.mxu1 %vm299_vm3, %v1999_v57  ;;  %4659 = vmatprep.mubr.msk.bf16.mxu0 %vm4904_vm2, %v4902_v1 }
 0x1ff   : > { %v1549_v30 = vadd.f32 %v1419_v7, %v5565_v23  ;;  %v4473_v60 = vpop.f32.mrf.mxu0  ;;  %4577 = vmatprep.mubr.msk.bf16.mxu1 %vm4904_vm2, %v4902_v1 }
 0x200   : > { %v4391_v59 = vpop.f32.mrf.mxu1 }
 0x201   : > { %v1785_v45 = vpop.f32.mrf.mxu0  ;;  %v1973_v59 = vld [vmem:[%s4959_s23 + $0xd4] sm:$0xff] }
 0x202   : > { %v1422_v8 = vpop.f32.mrf.mxu1  ;;  %v5874_v3 = vadd.f32 %v1785_v45, %v1548_v16  ;;  %v1974_v45 = vld [vmem:[%s4959_s23 + $0xdc] sm:$0xff] }
 0x203   : > { %v1550_v22 = vadd.f32 %v1422_v8, %v5576_v10  ;;  %v4474_v55 = vpop.f32.mrf.mxu0 }
 0x204   : > { %v4392_v5 = vpop.f32.mrf.mxu1  ;;  %v2002_v55 = vpack.c.bf16 %v1974_v45, %v1973_v59 }
 0x205   : > { %v1790_v61 = vpop.f32.mrf.mxu0  ;;  %4660 = vmatmul.mubr.msk.bf16.gmra.mxu0 %vm299_vm3, %v2000_v41 }
 0x206   : > { %v1427_v23 = vpop.f32.mrf.mxu1  ;;  %v5878_v15 = vadd.f32 %v1790_v61, %v1549_v30  ;;  %4578 = vmatmul.mubr.msk.bf16.gmra.mxu1 %vm299_vm3, %v2000_v41  ;;  %4663 = vmatprep.mubr.msk.bf16.mxu0 %vm4904_vm2, %v4902_v1 }
 0x207   : > { %v1551_v57 = vadd.f32 %v1427_v23, %v5580_v33  ;;  %v4477_v11 = vpop.f32.mrf.mxu0  ;;  %4581 = vmatprep.mubr.msk.bf16.mxu1 %vm4904_vm2, %v4902_v1 }
 0x208   : > { %v4395_v10 = vpop.f32.mrf.mxu1 }
 0x209   : > { %v1793_v16 = vpop.f32.mrf.mxu0  ;;  %v1975_v10 = vld [vmem:[%s4959_s23 + $0xe4] sm:$0xff] }
 0x20a   : > { %v1430_v50 = vpop.f32.mrf.mxu1  ;;  %v5888_v12 = vadd.f32 %v1793_v16, %v1550_v22  ;;  %v1976_v16 = vld [vmem:[%s4959_s23 + $0xec] sm:$0xff] }
 0x20b   : > { %v1552_v7 = vadd.f32 %v1430_v50, %v5591_v49  ;;  %v4478_v14 = vpop.f32.mrf.mxu0 }
 0x20c   : > { %v4396_v21 = vpop.f32.mrf.mxu1  ;;  %v2003_v14 = vpack.c.bf16 %v1976_v16, %v1975_v10 }
 0x20d   : > { %v1798_v30 = vpop.f32.mrf.mxu0  ;;  %4664 = vmatmul.mubr.msk.bf16.gmra.mxu0 %vm299_vm3, %v2001_v39 }
 0x20e   : > { %v1435_v33 = vpop.f32.mrf.mxu1  ;;  %v5892_v60 = vadd.f32 %v1798_v30, %v1551_v57  ;;  %4582 = vmatmul.mubr.msk.bf16.gmra.mxu1 %vm299_vm3, %v2001_v39  ;;  %4667 = vmatprep.mubr.msk.bf16.mxu0 %vm4904_vm2, %v4902_v1 }
 0x20f   : > { %v1553_v41 = vadd.f32 %v1435_v33, %v5595_v31  ;;  %v4481_v8 = vpop.f32.mrf.mxu0  ;;  %4585 = vmatprep.mubr.msk.bf16.mxu1 %vm4904_vm2, %v4902_v1 }
 0x210   : > { %v4399_v49 = vpop.f32.mrf.mxu1 }
 0x211   : > { %v1801_v22 = vpop.f32.mrf.mxu0  ;;  %v1977_v49 = vld [vmem:[%s4959_s23 + $0xf4] sm:$0xff] }
 0x212   : > { %v1438_v5 = vpop.f32.mrf.mxu1  ;;  %v5902_v61 = vadd.f32 %v1801_v22, %v1552_v7  ;;  %v1978_v22 = vld [vmem:[%s4959_s23 + $0xfc] sm:$0xff] }
 0x213   : > { %v1554_v23 = vadd.f32 %v1438_v5, %v5606_v20  ;;  %v4482_v51 = vpop.f32.mrf.mxu0 }
 0x214   : > { %v4400_v38 = vpop.f32.mrf.mxu1  ;;  %v2004_v51 = vpack.c.bf16 %v1978_v22, %v1977_v49 }
 0x215   : > { %v1806_v57 = vpop.f32.mrf.mxu0  ;;  %4668 = vmatmul.mubr.msk.bf16.gmra.mxu0 %vm299_vm3, %v2002_v55 }
 0x216   : > { %v1443_v31 = vpop.f32.mrf.mxu1  ;;  %v5906_v11 = vadd.f32 %v1806_v57, %v1553_v41  ;;  %4586 = vmatmul.mubr.msk.bf16.gmra.mxu1 %vm299_vm3, %v2002_v55  ;;  %4671 = vmatprep.mubr.msk.bf16.mxu0 %vm4904_vm2, %v4902_v1 }
 0x217   : > { %v1555_v39 = vadd.f32 %v1443_v31, %v5610_v28  ;;  %v4485_v50 = vpop.f32.mrf.mxu0  ;;  %4589 = vmatprep.mubr.msk.bf16.mxu1 %vm4904_vm2, %v4902_v1 }
 0x218   : > { %v4403_v20 = vpop.f32.mrf.mxu1 }
 0x219   : > { %v1809_v7 = vpop.f32.mrf.mxu0  ;;  %v1979_v20 = vld [vmem:[%s4959_s23 + $0x104] sm:$0xff] }
 0x21a   : > { %v1446_v21 = vpop.f32.mrf.mxu1  ;;  %v5916_v30 = vadd.f32 %v1809_v7, %v1554_v23  ;;  %v1980_v7 = vld [vmem:[%s4959_s23 + $0x10c] sm:$0xff] }
 0x21b   : > { %v1556_v33 = vadd.f32 %v1446_v21, %v5621_v42  ;;  %v4486_v59 = vpop.f32.mrf.mxu0 }
 0x21c   : > { %v4404_v45 = vpop.f32.mrf.mxu1  ;;  %v2005_v59 = vpack.c.bf16 %v1980_v7, %v1979_v20 }
 0x21d   : > { %v1814_v41 = vpop.f32.mrf.mxu0  ;;  %4672 = vmatmul.mubr.msk.bf16.gmra.mxu0 %vm299_vm3, %v2003_v14 }
 0x21e   : > { %v1451_v28 = vpop.f32.mrf.mxu1  ;;  %v5920_v8 = vadd.f32 %v1814_v41, %v1555_v39  ;;  %4590 = vmatmul.mubr.msk.bf16.gmra.mxu1 %vm299_vm3, %v2003_v14  ;;  %4675 = vmatprep.mubr.msk.bf16.mxu0 %vm4904_vm2, %v4902_v1 }
 0x21f   : > { %v1557_v55 = vadd.f32 %v1451_v28, %v5625_v6  ;;  %v4489_v5 = vpop.f32.mrf.mxu0  ;;  %4593 = vmatprep.mubr.msk.bf16.mxu1 %vm4904_vm2, %v4902_v1 }
 0x220   : > { %v4407_v42 = vpop.f32.mrf.mxu1 }
 0x221   : > { %v1817_v23 = vpop.f32.mrf.mxu0  ;;  %v1981_v42 = vld [vmem:[%s4959_s23 + $0x114] sm:$0xff] }
 0x222   : > { %v1454_v38 = vpop.f32.mrf.mxu1  ;;  %v5930_v57 = vadd.f32 %v1817_v23, %v1556_v33  ;;  %v1982_v23 = vld [vmem:[%s4959_s23 + $0x11c] sm:$0xff] }
 0x223   : > { %v1558_v31 = vadd.f32 %v1454_v38, %v5636_v35  ;;  %v4490_v10 = vpop.f32.mrf.mxu0 }
 0x224   : > { %v4408_v16 = vpop.f32.mrf.mxu1  ;;  %v2006_v10 = vpack.c.bf16 %v1982_v23, %v1981_v42 }
 0x225   : > { %v1822_v39 = vpop.f32.mrf.mxu0  ;;  %4676 = vmatmul.mubr.msk.bf16.gmra.mxu0 %vm299_vm3, %v2004_v51 }
 0x226   : > { %v1459_v6 = vpop.f32.mrf.mxu1  ;;  %v5934_v50 = vadd.f32 %v1822_v39, %v1557_v55  ;;  %4594 = vmatmul.mubr.msk.bf16.gmra.mxu1 %vm299_vm3, %v2004_v51  ;;  %4679 = vmatprep.mubr.msk.bf16.mxu0 %vm4904_vm2, %v4902_v1 }
 0x227   : > { %v1559_v14 = vadd.f32 %v1459_v6, %v5640_v19  ;;  %v4493_v21 = vpop.f32.mrf.mxu0  ;;  %4597 = vmatprep.mubr.msk.bf16.mxu1 %vm4904_vm2, %v4902_v1 }
 0x228   : > { %v4411_v35 = vpop.f32.mrf.mxu1 }
 0x229   : > { %v1825_v33 = vpop.f32.mrf.mxu0  ;;  %v1983_v35 = vld [vmem:[%s4959_s23 + $0x124] sm:$0xff] }
 0x22a   : > { %v1462_v45 = vpop.f32.mrf.mxu1  ;;  %v5944_v41 = vadd.f32 %v1825_v33, %v1558_v31  ;;  %v1984_v33 = vld [vmem:[%s4959_s23 + $0x12c] sm:$0xff] }
 0x22b   : > { %v1560_v28 = vadd.f32 %v1462_v45, %v5651_v53  ;;  %v4494_v49 = vpop.f32.mrf.mxu0 }
 0x22c   : > { %v4412_v22 = vpop.f32.mrf.mxu1  ;;  %v2007_v49 = vpack.c.bf16 %v1984_v33, %v1983_v35 }
 0x22d   : > { %v1830_v55 = vpop.f32.mrf.mxu0  ;;  %4680 = vmatmul.mubr.msk.bf16.gmra.mxu0 %vm299_vm3, %v2005_v59 }
 0x22e   : > { %v1467_v19 = vpop.f32.mrf.mxu1  ;;  %v5948_v5 = vadd.f32 %v1830_v55, %v1559_v14  ;;  %4598 = vmatmul.mubr.msk.bf16.gmra.mxu1 %vm299_vm3, %v2005_v59  ;;  %4683 = vmatprep.mubr.msk.bf16.mxu0 %vm4904_vm2, %v4902_v1 }
 0x22f   : > { %v1561_v51 = vadd.f32 %v1467_v19, %v5655_v2  ;;  %v4497_v38 = vpop.f32.mrf.mxu0  ;;  %4601 = vmatprep.mubr.msk.bf16.mxu1 %vm4904_vm2, %v4902_v1 }
 0x230   : > { %v4415_v53 = vpop.f32.mrf.mxu1 }
 0x231   : > { %v1833_v31 = vpop.f32.mrf.mxu0  ;;  %v1985_v53 = vld [vmem:[%s4959_s23 + $0x134] sm:$0xff] }
 0x232   : > { %v1470_v16 = vpop.f32.mrf.mxu1  ;;  %v5958_v39 = vadd.f32 %v1833_v31, %v1560_v28  ;;  %v1986_v31 = vld [vmem:[%s4959_s23 + $0x13c] sm:$0xff] }
 0x233   : > { %v1562_v6 = vadd.f32 %v1470_v16, %v5666_v40  ;;  %v4498_v20 = vpop.f32.mrf.mxu0 }
 0x234   : > { %v4416_v7 = vpop.f32.mrf.mxu1  ;;  %v2008_v20 = vpack.c.bf16 %v1986_v31, %v1985_v53 }
 0x235   : > { %v1838_v14 = vpop.f32.mrf.mxu0  ;;  %4684 = vmatmul.mubr.msk.bf16.gmra.mxu0 %vm299_vm3, %v2006_v10 }
 0x236   : > { %v1475_v2 = vpop.f32.mrf.mxu1  ;;  %v5962_v21 = vadd.f32 %v1838_v14, %v1561_v51  ;;  %4602 = vmatmul.mubr.msk.bf16.gmra.mxu1 %vm299_vm3, %v2006_v10  ;;  %4687 = vmatprep.mubr.msk.bf16.mxu0 %vm4904_vm2, %v4902_v1 }
 0x237   : > { %v1563_v59 = vadd.f32 %v1475_v2, %v5670_v44  ;;  %v4501_v45 = vpop.f32.mrf.mxu0  ;;  %4605 = vmatprep.mubr.msk.bf16.mxu1 %vm4904_vm2, %v4902_v1 }
 0x238   : > { %v4419_v40 = vpop.f32.mrf.mxu1 }
 0x239   : > { %v1841_v28 = vpop.f32.mrf.mxu0  ;;  %v1987_v40 = vld [vmem:[%s4959_s23 + $0x144] sm:$0xff] }
 0x23a   : > { %v1478_v22 = vpop.f32.mrf.mxu1  ;;  %v5972_v55 = vadd.f32 %v1841_v28, %v1562_v6  ;;  %v1988_v28 = vld [vmem:[%s4959_s23 + $0x14c] sm:$0xff] }
 0x23b   : > { %v1564_v19 = vadd.f32 %v1478_v22, %v5681_v32  ;;  %v4502_v42 = vpop.f32.mrf.mxu0 }
 0x23c   : > { %v4420_v23 = vpop.f32.mrf.mxu1  ;;  %v2009_v42 = vpack.c.bf16 %v1988_v28, %v1987_v40 }
 0x23d   : > { %v1846_v51 = vpop.f32.mrf.mxu0  ;;  %4688 = vmatmul.mubr.msk.bf16.gmra.mxu0 %vm299_vm3, %v2007_v49 }
 0x23e   : > { %v1483_v44 = vpop.f32.mrf.mxu1  ;;  %v5976_v38 = vadd.f32 %v1846_v51, %v1563_v59  ;;  %4606 = vmatmul.mubr.msk.bf16.gmra.mxu1 %vm299_vm3, %v2007_v49  ;;  %4691 = vmatprep.mubr.msk.bf16.mxu0 %vm4904_vm2, %v4902_v1 }
 0x23f   : > { %v1565_v10 = vadd.f32 %v1483_v44, %v5685_v27  ;;  %v4505_v16 = vpop.f32.mrf.mxu0  ;;  %4609 = vmatprep.mubr.msk.bf16.mxu1 %vm4904_vm2, %v4902_v1 }
 0x240   : > { %v4423_v32 = vpop.f32.mrf.mxu1 }
 0x241   : > { %v1849_v6 = vpop.f32.mrf.mxu0  ;;  %v1989_v32 = vld [vmem:[%s4959_s23 + $0x154] sm:$0xff] }
 0x242   : > { %v1486_v7 = vpop.f32.mrf.mxu1  ;;  %v5986_v14 = vadd.f32 %v1849_v6, %v1564_v19  ;;  %v2359_v6 = vld [vmem:[%s4959_s23 + $0x15c] sm:$0xff] }
 0x243   : > { %v1566_v2 = vadd.f32 %v1486_v7, %v5697_v37  ;;  %v4506_v35 = vpop.f32.mrf.mxu0 }
 0x244   : > { %v4424_v33 = vpop.f32.mrf.mxu1  ;;  %v2380_v35 = vpack.c.bf16 %v2359_v6, %v1989_v32 }
 0x245   : > { %v1854_v59 = vpop.f32.mrf.mxu0  ;;  %4692 = vmatmul.mubr.msk.bf16.gmra.mxu0 %vm299_vm3, %v2008_v20 }
 0x246   : > { %v1491_v27 = vpop.f32.mrf.mxu1  ;;  %v5990_v45 = vadd.f32 %v1854_v59, %v1565_v10  ;;  %4610 = vmatmul.mubr.msk.bf16.gmra.mxu1 %vm299_vm3, %v2008_v20  ;;  %4695 = vmatprep.mubr.msk.bf16.mxu0 %vm4904_vm2, %v4902_v1 }
 0x247   : > { %v1567_v49 = vadd.f32 %v1491_v27, %v5702_v48  ;;  %v4509_v22 = vpop.f32.mrf.mxu0  ;;  %4613 = vmatprep.mubr.msk.bf16.mxu1 %vm4904_vm2, %v4902_v1  ;;  %v2010_v27 = vpack.c.bf16 %v1989_v32, %v1989_v32 }
 0x248   : > { %v4427_v37 = vpop.f32.mrf.mxu1 }
 0x249   : > { %v1857_v19 = vpop.f32.mrf.mxu0 }
 0x24a   : > { %v1494_v23 = vpop.f32.mrf.mxu1  ;;  %v6000_v51 = vadd.f32 %v1857_v19, %v1566_v2  ;;  %v2360_v19 = vld [vmem:[%s4959_s23 + $0x164] sm:$0xff] }
 0x24b   : > { %v1568_v44 = vadd.f32 %v1494_v23, %v5713_v56  ;;  %v4510_v53 = vpop.f32.mrf.mxu0 }
 0x24c   : > { %v4428_v31 = vpop.f32.mrf.mxu1 }
 0x24d   : > { %v1862_v10 = vpop.f32.mrf.mxu0  ;;  %4696 = vmatmul.mubr.msk.bf16.gmra.mxu0 %vm299_vm3, %v2009_v42 }
 0x24e   : > { %v1499_v48 = vpop.f32.mrf.mxu1  ;;  %v6004_v16 = vadd.f32 %v1862_v10, %v1567_v49  ;;  %4614 = vmatmul.mubr.msk.bf16.gmra.mxu1 %vm299_vm3, %v2009_v42  ;;  %4699 = vmatprep.mubr.msk.bf16.mxu0 %vm4904_vm2, %v4902_v1  ;;  %v2381_v10 = vpack.c.bf16 %v2360_v19, %v2360_v19 }
 0x24f   : > { %v1569_v20 = vadd.f32 %v1499_v48, %v5717_v26  ;;  %v4513_v7 = vpop.f32.mrf.mxu0  ;;  %4617 = vmatprep.mubr.msk.bf16.mxu1 %vm4904_vm2, %v4902_v1 }
 0x250   : > { %v4431_v56 = vpop.f32.mrf.mxu1 }
 0x251   : > { %v1865_v2 = vpop.f32.mrf.mxu0 }
 0x252   : > { %v1502_v33 = vpop.f32.mrf.mxu1  ;;  %v6014_v59 = vadd.f32 %v1865_v2, %v1568_v44  ;;  %v2692_v44 = vld [vmem:[%s4959_s23 + $0x2d] sm:$0xff] }
 0x253   : > { %v1570_v40 = vadd.f32 %v1502_v33, %v5731_v29  ;;  %v4514_v28 = vpop.f32.mrf.mxu0  ;;  %v2691_v29 = vld [vmem:[%s4959_s23 + $0x25] sm:$0xff] }
 0x254   : > { %v4432_v49 = vpop.f32.mrf.mxu1  ;;  %v2732_v6 = vpack.c.bf16 %v2692_v44, %v2691_v29  ;;  %v3062_v33 = vld [vmem:[%s4959_s23 + $0x26] sm:$0xff] }
 0x255   : > { %v1870_v22 = vpop.f32.mrf.mxu0  ;;  %4700 = vmatmul.mubr.msk.bf16.gmra.mxu0 %vm299_vm3, %v2380_v35  ;;  %v2694_v49 = vld [vmem:[%s4959_s23 + $0x3d] sm:$0xff] }
 0x256   : > { %v1507_v26 = vpop.f32.mrf.mxu1  ;;  %v6018_v37 = vadd.f32 %v1870_v22, %v1569_v20  ;;  %4618 = vmatmul.mubr.msk.bf16.gmra.mxu1 %vm299_vm3, %v2010_v27  ;;  %4703 = vmatprep.mubr.msk.bf16.mxu0 %vm4904_vm2, %v4902_v1  ;;  %v3063_v27 = vld [vmem:[%s4959_s23 + $0x2e] sm:$0xff] }
 0x257   : > { %v1571_v42 = vadd.f32 %v1507_v26, %v5736_v4  ;;  %v4517_v23 = vpop.f32.mrf.mxu0  ;;  %4709 = vmatprep.mubr.msk.bf16.mxu1 %vm4904_vm2, %v4902_v1  ;;  %v3103_v19 = vpack.c.bf16 %v3063_v27, %v3062_v33 }
 0x258   : > { %v4435_v53 = vpop.f32.mrf.mxu1 }
 0x259   : > { %v1873_v31 = vpop.f32.mrf.mxu0 }
 0x25a   : > { %v1510_v48 = vpop.f32.mrf.mxu1  ;;  %v6029_v32 = vadd.f32 %v1873_v31, %v1570_v40 }
 0x25b   : > { %v1572_v20 = vadd.f32 %v1510_v48, %v5749_v62  ;;  %v4518_v4 = vpop.f32.mrf.mxu0  ;;  %v2693_v62 = vld [vmem:[%s4959_s23 + $0x35] sm:$0xff] }
 0x25c   : > { %v4436_v7 = vpop.f32.mrf.mxu1  ;;  %v2733_v29 = vpack.c.bf16 %v2694_v49, %v2693_v62 }
 0x25d   : > { %v1878_v56 = vpop.f32.mrf.mxu0  ;;  %4704 = vmatmul.mubr.msk.bf16.gmra.mxu0 %vm299_vm3, %v2381_v10 }
 0x25e   : > { %v1515_v2 = vpop.f32.mrf.mxu1  ;;  %v6033_v35 = vadd.f32 %v1878_v56, %v1571_v42  ;;  %4710 = vmatmul.mubr.msk.bf16.vlgmr.msra.gmra.mxu1 %vm299_vm3, %v2732_v6  ;;  %4795 = vmatprep.mubr.msk.bf16.mxu0 %vm4904_vm2, %v4902_v1  ;;  %v3064_v6 = vld [vmem:[%s4959_s23 + $0x36] sm:$0xff]  ;;  %v2696_v56 = vld [vmem:[%s4959_s23 + $0x4d] sm:$0xff] }
 0x25f   : > { %v1573_v40 = vadd.f32 %v1515_v2, %v5754_v25  ;;  %v4521_v28 = vpop.f32.mrf.mxu0  ;;  %4713 = vmatprep.mubr.msk.bf16.mxu1 %vm4904_vm2, %v4902_v1 }
 0x260   : > { %v4439_v22 = vpop.f32.mrf.mxu1 }
 0x261   : > { %v1881_v26 = vpop.f32.mrf.mxu0 }
 0x262   : > { %v1518_v42 = vpop.f32.mrf.mxu1  ;;  %v6045_v23 = vadd.f32 %v1881_v26, %v1572_v20  ;;  %v3065_v20 = vld [vmem:[%s4959_s23 + $0x3e] sm:$0xff] }
 0x263   : > { %v1574_v44 = vadd.f32 %v1518_v42, %v5764_v58  ;;  %v4522_v25 = vpop.f32.mrf.mxu0  ;;  %v2695_v58 = vld [vmem:[%s4959_s23 + $0x45] sm:$0xff]  ;;  %v3104_v27 = vpack.c.bf16 %v3065_v20, %v3064_v6 }
 0x264   : > { %v4440_v53 = vpop.f32.mrf.mxu1  ;;  %v2734_v62 = vpack.c.bf16 %v2696_v56, %v2695_v58 }
 0x265   : > { %v1886_v31 = vpop.f32.mrf.mxu0  ;;  %4796 = vmatmul.mubr.msk.bf16.vlgmr.msra.gmra.mxu0 %vm299_vm3, %v3103_v19 }
 0x266   : > { %v1523_v10 = vpop.f32.mrf.mxu1  ;;  %v6049_v48 = vadd.f32 %v1886_v31, %v1573_v40  ;;  %4714 = vmatmul.mubr.msk.bf16.gmra.mxu1 %vm299_vm3, %v2733_v29  ;;  %4799 = vmatprep.mubr.msk.bf16.mxu0 %vm4904_vm2, %v4902_v1  ;;  %v3066_v29 = vld [vmem:[%s4959_s23 + $0x46] sm:$0xff]  ;;  %v2698_v31 = vld [vmem:[%s4959_s23 + $0x5d] sm:$0xff] }
 0x267   : > { %v1575_v4 = vadd.f32 %v1523_v10, %v5768_v24  ;;  %v4525_v7 = vpop.f32.mrf.mxu0  ;;  %4717 = vmatprep.mubr.msk.bf16.mxu1 %vm4904_vm2, %v4902_v1 }
 0x268   : > { %v4443_v2 = vpop.f32.mrf.mxu1 }
 0x269   : > { %v1889_v33 = vpop.f32.mrf.mxu0 }
 0x26a   : > { %v1526_v40 = vpop.f32.mrf.mxu1  ;;  %v6061_v28 = vadd.f32 %v1889_v33, %v1574_v44  ;;  %v3067_v44 = vld [vmem:[%s4959_s23 + $0x4e] sm:$0xff] }
 0x26b   : > { %v1576_v49 = vadd.f32 %v1526_v40, %v5778_v0  ;;  %v4526_v24 = vpop.f32.mrf.mxu0  ;;  %v2697_v0 = vld [vmem:[%s4959_s23 + $0x55] sm:$0xff]  ;;  %v3105_v20 = vpack.c.bf16 %v3067_v44, %v3066_v29 }
 0x26c   : > { %v4444_v22 = vpop.f32.mrf.mxu1  ;;  %v2735_v58 = vpack.c.bf16 %v2698_v31, %v2697_v0  ;;  %v3068_v40 = vld [vmem:[%s4959_s23 + $0x56] sm:$0xff] }
 0x26d   : > { %v1894_v26 = vpop.f32.mrf.mxu0  ;;  %4800 = vmatmul.mubr.msk.bf16.gmra.mxu0 %vm299_vm3, %v3104_v27  ;;  %v2699_v22 = vld [vmem:[%s4959_s23 + $0x65] sm:$0xff] }
 0x26e   : > { %v1531_v19 = vpop.f32.mrf.mxu1  ;;  %v6065_v42 = vadd.f32 %v1894_v26, %v1575_v4  ;;  %4718 = vmatmul.mubr.msk.bf16.gmra.mxu1 %vm299_vm3, %v2734_v62  ;;  %4803 = vmatprep.mubr.msk.bf16.mxu0 %vm4904_vm2, %v4902_v1  ;;  %v3069_v62 = vld [vmem:[%s4959_s23 + $0x5e] sm:$0xff]  ;;  %v2700_v26 = vld [vmem:[%s4959_s23 + $0x6d] sm:$0xff] }
 0x26f   : > { %v1577_v25 = vadd.f32 %v1531_v19, %v5782_v46  ;;  %v4529_v53 = vpop.f32.mrf.mxu0  ;;  %4721 = vmatprep.mubr.msk.bf16.mxu1 %vm4904_vm2, %v4902_v1  ;;  %v3106_v44 = vpack.c.bf16 %v3069_v62, %v3068_v40 }
 0x270   : > { %v4447_v10 = vpop.f32.mrf.mxu1  ;;  %v2736_v53 = vpack.c.bf16 %v2700_v26, %v2699_v22 }
 0x271   : > { %v1897_v6 = vpop.f32.mrf.mxu0 }
 0x272   : > { %v1534_v4 = vpop.f32.mrf.mxu1  ;;  %v6077_v7 = vadd.f32 %v1897_v6, %v1576_v49 }
 0x273   : > { %v4530_v56 = vpop.f32.mrf.mxu0  ;;  %v3070_v4 = vld [vmem:[%s4959_s23 + $0x66] sm:$0xff] }
 0x274   : > { %v4448_v2 = vpop.f32.mrf.mxu1 }
 0x275   : > { %v1902_v46 = vpop.f32.mrf.mxu0  ;;  %4804 = vmatmul.mubr.msk.bf16.gmra.mxu0 %vm299_vm3, %v3105_v20 }
 0x276   : > { %v6080_v33 = vadd.f32 %v1902_v46, %v1577_v25  ;;  %v2113_v27 = vpop.f32.mrf.mxu1  ;;  %4722 = vmatmul.mubr.msk.bf16.gmra.mxu1 %vm299_vm3, %v2735_v58  ;;  %4807 = vmatprep.mubr.msk.bf16.mxu0 %vm4904_vm2, %v4902_v1  ;;  %v3071_v58 = vld [vmem:[%s4959_s23 + $0x6e] sm:$0xff]  ;;  %v2702_v46 = vld [vmem:[%s4959_s23 + $0x7d] sm:$0xff] }
 0x277   : > { %v2279_v49 = vadd.f32 %v2113_v27, %v5794_v18  ;;  %v4533_v24 = vpop.f32.mrf.mxu0  ;;  %4725 = vmatprep.mubr.msk.bf16.mxu1 %vm4904_vm2, %v4902_v1  ;;  %v3107_v62 = vpack.c.bf16 %v3071_v58, %v3070_v4 }
 0x278   : > { %v4539_v19 = vpop.f32.mrf.mxu1 }
 0x279   : > { %v1905_v29 = vpop.f32.mrf.mxu0 }
 0x27a   : > { %v2116_v25 = vpop.f32.mrf.mxu1 }
 0x27b   : > { %v2280_v0 = vadd.f32 %v2116_v25, %v5804_v9  ;;  %v4534_v31 = vpop.f32.mrf.mxu0  ;;  %v2701_v9 = vld [vmem:[%s4959_s23 + $0x75] sm:$0xff] }
 0x27c   : > { %v4540_v10 = vpop.f32.mrf.mxu1  ;;  %v2737_v22 = vpack.c.bf16 %v2702_v46, %v2701_v9 }
 0x27d   : > { %v2484_v18 = vpop.f32.mrf.mxu0  ;;  %4808 = vmatmul.mubr.msk.bf16.gmra.mxu0 %vm299_vm3, %v3106_v44 }
 0x27e   : > { %v2121_v6 = vpop.f32.mrf.mxu1  ;;  %v6094_v20 = vadd.f32 %v2484_v18, %v2279_v49  ;;  %4726 = vmatmul.mubr.msk.bf16.gmra.mxu1 %vm299_vm3, %v2736_v53  ;;  %4811 = vmatprep.mubr.msk.bf16.mxu0 %vm4904_vm2, %v4902_v1  ;;  %v3072_v53 = vld [vmem:[%s4959_s23 + $0x76] sm:$0xff]  ;;  %v2704_v18 = vld [vmem:[%s4959_s23 + $0x8d] sm:$0xff] }
 0x27f   : > { %v2281_v56 = vadd.f32 %v2121_v6, %v5808_v43  ;;  %v4625_v2 = vpop.f32.mrf.mxu0  ;;  %4729 = vmatprep.mubr.msk.bf16.mxu1 %vm4904_vm2, %v4902_v1 }
 0x280   : > { %v4543_v27 = vpop.f32.mrf.mxu1 }
 0x281   : > { %v2487_v40 = vpop.f32.mrf.mxu0 }
 0x282   : > { %v2124_v49 = vpop.f32.mrf.mxu1  ;;  %v6106_v24 = vadd.f32 %v2487_v40, %v2280_v0  ;;  %v3073_v0 = vld [vmem:[%s4959_s23 + $0x7e] sm:$0xff] }
 0x283   : > { %v2282_v26 = vadd.f32 %v2124_v49, %v5818_v34  ;;  %v4626_v43 = vpop.f32.mrf.mxu0  ;;  %v2703_v34 = vld [vmem:[%s4959_s23 + $0x85] sm:$0xff]  ;;  %v3108_v58 = vpack.c.bf16 %v3073_v0, %v3072_v53 }
 0x284   : > { %v4544_v19 = vpop.f32.mrf.mxu1  ;;  %v2738_v9 = vpack.c.bf16 %v2704_v18, %v2703_v34 }
 0x285   : > { %v2492_v29 = vpop.f32.mrf.mxu0  ;;  %4812 = vmatmul.mubr.msk.bf16.gmra.mxu0 %vm299_vm3, %v3107_v62 }
 0x286   : > { %v2129_v44 = vpop.f32.mrf.mxu1  ;;  %v6110_v25 = vadd.f32 %v2492_v29, %v2281_v56  ;;  %4730 = vmatmul.mubr.msk.bf16.gmra.mxu1 %vm299_vm3, %v2737_v22  ;;  %4815 = vmatprep.mubr.msk.bf16.mxu0 %vm4904_vm2, %v4902_v1  ;;  %v3074_v22 = vld [vmem:[%s4959_s23 + $0x86] sm:$0xff]  ;;  %v2706_v29 = vld [vmem:[%s4959_s23 + $0x9d] sm:$0xff] }
 0x287   : > { %v2283_v31 = vadd.f32 %v2129_v44, %v5822_v47  ;;  %v4629_v10 = vpop.f32.mrf.mxu0  ;;  %4733 = vmatprep.mubr.msk.bf16.mxu1 %vm4904_vm2, %v4902_v1 }
 0x288   : > { %v4547_v6 = vpop.f32.mrf.mxu1 }
 0x289   : > { %v2495_v4 = vpop.f32.mrf.mxu0 }
 0x28a   : > { %v2132_v56 = vpop.f32.mrf.mxu1  ;;  %v6122_v2 = vadd.f32 %v2495_v4, %v2282_v26  ;;  %v3075_v26 = vld [vmem:[%s4959_s23 + $0x8e] sm:$0xff] }
 0x28b   : > { %v2284_v46 = vadd.f32 %v2132_v56, %v5832_v17  ;;  %v4630_v47 = vpop.f32.mrf.mxu0  ;;  %v2705_v17 = vld [vmem:[%s4959_s23 + $0x95] sm:$0xff]  ;;  %v3109_v0 = vpack.c.bf16 %v3075_v26, %v3074_v22 }
 0x28c   : > { %v4548_v27 = vpop.f32.mrf.mxu1  ;;  %v2739_v34 = vpack.c.bf16 %v2706_v29, %v2705_v17 }
 0x28d   : > { %v2500_v40 = vpop.f32.mrf.mxu0  ;;  %4816 = vmatmul.mubr.msk.bf16.gmra.mxu0 %vm299_vm3, %v3108_v58 }
 0x28e   : > { %v2137_v62 = vpop.f32.mrf.mxu1  ;;  %v6126_v49 = vadd.f32 %v2500_v40, %v2283_v31  ;;  %4734 = vmatmul.mubr.msk.bf16.gmra.mxu1 %vm299_vm3, %v2738_v9  ;;  %4819 = vmatprep.mubr.msk.bf16.mxu0 %vm4904_vm2, %v4902_v1  ;;  %v3076_v9 = vld [vmem:[%s4959_s23 + $0x96] sm:$0xff]  ;;  %v2708_v40 = vld [vmem:[%s4959_s23 + $0xad] sm:$0xff] }
 0x28f   : > { %v2285_v43 = vadd.f32 %v2137_v62, %v5836_v13  ;;  %v4633_v19 = vpop.f32.mrf.mxu0  ;;  %4737 = vmatprep.mubr.msk.bf16.mxu1 %vm4904_vm2, %v4902_v1 }
 0x290   : > { %v4551_v44 = vpop.f32.mrf.mxu1 }
 0x291   : > { %v2503_v53 = vpop.f32.mrf.mxu0 }
 0x292   : > { %v2140_v31 = vpop.f32.mrf.mxu1  ;;  %v6138_v10 = vadd.f32 %v2503_v53, %v2284_v46  ;;  %v3077_v46 = vld [vmem:[%s4959_s23 + $0x9e] sm:$0xff] }
 0x293   : > { %v2286_v18 = vadd.f32 %v2140_v31, %v5846_v52  ;;  %v4634_v13 = vpop.f32.mrf.mxu0  ;;  %v2707_v52 = vld [vmem:[%s4959_s23 + $0xa5] sm:$0xff]  ;;  %v3110_v26 = vpack.c.bf16 %v3077_v46, %v3076_v9 }
 0x294   : > { %v4552_v6 = vpop.f32.mrf.mxu1  ;;  %v2740_v17 = vpack.c.bf16 %v2708_v40, %v2707_v52 }
 0x295   : > { %v2508_v4 = vpop.f32.mrf.mxu0  ;;  %4820 = vmatmul.mubr.msk.bf16.gmra.mxu0 %vm299_vm3, %v3109_v0 }
 0x296   : > { %v2145_v58 = vpop.f32.mrf.mxu1  ;;  %v6142_v56 = vadd.f32 %v2508_v4, %v2285_v43  ;;  %4738 = vmatmul.mubr.msk.bf16.gmra.mxu1 %vm299_vm3, %v2739_v34  ;;  %4823 = vmatprep.mubr.msk.bf16.mxu0 %vm4904_vm2, %v4902_v1  ;;  %v3078_v34 = vld [vmem:[%s4959_s23 + $0xa6] sm:$0xff]  ;;  %v2710_v4 = vld [vmem:[%s4959_s23 + $0xbd] sm:$0xff] }
 0x297   : > { %v2287_v47 = vadd.f32 %v2145_v58, %v5850_v63  ;;  %v4637_v27 = vpop.f32.mrf.mxu0  ;;  %4741 = vmatprep.mubr.msk.bf16.mxu1 %vm4904_vm2, %v4902_v1 }
 0x298   : > { %v4555_v62 = vpop.f32.mrf.mxu1 }
 0x299   : > { %v2511_v22 = vpop.f32.mrf.mxu0 }
 0x29a   : > { %v2148_v43 = vpop.f32.mrf.mxu1  ;;  %v6154_v19 = vadd.f32 %v2511_v22, %v2286_v18  ;;  %v3079_v18 = vld [vmem:[%s4959_s23 + $0xae] sm:$0xff] }
 0x29b   : > { %v2288_v29 = vadd.f32 %v2148_v43, %v5860_v36  ;;  %v4638_v63 = vpop.f32.mrf.mxu0  ;;  %v2709_v36 = vld [vmem:[%s4959_s23 + $0xb5] sm:$0xff]  ;;  %v3111_v46 = vpack.c.bf16 %v3079_v18, %v3078_v34 }
 0x29c   : > { %v4556_v44 = vpop.f32.mrf.mxu1  ;;  %v2741_v52 = vpack.c.bf16 %v2710_v4, %v2709_v36 }
 0x29d   : > { %v2516_v53 = vpop.f32.mrf.mxu0  ;;  %4824 = vmatmul.mubr.msk.bf16.gmra.mxu0 %vm299_vm3, %v3110_v26 }
 0x29e   : > { %v2153_v0 = vpop.f32.mrf.mxu1  ;;  %v6158_v31 = vadd.f32 %v2516_v53, %v2287_v47  ;;  %4742 = vmatmul.mubr.msk.bf16.gmra.mxu1 %vm299_vm3, %v2740_v17  ;;  %4827 = vmatprep.mubr.msk.bf16.mxu0 %vm4904_vm2, %v4902_v1  ;;  %v3080_v17 = vld [vmem:[%s4959_s23 + $0xb6] sm:$0xff]  ;;  %v2712_v53 = vld [vmem:[%s4959_s23 + $0xcd] sm:$0xff] }
 0x29f   : > { %v2289_v13 = vadd.f32 %v2153_v0, %v5864_v54  ;;  %v4641_v6 = vpop.f32.mrf.mxu0  ;;  %4745 = vmatprep.mubr.msk.bf16.mxu1 %vm4904_vm2, %v4902_v1 }
 0x2a0   : > { %v4559_v58 = vpop.f32.mrf.mxu1 }
 0x2a1   : > { %v2519_v9 = vpop.f32.mrf.mxu0 }
 0x2a2   : > { %v2156_v47 = vpop.f32.mrf.mxu1  ;;  %v6170_v27 = vadd.f32 %v2519_v9, %v2288_v29  ;;  %v3081_v29 = vld [vmem:[%s4959_s23 + $0xbe] sm:$0xff] }
 0x2a3   : > { %v2290_v40 = vadd.f32 %v2156_v47, %v5874_v3  ;;  %v4642_v54 = vpop.f32.mrf.mxu0  ;;  %v2711_v3 = vld [vmem:[%s4959_s23 + $0xc5] sm:$0xff]  ;;  %v3112_v18 = vpack.c.bf16 %v3081_v29, %v3080_v17 }
 0x2a4   : > { %v4560_v62 = vpop.f32.mrf.mxu1  ;;  %v2742_v36 = vpack.c.bf16 %v2712_v53, %v2711_v3 }
 0x2a5   : > { %v2524_v22 = vpop.f32.mrf.mxu0  ;;  %4828 = vmatmul.mubr.msk.bf16.gmra.mxu0 %vm299_vm3, %v3111_v46 }
 0x2a6   : > { %v2161_v26 = vpop.f32.mrf.mxu1  ;;  %v6174_v43 = vadd.f32 %v2524_v22, %v2289_v13  ;;  %4746 = vmatmul.mubr.msk.bf16.gmra.mxu1 %vm299_vm3, %v2741_v52  ;;  %4831 = vmatprep.mubr.msk.bf16.mxu0 %vm4904_vm2, %v4902_v1  ;;  %v3082_v52 = vld [vmem:[%s4959_s23 + $0xc6] sm:$0xff]  ;;  %v2714_v22 = vld [vmem:[%s4959_s23 + $0xdd] sm:$0xff] }
 0x2a7   : > { %v2291_v63 = vadd.f32 %v2161_v26, %v5878_v15  ;;  %v4645_v44 = vpop.f32.mrf.mxu0  ;;  %4749 = vmatprep.mubr.msk.bf16.mxu1 %vm4904_vm2, %v4902_v1 }
 0x2a8   : > { %v4563_v0 = vpop.f32.mrf.mxu1 }
 0x2a9   : > { %v2527_v34 = vpop.f32.mrf.mxu0 }
 0x2aa   : > { %v2164_v13 = vpop.f32.mrf.mxu1  ;;  %v6186_v6 = vadd.f32 %v2527_v34, %v2290_v40  ;;  %v3083_v40 = vld [vmem:[%s4959_s23 + $0xce] sm:$0xff] }
 0x2ab   : > { %v2292_v4 = vadd.f32 %v2164_v13, %v5888_v12  ;;  %v4646_v15 = vpop.f32.mrf.mxu0  ;;  %v2713_v12 = vld [vmem:[%s4959_s23 + $0xd5] sm:$0xff]  ;;  %v3113_v29 = vpack.c.bf16 %v3083_v40, %v3082_v52 }
 0x2ac   : > { %v4564_v58 = vpop.f32.mrf.mxu1  ;;  %v2743_v3 = vpack.c.bf16 %v2714_v22, %v2713_v12 }
 0x2ad   : > { %v2532_v9 = vpop.f32.mrf.mxu0  ;;  %4832 = vmatmul.mubr.msk.bf16.gmra.mxu0 %vm299_vm3, %v3112_v18 }
 0x2ae   : > { %v2169_v46 = vpop.f32.mrf.mxu1  ;;  %v6190_v47 = vadd.f32 %v2532_v9, %v2291_v63  ;;  %4750 = vmatmul.mubr.msk.bf16.gmra.mxu1 %vm299_vm3, %v2742_v36  ;;  %4835 = vmatprep.mubr.msk.bf16.mxu0 %vm4904_vm2, %v4902_v1  ;;  %v3084_v36 = vld [vmem:[%s4959_s23 + $0xd6] sm:$0xff]  ;;  %v2716_v9 = vld [vmem:[%s4959_s23 + $0xed] sm:$0xff] }
 0x2af   : > { %v2293_v54 = vadd.f32 %v2169_v46, %v5892_v60  ;;  %v4649_v62 = vpop.f32.mrf.mxu0  ;;  %4753 = vmatprep.mubr.msk.bf16.mxu1 %vm4904_vm2, %v4902_v1 }
 0x2b0   : > { %v4567_v26 = vpop.f32.mrf.mxu1 }
 0x2b1   : > { %v2535_v17 = vpop.f32.mrf.mxu0 }
 0x2b2   : > { %v2172_v63 = vpop.f32.mrf.mxu1  ;;  %v6202_v44 = vadd.f32 %v2535_v17, %v2292_v4  ;;  %v3085_v4 = vld [vmem:[%s4959_s23 + $0xde] sm:$0xff] }
 0x2b3   : > { %v2294_v53 = vadd.f32 %v2172_v63, %v5902_v61  ;;  %v4650_v60 = vpop.f32.mrf.mxu0  ;;  %v2715_v61 = vld [vmem:[%s4959_s23 + $0xe5] sm:$0xff]  ;;  %v3114_v40 = vpack.c.bf16 %v3085_v4, %v3084_v36 }
 0x2b4   : > { %v4568_v0 = vpop.f32.mrf.mxu1  ;;  %v2744_v12 = vpack.c.bf16 %v2716_v9, %v2715_v61 }
 0x2b5   : > { %v2540_v34 = vpop.f32.mrf.mxu0  ;;  %4836 = vmatmul.mubr.msk.bf16.gmra.mxu0 %vm299_vm3, %v3113_v29 }
 0x2b6   : > { %v2177_v18 = vpop.f32.mrf.mxu1  ;;  %v6206_v13 = vadd.f32 %v2540_v34, %v2293_v54  ;;  %4754 = vmatmul.mubr.msk.bf16.gmra.mxu1 %vm299_vm3, %v2743_v3  ;;  %4839 = vmatprep.mubr.msk.bf16.mxu0 %vm4904_vm2, %v4902_v1  ;;  %v3086_v3 = vld [vmem:[%s4959_s23 + $0xe6] sm:$0xff]  ;;  %v2718_v34 = vld [vmem:[%s4959_s23 + $0xfd] sm:$0xff] }
 0x2b7   : > { %v2295_v15 = vadd.f32 %v2177_v18, %v5906_v11  ;;  %v4653_v58 = vpop.f32.mrf.mxu0  ;;  %4757 = vmatprep.mubr.msk.bf16.mxu1 %vm4904_vm2, %v4902_v1 }
 0x2b8   : > { %v4571_v46 = vpop.f32.mrf.mxu1 }
 0x2b9   : > { %v2543_v52 = vpop.f32.mrf.mxu0 }
 0x2ba   : > { %v2180_v54 = vpop.f32.mrf.mxu1  ;;  %v6218_v62 = vadd.f32 %v2543_v52, %v2294_v53  ;;  %v3087_v53 = vld [vmem:[%s4959_s23 + $0xee] sm:$0xff] }
 0x2bb   : > { %v2296_v22 = vadd.f32 %v2180_v54, %v5916_v30  ;;  %v4654_v11 = vpop.f32.mrf.mxu0  ;;  %v2717_v30 = vld [vmem:[%s4959_s23 + $0xf5] sm:$0xff]  ;;  %v3115_v4 = vpack.c.bf16 %v3087_v53, %v3086_v3 }
 0x2bc   : > { %v4572_v26 = vpop.f32.mrf.mxu1  ;;  %v2745_v61 = vpack.c.bf16 %v2718_v34, %v2717_v30 }
 0x2bd   : > { %v2548_v17 = vpop.f32.mrf.mxu0  ;;  %4840 = vmatmul.mubr.msk.bf16.gmra.mxu0 %vm299_vm3, %v3114_v40 }
 0x2be   : > { %v2185_v29 = vpop.f32.mrf.mxu1  ;;  %v6222_v63 = vadd.f32 %v2548_v17, %v2295_v15  ;;  %4758 = vmatmul.mubr.msk.bf16.gmra.mxu1 %vm299_vm3, %v2744_v12  ;;  %4843 = vmatprep.mubr.msk.bf16.mxu0 %vm4904_vm2, %v4902_v1  ;;  %v3088_v12 = vld [vmem:[%s4959_s23 + $0xf6] sm:$0xff]  ;;  %v2720_v17 = vld [vmem:[%s4959_s23 + $0x10d] sm:$0xff] }
 0x2bf   : > { %v2297_v60 = vadd.f32 %v2185_v29, %v5920_v8  ;;  %v4657_v0 = vpop.f32.mrf.mxu0  ;;  %4761 = vmatprep.mubr.msk.bf16.mxu1 %vm4904_vm2, %v4902_v1 }
 0x2c0   : > { %v4575_v18 = vpop.f32.mrf.mxu1 }
 0x2c1   : > { %v2551_v36 = vpop.f32.mrf.mxu0 }
 0x2c2   : > { %v2188_v15 = vpop.f32.mrf.mxu1  ;;  %v6234_v58 = vadd.f32 %v2551_v36, %v2296_v22  ;;  %v3089_v22 = vld [vmem:[%s4959_s23 + $0xfe] sm:$0xff] }
 0x2c3   : > { %v2298_v9 = vadd.f32 %v2188_v15, %v5930_v57  ;;  %v4658_v8 = vpop.f32.mrf.mxu0  ;;  %v2719_v57 = vld [vmem:[%s4959_s23 + $0x105] sm:$0xff]  ;;  %v3116_v53 = vpack.c.bf16 %v3089_v22, %v3088_v12 }
 0x2c4   : > { %v4576_v46 = vpop.f32.mrf.mxu1  ;;  %v2746_v30 = vpack.c.bf16 %v2720_v17, %v2719_v57 }
 0x2c5   : > { %v2556_v52 = vpop.f32.mrf.mxu0  ;;  %4844 = vmatmul.mubr.msk.bf16.gmra.mxu0 %vm299_vm3, %v3115_v4 }
 0x2c6   : > { %v2193_v40 = vpop.f32.mrf.mxu1  ;;  %v6238_v54 = vadd.f32 %v2556_v52, %v2297_v60  ;;  %4762 = vmatmul.mubr.msk.bf16.gmra.mxu1 %vm299_vm3, %v2745_v61  ;;  %4847 = vmatprep.mubr.msk.bf16.mxu0 %vm4904_vm2, %v4902_v1  ;;  %v3090_v61 = vld [vmem:[%s4959_s23 + $0x106] sm:$0xff]  ;;  %v2722_v52 = vld [vmem:[%s4959_s23 + $0x11d] sm:$0xff] }
 0x2c7   : > { %v2299_v11 = vadd.f32 %v2193_v40, %v5934_v50  ;;  %v4661_v26 = vpop.f32.mrf.mxu0  ;;  %4765 = vmatprep.mubr.msk.bf16.mxu1 %vm4904_vm2, %v4902_v1 }
 0x2c8   : > { %v4579_v29 = vpop.f32.mrf.mxu1 }
 0x2c9   : > { %v2559_v3 = vpop.f32.mrf.mxu0 }
 0x2ca   : > { %v2196_v60 = vpop.f32.mrf.mxu1  ;;  %v6250_v0 = vadd.f32 %v2559_v3, %v2298_v9  ;;  %v3091_v9 = vld [vmem:[%s4959_s23 + $0x10e] sm:$0xff] }
 0x2cb   : > { %v2300_v34 = vadd.f32 %v2196_v60, %v5944_v41  ;;  %v4662_v50 = vpop.f32.mrf.mxu0  ;;  %v2721_v41 = vld [vmem:[%s4959_s23 + $0x115] sm:$0xff]  ;;  %v3117_v22 = vpack.c.bf16 %v3091_v9, %v3090_v61 }
 0x2cc   : > { %v4580_v18 = vpop.f32.mrf.mxu1  ;;  %v2747_v57 = vpack.c.bf16 %v2722_v52, %v2721_v41 }
 0x2cd   : > { %v2564_v36 = vpop.f32.mrf.mxu0  ;;  %4848 = vmatmul.mubr.msk.bf16.gmra.mxu0 %vm299_vm3, %v3116_v53 }
 0x2ce   : > { %v2201_v4 = vpop.f32.mrf.mxu1  ;;  %v6254_v15 = vadd.f32 %v2564_v36, %v2299_v11  ;;  %4766 = vmatmul.mubr.msk.bf16.gmra.mxu1 %vm299_vm3, %v2746_v30  ;;  %4851 = vmatprep.mubr.msk.bf16.mxu0 %vm4904_vm2, %v4902_v1  ;;  %v3092_v30 = vld [vmem:[%s4959_s23 + $0x116] sm:$0xff]  ;;  %v2724_v36 = vld [vmem:[%s4959_s23 + $0x12d] sm:$0xff] }
 0x2cf   : > { %v2301_v8 = vadd.f32 %v2201_v4, %v5948_v5  ;;  %v4665_v46 = vpop.f32.mrf.mxu0  ;;  %4769 = vmatprep.mubr.msk.bf16.mxu1 %vm4904_vm2, %v4902_v1 }
 0x2d0   : > { %v4583_v40 = vpop.f32.mrf.mxu1 }
 0x2d1   : > { %v2567_v12 = vpop.f32.mrf.mxu0 }
 0x2d2   : > { %v2204_v11 = vpop.f32.mrf.mxu1  ;;  %v6266_v26 = vadd.f32 %v2567_v12, %v2300_v34  ;;  %v3093_v34 = vld [vmem:[%s4959_s23 + $0x11e] sm:$0xff] }
 0x2d3   : > { %v2302_v17 = vadd.f32 %v2204_v11, %v5958_v39  ;;  %v4666_v5 = vpop.f32.mrf.mxu0  ;;  %v2723_v39 = vld [vmem:[%s4959_s23 + $0x125] sm:$0xff]  ;;  %v3118_v9 = vpack.c.bf16 %v3093_v34, %v3092_v30 }
 0x2d4   : > { %v4584_v29 = vpop.f32.mrf.mxu1  ;;  %v2748_v41 = vpack.c.bf16 %v2724_v36, %v2723_v39 }
 0x2d5   : > { %v2572_v3 = vpop.f32.mrf.mxu0  ;;  %4852 = vmatmul.mubr.msk.bf16.gmra.mxu0 %vm299_vm3, %v3117_v22 }
 0x2d6   : > { %v2209_v53 = vpop.f32.mrf.mxu1  ;;  %v6270_v60 = vadd.f32 %v2572_v3, %v2301_v8  ;;  %4770 = vmatmul.mubr.msk.bf16.gmra.mxu1 %vm299_vm3, %v2747_v57  ;;  %4855 = vmatprep.mubr.msk.bf16.mxu0 %vm4904_vm2, %v4902_v1  ;;  %v3094_v57 = vld [vmem:[%s4959_s23 + $0x126] sm:$0xff]  ;;  %v2726_v3 = vld [vmem:[%s4959_s23 + $0x13d] sm:$0xff] }
 0x2d7   : > { %v2303_v50 = vadd.f32 %v2209_v53, %v5962_v21  ;;  %v4669_v18 = vpop.f32.mrf.mxu0  ;;  %4773 = vmatprep.mubr.msk.bf16.mxu1 %vm4904_vm2, %v4902_v1 }
 0x2d8   : > { %v4587_v4 = vpop.f32.mrf.mxu1 }
 0x2d9   : > { %v2575_v61 = vpop.f32.mrf.mxu0 }
 0x2da   : > { %v2212_v8 = vpop.f32.mrf.mxu1  ;;  %v6282_v46 = vadd.f32 %v2575_v61, %v2302_v17  ;;  %v3095_v17 = vld [vmem:[%s4959_s23 + $0x12e] sm:$0xff] }
 0x2db   : > { %v2304_v52 = vadd.f32 %v2212_v8, %v5972_v55  ;;  %v4670_v21 = vpop.f32.mrf.mxu0  ;;  %v2725_v55 = vld [vmem:[%s4959_s23 + $0x135] sm:$0xff]  ;;  %v3119_v34 = vpack.c.bf16 %v3095_v17, %v3094_v57 }
 0x2dc   : > { %v4588_v40 = vpop.f32.mrf.mxu1  ;;  %v2749_v39 = vpack.c.bf16 %v2726_v3, %v2725_v55 }
 0x2dd   : > { %v2580_v12 = vpop.f32.mrf.mxu0  ;;  %4856 = vmatmul.mubr.msk.bf16.gmra.mxu0 %vm299_vm3, %v3118_v9 }
 0x2de   : > { %v2217_v22 = vpop.f32.mrf.mxu1  ;;  %v6286_v11 = vadd.f32 %v2580_v12, %v2303_v50  ;;  %4774 = vmatmul.mubr.msk.bf16.gmra.mxu1 %vm299_vm3, %v2748_v41  ;;  %4859 = vmatprep.mubr.msk.bf16.mxu0 %vm4904_vm2, %v4902_v1  ;;  %v3096_v41 = vld [vmem:[%s4959_s23 + $0x136] sm:$0xff]  ;;  %v2728_v12 = vld [vmem:[%s4959_s23 + $0x14d] sm:$0xff] }
 0x2df   : > { %v2305_v5 = vadd.f32 %v2217_v22, %v5976_v38  ;;  %v4673_v29 = vpop.f32.mrf.mxu0  ;;  %4777 = vmatprep.mubr.msk.bf16.mxu1 %vm4904_vm2, %v4902_v1 }
 0x2e0   : > { %v4591_v53 = vpop.f32.mrf.mxu1 }
 0x2e1   : > { %v2583_v30 = vpop.f32.mrf.mxu0 }
 0x2e2   : > { %v2220_v50 = vpop.f32.mrf.mxu1  ;;  %v6298_v18 = vadd.f32 %v2583_v30, %v2304_v52  ;;  %v3097_v52 = vld [vmem:[%s4959_s23 + $0x13e] sm:$0xff] }
 0x2e3   : > { %v2306_v36 = vadd.f32 %v2220_v50, %v5986_v14  ;;  %v4674_v38 = vpop.f32.mrf.mxu0  ;;  %v2727_v14 = vld [vmem:[%s4959_s23 + $0x145] sm:$0xff]  ;;  %v3120_v17 = vpack.c.bf16 %v3097_v52, %v3096_v41 }
 0x2e4   : > { %v4592_v4 = vpop.f32.mrf.mxu1  ;;  %v2750_v55 = vpack.c.bf16 %v2728_v12, %v2727_v14 }
 0x2e5   : > { %v2588_v61 = vpop.f32.mrf.mxu0  ;;  %4860 = vmatmul.mubr.msk.bf16.gmra.mxu0 %vm299_vm3, %v3119_v34 }
 0x2e6   : > { %v2225_v9 = vpop.f32.mrf.mxu1  ;;  %v6302_v8 = vadd.f32 %v2588_v61, %v2305_v5  ;;  %4778 = vmatmul.mubr.msk.bf16.gmra.mxu1 %vm299_vm3, %v2749_v39  ;;  %4863 = vmatprep.mubr.msk.bf16.mxu0 %vm4904_vm2, %v4902_v1  ;;  %v3098_v39 = vld [vmem:[%s4959_s23 + $0x146] sm:$0xff]  ;;  %v2730_v61 = vld [vmem:[%s4959_s23 + $0x15d] sm:$0xff] }
 0x2e7   : > { %v2307_v21 = vadd.f32 %v2225_v9, %v5990_v45  ;;  %v4677_v40 = vpop.f32.mrf.mxu0  ;;  %4781 = vmatprep.mubr.msk.bf16.mxu1 %vm4904_vm2, %v4902_v1 }
 0x2e8   : > { %v4595_v22 = vpop.f32.mrf.mxu1 }
 0x2e9   : > { %v2591_v57 = vpop.f32.mrf.mxu0 }
 0x2ea   : > { %v2228_v5 = vpop.f32.mrf.mxu1  ;;  %v6314_v29 = vadd.f32 %v2591_v57, %v2306_v36  ;;  %v3099_v36 = vld [vmem:[%s4959_s23 + $0x14e] sm:$0xff] }
 0x2eb   : > { %v2308_v3 = vadd.f32 %v2228_v5, %v6000_v51  ;;  %v4678_v45 = vpop.f32.mrf.mxu0  ;;  %v2729_v51 = vld [vmem:[%s4959_s23 + $0x155] sm:$0xff]  ;;  %v3121_v52 = vpack.c.bf16 %v3099_v36, %v3098_v39 }
 0x2ec   : > { %v4596_v53 = vpop.f32.mrf.mxu1  ;;  %v2751_v14 = vpack.c.bf16 %v2730_v61, %v2729_v51 }
 0x2ed   : > { %v2596_v30 = vpop.f32.mrf.mxu0  ;;  %4864 = vmatmul.mubr.msk.bf16.gmra.mxu0 %vm299_vm3, %v3120_v17 }
 0x2ee   : > { %v2233_v34 = vpop.f32.mrf.mxu1  ;;  %v6318_v50 = vadd.f32 %v2596_v30, %v2307_v21  ;;  %4782 = vmatmul.mubr.msk.bf16.gmra.mxu1 %vm299_vm3, %v2750_v55  ;;  %4867 = vmatprep.mubr.msk.bf16.mxu0 %vm4904_vm2, %v4902_v1  ;;  %v3100_v55 = vld [vmem:[%s4959_s23 + $0x156] sm:$0xff] }
 0x2ef   : > { %v2309_v38 = vadd.f32 %v2233_v34, %v6004_v16  ;;  %v4681_v4 = vpop.f32.mrf.mxu0  ;;  %4785 = vmatprep.mubr.msk.bf16.mxu1 %vm4904_vm2, %v4902_v1 }
 0x2f0   : > { %v4599_v9 = vpop.f32.mrf.mxu1 }
 0x2f1   : > { %v2599_v41 = vpop.f32.mrf.mxu0 }
 0x2f2   : > { %v2236_v21 = vpop.f32.mrf.mxu1  ;;  %v6330_v40 = vadd.f32 %v2599_v41, %v2308_v3  ;;  %v3101_v3 = vld [vmem:[%s4959_s23 + $0x15e] sm:$0xff] }
 0x2f3   : > { %v2310_v12 = vadd.f32 %v2236_v21, %v6014_v59  ;;  %v4682_v22 = vpop.f32.mrf.mxu0  ;;  %v2731_v59 = vld [vmem:[%s4959_s23 + $0x165] sm:$0xff]  ;;  %v3122_v39 = vpack.c.bf16 %v3101_v3, %v3100_v55 }
 0x2f4   : > { %v4600_v16 = vpop.f32.mrf.mxu1  ;;  %v2752_v4 = vpack.c.bf16 %v2731_v59, %v2731_v59  ;;  %v3102_v21 = vld [vmem:[%s4959_s23 + $0x166] sm:$0xff] }
 0x2f5   : > { %v2604_v57 = vpop.f32.mrf.mxu0  ;;  %4868 = vmatmul.mubr.msk.bf16.gmra.mxu0 %vm299_vm3, %v3121_v52 }
 0x2f6   : > { %v2241_v17 = vpop.f32.mrf.mxu1  ;;  %v6334_v5 = vadd.f32 %v2604_v57, %v2309_v38  ;;  %4786 = vmatmul.mubr.msk.bf16.gmra.mxu1 %vm299_vm3, %v2751_v14  ;;  %4871 = vmatprep.mubr.msk.bf16.mxu0 %vm4904_vm2, %v4902_v1 }
 0x2f7   : > { %v2311_v45 = vadd.f32 %v2241_v17, %v6018_v37  ;;  %v4685_v53 = vpop.f32.mrf.mxu0  ;;  %4789 = vmatprep.mubr.msk.bf16.mxu1 %vm4904_vm2, %v4902_v1 }
 0x2f8   : > { %v4603_v30 = vpop.f32.mrf.mxu1 }
 0x2f9   : > { %v2607_v34 = vpop.f32.mrf.mxu0 }
 0x2fa   : > { %v2244_v36 = vpop.f32.mrf.mxu1  ;;  %v6345_v38 = vadd.f32 %v2607_v34, %v2310_v12 }
 0x2fb   : > { %v2312_v51 = vadd.f32 %v2244_v36, %v6029_v32  ;;  %v4686_v61 = vpop.f32.mrf.mxu0  ;;  %v3123_v32 = vpack.c.bf16 %v3102_v21, %v3102_v21 }
 0x2fc   : > { %v4604_v9 = vpop.f32.mrf.mxu1 }
 0x2fd   : > { %v2612_v41 = vpop.f32.mrf.mxu0  ;;  %4872 = vmatmul.mubr.msk.bf16.gmra.mxu0 %vm299_vm3, %v3122_v39 }
 0x2fe   : > { %v2249_v37 = vpop.f32.mrf.mxu1  ;;  %v6349_v52 = vadd.f32 %v2612_v41, %v2311_v45  ;;  %4790 = vmatmul.mubr.msk.bf16.gmra.mxu1 %vm299_vm3, %v2752_v4  ;;  %4875 = vmatprep.mubr.msk.bf16.mxu0 %vm4904_vm2, %v4902_v1 }
 0x2ff   : > { %v2313_v14 = vadd.f32 %v2249_v37, %v6033_v35  ;;  %v4689_v12 = vpop.f32.mrf.mxu0 }
 0x300   : > { %v4607_v22 = vpop.f32.mrf.mxu1 }
 0x301   : > { %v2615_v16 = vpop.f32.mrf.mxu0 }
 0x302   : > { %v2252_v57 = vpop.f32.mrf.mxu1  ;;  %v6356_v17 = vadd.f32 %v2615_v16, %v2312_v51 }
 0x303   : > { %v2314_v55 = vadd.f32 %v2252_v57, %v6045_v23  ;;  %v4690_v3 = vpop.f32.mrf.mxu0 }
 0x304   : > { %v4608_v45 = vpop.f32.mrf.mxu1 }
 0x305   : > { %v2620_v53 = vpop.f32.mrf.mxu0  ;;  %4876 = vmatmul.mubr.msk.bf16.gmra.mxu0 %vm299_vm3, %v3123_v32 }
 0x306   : > { %v2257_v59 = vpop.f32.mrf.mxu1  ;;  %v6360_v30 = vadd.f32 %v2620_v53, %v2313_v14 }
 0x307   : > { %v2315_v1 = vadd.f32 %v2257_v59, %v6049_v48  ;;  %v4693_v35 = vpop.f32.mrf.mxu0 }
 0x308   : > { %v4611_v34 = vpop.f32.mrf.mxu1 }
 0x309   : > { %v2623_v39 = vpop.f32.mrf.mxu0 }
 0x30a   : > { %v2260_v36 = vpop.f32.mrf.mxu1  ;;  %v6363_v4 = vadd.f32 %v2623_v39, %v2314_v55 }
 0x30b   : > { %v2316_v51 = vadd.f32 %v2260_v36, %v6061_v28  ;;  %v4694_v61 = vpop.f32.mrf.mxu0 }
 0x30c   : > { %v4612_v23 = vpop.f32.mrf.mxu1 }
 0x30d   : > { %v2628_v9 = vpop.f32.mrf.mxu0 }
 0x30e   : > { %v2265_v41 = vpop.f32.mrf.mxu1  ;;  %v6366_v37 = vadd.f32 %v2628_v9, %v2315_v1 }
 0x30f   : > { %v2317_v21 = vadd.f32 %v2265_v41, %v6065_v42  ;;  %v4697_v14 = vpop.f32.mrf.mxu0 }
 0x310   : > { %v4615_v12 = vpop.f32.mrf.mxu1 }
 0x311   : > { %v2631_v22 = vpop.f32.mrf.mxu0 }
 0x312   : > { %v2268_v48 = vpop.f32.mrf.mxu1  ;;  %v6369_v16 = vadd.f32 %v2631_v22, %v2316_v51 }
 0x313   : > { %v2318_v32 = vadd.f32 %v2268_v48, %v6077_v7  ;;  %v4698_v57 = vpop.f32.mrf.mxu0  ;;  %v6383_v48 = vld [vmem:[%s6518_s2] ss:$0 sm:$0xff] }
 0x314   : > { %v4616_v55 = vpop.f32.mrf.mxu1 }
 0x315   : > { %v2636_v3 = vpop.f32.mrf.mxu0 }
 0x316   : > { %v2273_v28 = vpop.f32.mrf.mxu1  ;;  %v6372_v45 = vadd.f32 %v2636_v3, %v2317_v21 }
 0x317   : > { %v2319_v53 = vadd.f32 %v2273_v28, %v6080_v33  ;;  %v4701_v59 = vpop.f32.mrf.mxu0 }
 0x318   : > { %v4619_v1 = vpop.f32.mrf.mxu1 }
 0x319   : > { %v2639_v35 = vpop.f32.mrf.mxu0 }
 0x31a   : > { %v2276_v42 = vpop.f32.mrf.mxu1  ;;  %v6375_v34 = vadd.f32 %v2639_v35, %v2318_v32 }
 0x31b   : > { %v4702_v39 = vpop.f32.mrf.mxu0 }
 0x31c   : > { %v4620_v36 = vpop.f32.mrf.mxu1 }
 0x31d   : > { %v2644_v51 = vpop.f32.mrf.mxu0 }
 0x31e   : > { %v6377_v61 = vadd.f32 %v2644_v51, %v2319_v53  ;;  %v2855_v7 = vpop.f32.mrf.mxu1 }
 0x31f   : > { %v4705_v23 = vpop.f32.mrf.mxu0  ;;  %v3021_v33 = vadd.f32 %v2855_v7, %v6094_v20 }
 0x320   : > { %v4711_v9 = vpop.f32.mrf.mxu1 }
 0x321   : > { %v2647_v41 = vpop.f32.mrf.mxu0 }
 0x322   : > { %v2858_v21 = vpop.f32.mrf.mxu1 }
 0x323   : > { %v4706_v14 = vpop.f32.mrf.mxu0  ;;  %v3022_v3 = vadd.f32 %v2858_v21, %v6106_v24 }
 0x324   : > { %v4712_v12 = vpop.f32.mrf.mxu1 }
 0x325   : > { %v3226_v22 = vpop.f32.mrf.mxu0 }
 0x326   : > { %v2863_v32 = vpop.f32.mrf.mxu1  ;;  %v3392_v57 = vadd.f32 %v3226_v22, %v3021_v33 }
 0x327   : > { %v4797_v55 = vpop.f32.mrf.mxu0  ;;  %v3023_v39 = vadd.f32 %v2863_v32, %v6110_v25 }
 0x328   : > { %v3440_v28 = vadd.f32 %v6383_v48, %v3392_v57  ;;  %v4715_v53 = vpop.f32.mrf.mxu1 }
 0x329   : > { %v3229_v59 = vpop.f32.mrf.mxu0 }
 0x32a   : > { %vm3481_vm4 = vcmp.ge.f32.partialorder %v3440_v28, 0.0  ;;  %v3522_v20 = vmul.f32 0.2, %v3440_v28  ;;  %v2866_v1 = vpop.f32.mrf.mxu1  ;;  %v3393_v35 = vadd.f32 %v3229_v59, %v3022_v3 }
 0x32b   : > { %v4798_v42 = vpop.f32.mrf.mxu0  ;;  %v3024_v14 = vadd.f32 %v2866_v1, %v6122_v2 }
 0x32c   : > { %v3563_v36 = vsel %vm3481_vm4, %v3440_v28, %v3522_v20  ;;  %v3441_v24 = vadd.f32 %v6383_v48, %v3393_v35  ;;  %v4716_v51 = vpop.f32.mrf.mxu1 }
 0x32d   : > { %3604 = vst [vmem:[%s6391_s16] sm:$0xff] %v3563_v36  ;;  %v3234_v7 = vpop.f32.mrf.mxu0 }
 0x32e   : > { %vm3482_vm5 = vcmp.ge.f32.partialorder %v3441_v24, 0.0  ;;  %v3523_v23 = vmul.f32 0.2, %v3441_v24  ;;  %v2871_v9 = vpop.f32.mrf.mxu1  ;;  %v3394_v41 = vadd.f32 %v3234_v7, %v3023_v39 }
 0x32f   : > { %v4801_v21 = vpop.f32.mrf.mxu0  ;;  %v3025_v28 = vadd.f32 %v2871_v9, %v6126_v49 }
 0x330   : > { %v3564_v33 = vsel %vm3482_vm5, %v3441_v24, %v3523_v23  ;;  %v3442_v12 = vadd.f32 %v6383_v48, %v3394_v41  ;;  %v4719_v22 = vpop.f32.mrf.mxu1 }
 0x331   : > { %3605 = vst [vmem:[%s6391_s16 + $0x8] sm:$0xff] %v3564_v33  ;;  %v3237_v25 = vpop.f32.mrf.mxu0 }
 0x332   : > { %vm3483_vm6 = vcmp.ge.f32.partialorder %v3442_v12, 0.0  ;;  %v3524_v32 = vmul.f32 0.2, %v3442_v12  ;;  %v2874_v57 = vpop.f32.mrf.mxu1  ;;  %v3395_v55 = vadd.f32 %v3237_v25, %v3024_v14 }
 0x333   : > { %v4802_v3 = vpop.f32.mrf.mxu0  ;;  %v3026_v36 = vadd.f32 %v2874_v57, %v6138_v10 }
 0x334   : > { %v3565_v53 = vsel %vm3483_vm6, %v3442_v12, %v3524_v32  ;;  %v3443_v59 = vadd.f32 %v6383_v48, %v3395_v55  ;;  %v4720_v20 = vpop.f32.mrf.mxu1 }
 0x335   : > { %3606 = vst [vmem:[%s6391_s16 + $0x10] sm:$0xff] %v3565_v53  ;;  %v3242_v2 = vpop.f32.mrf.mxu0 }
 0x336   : > { %vm3484_vm7 = vcmp.ge.f32.partialorder %v3443_v59, 0.0  ;;  %v3525_v1 = vmul.f32 0.2, %v3443_v59  ;;  %v2879_v35 = vpop.f32.mrf.mxu1  ;;  %v3396_v42 = vadd.f32 %v3242_v2, %v3025_v28 }
 0x337   : > { %v4805_v39 = vpop.f32.mrf.mxu0  ;;  %v3027_v14 = vadd.f32 %v2879_v35, %v6142_v56 }
 0x338   : > { %v3566_v24 = vsel %vm3484_vm7, %v3443_v59, %v3525_v1  ;;  %v3444_v51 = vadd.f32 %v6383_v48, %v3396_v42  ;;  %v4723_v7 = vpop.f32.mrf.mxu1 }
 0x339   : > { %3607 = vst [vmem:[%s6391_s16 + $0x18] sm:$0xff] %v3566_v24  ;;  %v3245_v49 = vpop.f32.mrf.mxu0 }
 0x33a   : > { %vm3485_vm8 = vcmp.ge.f32.partialorder %v3444_v51, 0.0  ;;  %v3526_v23 = vmul.f32 0.2, %v3444_v51  ;;  %v2882_v9 = vpop.f32.mrf.mxu1  ;;  %v3397_v41 = vadd.f32 %v3245_v49, %v3026_v36 }
 0x33b   : > { %v4806_v21 = vpop.f32.mrf.mxu0  ;;  %v3028_v3 = vadd.f32 %v2882_v9, %v6154_v19 }
 0x33c   : > { %v3567_v33 = vsel %vm3485_vm8, %v3444_v51, %v3526_v23  ;;  %v3445_v12 = vadd.f32 %v6383_v48, %v3397_v41  ;;  %v4724_v22 = vpop.f32.mrf.mxu1 }
 0x33d   : > { %3608 = vst [vmem:[%s6391_s16 + $0x20] sm:$0xff] %v3567_v33  ;;  %v3250_v10 = vpop.f32.mrf.mxu0 }
 0x33e   : > { %vm3486_vm9 = vcmp.ge.f32.partialorder %v3445_v12, 0.0  ;;  %v3527_v25 = vmul.f32 0.2, %v3445_v12  ;;  %v2887_v32 = vpop.f32.mrf.mxu1  ;;  %v3398_v57 = vadd.f32 %v3250_v10, %v3027_v14 }
 0x33f   : > { %v4809_v55 = vpop.f32.mrf.mxu0  ;;  %v3029_v42 = vadd.f32 %v2887_v32, %v6158_v31 }
 0x340   : > { %v3568_v28 = vsel %vm3486_vm9, %v3445_v12, %v3527_v25  ;;  %v3446_v53 = vadd.f32 %v6383_v48, %v3398_v57  ;;  %v4727_v59 = vpop.f32.mrf.mxu1 }
 0x341   : > { %3609 = vst [vmem:[%s6391_s16 + $0x28] sm:$0xff] %v3568_v28  ;;  %v3253_v56 = vpop.f32.mrf.mxu0 }
 0x342   : > { %vm3487_vm10 = vcmp.ge.f32.partialorder %v3446_v53, 0.0  ;;  %v3528_v20 = vmul.f32 0.2, %v3446_v53  ;;  %v2890_v2 = vpop.f32.mrf.mxu1  ;;  %v3399_v1 = vadd.f32 %v3253_v56, %v3028_v3 }
 0x343   : > { %v4810_v35 = vpop.f32.mrf.mxu0  ;;  %v3030_v9 = vadd.f32 %v2890_v2, %v6170_v27 }
 0x344   : > { %v3569_v39 = vsel %vm3487_vm10, %v3446_v53, %v3528_v20  ;;  %v3447_v36 = vadd.f32 %v6383_v48, %v3399_v1  ;;  %v4728_v24 = vpop.f32.mrf.mxu1 }
 0x345   : > { %3610 = vst [vmem:[%s6391_s16 + $0x30] sm:$0xff] %v3569_v39  ;;  %v3258_v19 = vpop.f32.mrf.mxu0 }
 0x346   : > { %vm3488_vm11 = vcmp.ge.f32.partialorder %v3447_v36, 0.0  ;;  %v3529_v51 = vmul.f32 0.2, %v3447_v36  ;;  %v2895_v7 = vpop.f32.mrf.mxu1  ;;  %v3400_v49 = vadd.f32 %v3258_v19, %v3029_v42 }
 0x347   : > { %v4813_v23 = vpop.f32.mrf.mxu0  ;;  %v3031_v25 = vadd.f32 %v2895_v7, %v6174_v43 }
 0x348   : > { %v3570_v41 = vsel %vm3488_vm11, %v3447_v36, %v3529_v51  ;;  %v3448_v21 = vadd.f32 %v6383_v48, %v3400_v49  ;;  %v4731_v14 = vpop.f32.mrf.mxu1 }
 0x349   : > { %3611 = vst [vmem:[%s6391_s16 + $0x38] sm:$0xff] %v3570_v41  ;;  %v3261_v31 = vpop.f32.mrf.mxu0 }
 0x34a   : > { %vm3489_vm12 = vcmp.ge.f32.partialorder %v3448_v21, 0.0  ;;  %v3530_v33 = vmul.f32 0.2, %v3448_v21  ;;  %v2898_v12 = vpop.f32.mrf.mxu1  ;;  %v3401_v22 = vadd.f32 %v3261_v31, %v3030_v9 }
 0x34b   : > { %v4814_v10 = vpop.f32.mrf.mxu0  ;;  %v3032_v56 = vadd.f32 %v2898_v12, %v6186_v6 }
 0x34c   : > { %v3571_v32 = vsel %vm3489_vm12, %v3448_v21, %v3530_v33  ;;  %v3449_v57 = vadd.f32 %v6383_v48, %v3401_v22  ;;  %v4732_v55 = vpop.f32.mrf.mxu1 }
 0x34d   : > { %3612 = vst [vmem:[%s6391_s16 + $0x40] sm:$0xff] %v3571_v32  ;;  %v3266_v27 = vpop.f32.mrf.mxu0 }
 0x34e   : > { %vm3490_vm13 = vcmp.ge.f32.partialorder %v3449_v57, 0.0  ;;  %v3531_v3 = vmul.f32 0.2, %v3449_v57  ;;  %v2903_v28 = vpop.f32.mrf.mxu1  ;;  %v3402_v53 = vadd.f32 %v3266_v27, %v3031_v25 }
 0x34f   : > { %v4817_v59 = vpop.f32.mrf.mxu0  ;;  %v3033_v24 = vadd.f32 %v2903_v28, %v6190_v47 }
 0x350   : > { %v3572_v20 = vsel %vm3490_vm13, %v3449_v57, %v3531_v3  ;;  %v3450_v2 = vadd.f32 %v6383_v48, %v3402_v53  ;;  %v4735_v1 = vpop.f32.mrf.mxu1 }
 0x351   : > { %3613 = vst [vmem:[%s6391_s16 + $0x48] sm:$0xff] %v3572_v20  ;;  %v3269_v43 = vpop.f32.mrf.mxu0 }
 0x352   : > { %vm3491_vm14 = vcmp.ge.f32.partialorder %v3450_v2, 0.0  ;;  %v3532_v35 = vmul.f32 0.2, %v3450_v2  ;;  %v2906_v42 = vpop.f32.mrf.mxu1  ;;  %v3403_v39 = vadd.f32 %v3269_v43, %v3032_v56 }
 0x353   : > { %v4818_v36 = vpop.f32.mrf.mxu0  ;;  %v3034_v21 = vadd.f32 %v2906_v42, %v6202_v44 }
 0x354   : > { %v3573_v19 = vsel %vm3491_vm14, %v3450_v2, %v3532_v35  ;;  %v3451_v51 = vadd.f32 %v6383_v48, %v3403_v39  ;;  %v4736_v7 = vpop.f32.mrf.mxu1 }
 0x355   : > { %3614 = vst [vmem:[%s6391_s16 + $0x50] sm:$0xff] %v3573_v19  ;;  %v3274_v6 = vpop.f32.mrf.mxu0 }
 0x356   : > { %vm3492_vm15 = vcmp.ge.f32.partialorder %v3451_v51, 0.0  ;;  %v3533_v49 = vmul.f32 0.2, %v3451_v51  ;;  %v2911_v23 = vpop.f32.mrf.mxu1  ;;  %v3404_v9 = vadd.f32 %v3274_v6, %v3033_v24 }
 0x357   : > { %v4821_v41 = vpop.f32.mrf.mxu0  ;;  %v3035_v32 = vadd.f32 %v2911_v23, %v6206_v13 }
 0x358   : > { %v3574_v14 = vsel %vm3492_vm15, %v3451_v51, %v3533_v49  ;;  %v3452_v31 = vadd.f32 %v6383_v48, %v3404_v9  ;;  %v4739_v33 = vpop.f32.mrf.mxu1 }
 0x359   : > { %3615 = vst [vmem:[%s6391_s16 + $0x58] sm:$0xff] %v3574_v14  ;;  %v3277_v47 = vpop.f32.mrf.mxu0 }
 0x35a   : > { %vm3493_vm0 = vcmp.ge.f32.partialorder %v3452_v31, 0.0  ;;  %v3534_v12 = vmul.f32 0.2, %v3452_v31  ;;  %v2914_v22 = vpop.f32.mrf.mxu1  ;;  %v3405_v10 = vadd.f32 %v3277_v47, %v3034_v21 }
 0x35b   : > { %v4822_v25 = vpop.f32.mrf.mxu0  ;;  %v3036_v56 = vadd.f32 %v2914_v22, %v6218_v62 }
 0x35c   : > { %v3575_v57 = vsel %vm3493_vm0, %v3452_v31, %v3534_v12  ;;  %v3453_v55 = vadd.f32 %v6383_v48, %v3405_v10  ;;  %v4740_v27 = vpop.f32.mrf.mxu1 }
 0x35d   : > { %3616 = vst [vmem:[%s6391_s16 + $0x60] sm:$0xff] %v3575_v57  ;;  %v3282_v44 = vpop.f32.mrf.mxu0 }
 0x35e   : > { %vm3494_vm1 = vcmp.ge.f32.partialorder %v3453_v55, 0.0  ;;  %v3535_v3 = vmul.f32 0.2, %v3453_v55  ;;  %v2919_v28 = vpop.f32.mrf.mxu1  ;;  %v3406_v53 = vadd.f32 %v3282_v44, %v3035_v32 }
 0x35f   : > { %v4825_v59 = vpop.f32.mrf.mxu0  ;;  %v3037_v36 = vadd.f32 %v2919_v28, %v6222_v63 }
 0x360   : > { %v3576_v20 = vsel %vm3494_vm1, %v3453_v55, %v3535_v3  ;;  %v3454_v2 = vadd.f32 %v6383_v48, %v3406_v53  ;;  %v4743_v1 = vpop.f32.mrf.mxu1 }
 0x361   : > { %3617 = vst [vmem:[%s6391_s16 + $0x68] sm:$0xff] %v3576_v20  ;;  %v3285_v13 = vpop.f32.mrf.mxu0 }
 0x362   : > { %vm3495_vm2 = vcmp.ge.f32.partialorder %v3454_v2, 0.0  ;;  %v3536_v43 = vmul.f32 0.2, %v3454_v2  ;;  %v2922_v35 = vpop.f32.mrf.mxu1  ;;  %v3407_v42 = vadd.f32 %v3285_v13, %v3036_v56 }
 0x363   : > { %v4826_v39 = vpop.f32.mrf.mxu0  ;;  %v3038_v9 = vadd.f32 %v2922_v35, %v6234_v58 }
 0x364   : > { %v3577_v24 = vsel %vm3495_vm2, %v3454_v2, %v3536_v43  ;;  %v3455_v19 = vadd.f32 %v6383_v48, %v3407_v42  ;;  %v4744_v51 = vpop.f32.mrf.mxu1 }
 0x365   : > { %3618 = vst [vmem:[%s6391_s16 + $0x70] sm:$0xff] %v3577_v24  ;;  %v3290_v62 = vpop.f32.mrf.mxu0 }
 0x366   : > { %vm3496_vm3 = vcmp.ge.f32.partialorder %v3455_v19, 0.0  ;;  %v3537_v7 = vmul.f32 0.2, %v3455_v19  ;;  %v2927_v6 = vpop.f32.mrf.mxu1  ;;  %v3408_v49 = vadd.f32 %v3290_v62, %v3037_v36 }
 0x367   : > { %v4829_v23 = vpop.f32.mrf.mxu0  ;;  %v3039_v22 = vadd.f32 %v2927_v6, %v6238_v54 }
 0x368   : > { %v3578_v41 = vsel %vm3496_vm3, %v3455_v19, %v3537_v7  ;;  %v3456_v21 = vadd.f32 %v6383_v48, %v3408_v49  ;;  %v4747_v14 = vpop.f32.mrf.mxu1 }
 0x369   : > { %3619 = vst [vmem:[%s6391_s16 + $0x78] sm:$0xff] %v3578_v41  ;;  %v3293_v63 = vpop.f32.mrf.mxu0 }
 0x36a   : > { %vm3497_vm4 = vcmp.ge.f32.partialorder %v3456_v21, 0.0  ;;  %v3538_v31 = vmul.f32 0.2, %v3456_v21  ;;  %v2930_v33 = vpop.f32.mrf.mxu1  ;;  %v3409_v47 = vadd.f32 %v3293_v63, %v3038_v9 }
 0x36b   : > { %v4830_v12 = vpop.f32.mrf.mxu0  ;;  %v3040_v3 = vadd.f32 %v2930_v33, %v6250_v0 }
 0x36c   : > { %v3579_v10 = vsel %vm3497_vm4, %v3456_v21, %v3538_v31  ;;  %v3457_v25 = vadd.f32 %v6383_v48, %v3409_v47  ;;  %v4748_v32 = vpop.f32.mrf.mxu1 }
 0x36d   : > { %3620 = vst [vmem:[%s6391_s16 + $0x80] sm:$0xff] %v3579_v10  ;;  %v3298_v58 = vpop.f32.mrf.mxu0 }
 0x36e   : > { %vm3498_vm5 = vcmp.ge.f32.partialorder %v3457_v25, 0.0  ;;  %v3539_v57 = vmul.f32 0.2, %v3457_v25  ;;  %v2935_v55 = vpop.f32.mrf.mxu1  ;;  %v3410_v27 = vadd.f32 %v3298_v58, %v3039_v22 }
 0x36f   : > { %v4833_v44 = vpop.f32.mrf.mxu0  ;;  %v3041_v13 = vadd.f32 %v2935_v55, %v6254_v15 }
 0x370   : > { %v3580_v28 = vsel %vm3498_vm5, %v3457_v25, %v3539_v57  ;;  %v3458_v53 = vadd.f32 %v6383_v48, %v3410_v27  ;;  %v4751_v59 = vpop.f32.mrf.mxu1 }
 0x371   : > { %3621 = vst [vmem:[%s6391_s16 + $0x88] sm:$0xff] %v3580_v28  ;;  %v3301_v54 = vpop.f32.mrf.mxu0 }
 0x372   : > { %vm3499_vm6 = vcmp.ge.f32.partialorder %v3458_v53, 0.0  ;;  %v3540_v56 = vmul.f32 0.2, %v3458_v53  ;;  %v2938_v20 = vpop.f32.mrf.mxu1  ;;  %v3411_v2 = vadd.f32 %v3301_v54, %v3040_v3 }
 0x373   : > { %v4834_v1 = vpop.f32.mrf.mxu0  ;;  %v3042_v51 = vadd.f32 %v2938_v20, %v6266_v26 }
 0x374   : > { %v3581_v43 = vsel %vm3499_vm6, %v3458_v53, %v3540_v56  ;;  %v3459_v35 = vadd.f32 %v6383_v48, %v3411_v2  ;;  %v4752_v42 = vpop.f32.mrf.mxu1 }
 0x375   : > { %3622 = vst [vmem:[%s6391_s16 + $0x90] sm:$0xff] %v3581_v43  ;;  %v3306_v0 = vpop.f32.mrf.mxu0 }
 0x376   : > { %vm3500_vm7 = vcmp.ge.f32.partialorder %v3459_v35, 0.0  ;;  %v3541_v39 = vmul.f32 0.2, %v3459_v35  ;;  %v2943_v36 = vpop.f32.mrf.mxu1  ;;  %v3412_v24 = vadd.f32 %v3306_v0, %v3041_v13 }
 0x377   : > { %v4837_v19 = vpop.f32.mrf.mxu0  ;;  %v3043_v21 = vadd.f32 %v2943_v36, %v6270_v60 }
 0x378   : > { %v3582_v62 = vsel %vm3500_vm7, %v3459_v35, %v3541_v39  ;;  %v3460_v7 = vadd.f32 %v6383_v48, %v3412_v24  ;;  %v4755_v6 = vpop.f32.mrf.mxu1 }
 0x379   : > { %3623 = vst [vmem:[%s6391_s16 + $0x98] sm:$0xff] %v3582_v62  ;;  %v3309_v15 = vpop.f32.mrf.mxu0 }
 0x37a   : > { %vm3501_vm8 = vcmp.ge.f32.partialorder %v3460_v7, 0.0  ;;  %v3542_v49 = vmul.f32 0.2, %v3460_v7  ;;  %v2946_v23 = vpop.f32.mrf.mxu1  ;;  %v3413_v9 = vadd.f32 %v3309_v15, %v3042_v51 }
 0x37b   : > { %v4838_v41 = vpop.f32.mrf.mxu0  ;;  %v3044_v10 = vadd.f32 %v2946_v23, %v6282_v46 }
 0x37c   : > { %v3583_v14 = vsel %vm3501_vm8, %v3460_v7, %v3542_v49  ;;  %v3461_v63 = vadd.f32 %v6383_v48, %v3413_v9  ;;  %v4756_v31 = vpop.f32.mrf.mxu1 }
 0x37d   : > { %3624 = vst [vmem:[%s6391_s16 + $0xa0] sm:$0xff] %v3583_v14  ;;  %v3314_v26 = vpop.f32.mrf.mxu0 }
 0x37e   : > { %vm3502_vm9 = vcmp.ge.f32.partialorder %v3461_v63, 0.0  ;;  %v3543_v33 = vmul.f32 0.2, %v3461_v63  ;;  %v2951_v47 = vpop.f32.mrf.mxu1  ;;  %v3414_v12 = vadd.f32 %v3314_v26, %v3043_v21 }
 0x37f   : > { %v4841_v22 = vpop.f32.mrf.mxu0  ;;  %v3045_v3 = vadd.f32 %v2951_v47, %v6286_v11 }
 0x380   : > { %v3584_v25 = vsel %vm3502_vm9, %v3461_v63, %v3543_v33  ;;  %v3462_v32 = vadd.f32 %v6383_v48, %v3414_v12  ;;  %v4759_v58 = vpop.f32.mrf.mxu1 }
 0x381   : > { %3625 = vst [vmem:[%s6391_s16 + $0xa8] sm:$0xff] %v3584_v25  ;;  %v3317_v60 = vpop.f32.mrf.mxu0 }
 0x382   : > { %vm3503_vm10 = vcmp.ge.f32.partialorder %v3462_v32, 0.0  ;;  %v3544_v57 = vmul.f32 0.2, %v3462_v32  ;;  %v2954_v55 = vpop.f32.mrf.mxu1  ;;  %v3415_v27 = vadd.f32 %v3317_v60, %v3044_v10 }
 0x383   : > { %v4842_v44 = vpop.f32.mrf.mxu0  ;;  %v3046_v1 = vadd.f32 %v2954_v55, %v6298_v18 }
 0x384   : > { %v3585_v28 = vsel %vm3503_vm10, %v3462_v32, %v3544_v57  ;;  %v3463_v53 = vadd.f32 %v6383_v48, %v3415_v27  ;;  %v4760_v59 = vpop.f32.mrf.mxu1 }
 0x385   : > { %3626 = vst [vmem:[%s6391_s16 + $0xb0] sm:$0xff] %v3585_v28  ;;  %v3322_v46 = vpop.f32.mrf.mxu0 }
 0x386   : > { %vm3504_vm11 = vcmp.ge.f32.partialorder %v3463_v53, 0.0  ;;  %v3545_v54 = vmul.f32 0.2, %v3463_v53  ;;  %v2959_v56 = vpop.f32.mrf.mxu1  ;;  %v3416_v20 = vadd.f32 %v3322_v46, %v3045_v3 }
 0x387   : > { %v4845_v2 = vpop.f32.mrf.mxu0  ;;  %v3047_v24 = vadd.f32 %v2959_v56, %v6302_v8 }
 0x388   : > { %v3586_v13 = vsel %vm3504_vm11, %v3463_v53, %v3545_v54  ;;  %v3464_v43 = vadd.f32 %v6383_v48, %v3416_v20  ;;  %v4763_v35 = vpop.f32.mrf.mxu1 }
 0x389   : > { %3627 = vst [vmem:[%s6391_s16 + $0xb8] sm:$0xff] %v3586_v13  ;;  %v3325_v11 = vpop.f32.mrf.mxu0 }
 0x38a   : > { %vm3505_vm12 = vcmp.ge.f32.partialorder %v3464_v43, 0.0  ;;  %v3546_v42 = vmul.f32 0.2, %v3464_v43  ;;  %v2962_v0 = vpop.f32.mrf.mxu1  ;;  %v3417_v39 = vadd.f32 %v3325_v11, %v3046_v1 }
 0x38b   : > { %v4846_v36 = vpop.f32.mrf.mxu0  ;;  %v3048_v23 = vadd.f32 %v2962_v0, %v6314_v29 }
 0x38c   : > { %v3587_v19 = vsel %vm3505_vm12, %v3464_v43, %v3546_v42  ;;  %v3465_v51 = vadd.f32 %v6383_v48, %v3417_v39  ;;  %v4764_v62 = vpop.f32.mrf.mxu1 }
 0x38d   : > { %3628 = vst [vmem:[%s6391_s16 + $0xc0] sm:$0xff] %v3587_v19  ;;  %v3330_v18 = vpop.f32.mrf.mxu0 }
 0x38e   : > { %vm3506_vm13 = vcmp.ge.f32.partialorder %v3465_v51, 0.0  ;;  %v3547_v7 = vmul.f32 0.2, %v3465_v51  ;;  %v2967_v6 = vpop.f32.mrf.mxu1  ;;  %v3418_v15 = vadd.f32 %v3330_v18, %v3047_v24 }
 0x38f   : > { %v4849_v49 = vpop.f32.mrf.mxu0  ;;  %v3049_v33 = vadd.f32 %v2967_v6, %v6318_v50 }
 0x390   : > { %v3588_v9 = vsel %vm3506_vm13, %v3465_v51, %v3547_v7  ;;  %v3466_v41 = vadd.f32 %v6383_v48, %v3418_v15  ;;  %v4767_v21 = vpop.f32.mrf.mxu1 }
 0x391   : > { %3629 = vst [vmem:[%s6391_s16 + $0xc8] sm:$0xff] %v3588_v9  ;;  %v3333_v8 = vpop.f32.mrf.mxu0 }
 0x392   : > { %vm3507_vm14 = vcmp.ge.f32.partialorder %v3466_v41, 0.0  ;;  %v3548_v14 = vmul.f32 0.2, %v3466_v41  ;;  %v2970_v63 = vpop.f32.mrf.mxu1  ;;  %v3419_v31 = vadd.f32 %v3333_v8, %v3048_v23 }
 0x393   : > { %v4850_v26 = vpop.f32.mrf.mxu0  ;;  %v3050_v60 = vadd.f32 %v2970_v63, %v6330_v40 }
 0x394   : > { %v3589_v47 = vsel %vm3507_vm14, %v3466_v41, %v3548_v14  ;;  %v3467_v12 = vadd.f32 %v6383_v48, %v3419_v31  ;;  %v4768_v22 = vpop.f32.mrf.mxu1 }
 0x395   : > { %3630 = vst [vmem:[%s6391_s16 + $0xd0] sm:$0xff] %v3589_v47  ;;  %v3338_v29 = vpop.f32.mrf.mxu0 }
 0x396   : > { %vm3508_vm15 = vcmp.ge.f32.partialorder %v3467_v12, 0.0  ;;  %v3549_v10 = vmul.f32 0.2, %v3467_v12  ;;  %v2975_v25 = vpop.f32.mrf.mxu1  ;;  %v3420_v32 = vadd.f32 %v3338_v29, %v3049_v33 }
 0x397   : > { %v4853_v58 = vpop.f32.mrf.mxu0  ;;  %v3051_v59 = vadd.f32 %v2975_v25, %v6334_v5 }
 0x398   : > { %v3590_v57 = vsel %vm3508_vm15, %v3467_v12, %v3549_v10  ;;  %v3468_v55 = vadd.f32 %v6383_v48, %v3420_v32  ;;  %v4771_v27 = vpop.f32.mrf.mxu1 }
 0x399   : > { %3631 = vst [vmem:[%s6391_s16 + $0xd8] sm:$0xff] %v3590_v57  ;;  %v3341_v50 = vpop.f32.mrf.mxu0 }
 0x39a   : > { %vm3509_vm0 = vcmp.ge.f32.partialorder %v3468_v55, 0.0  ;;  %v3550_v44 = vmul.f32 0.2, %v3468_v55  ;;  %v2978_v3 = vpop.f32.mrf.mxu1  ;;  %v3421_v28 = vadd.f32 %v3341_v50, %v3050_v60 }
 0x39b   : > { %v4854_v53 = vpop.f32.mrf.mxu0  ;;  %v3052_v43 = vadd.f32 %v2978_v3, %v6345_v38 }
 0x39c   : > { %v3591_v46 = vsel %vm3509_vm0, %v3468_v55, %v3550_v44  ;;  %v3469_v54 = vadd.f32 %v6383_v48, %v3421_v28  ;;  %v4772_v56 = vpop.f32.mrf.mxu1 }
 0x39d   : > { %3632 = vst [vmem:[%s6391_s16 + $0xe0] sm:$0xff] %v3591_v46  ;;  %v3346_v40 = vpop.f32.mrf.mxu0 }
 0x39e   : > { %vm3510_vm1 = vcmp.ge.f32.partialorder %v3469_v54, 0.0  ;;  %v3551_v20 = vmul.f32 0.2, %v3469_v54  ;;  %v2983_v2 = vpop.f32.mrf.mxu1  ;;  %v3422_v1 = vadd.f32 %v3346_v40, %v3051_v59 }
 0x39f   : > { %v4857_v13 = vpop.f32.mrf.mxu0  ;;  %v3053_v19 = vadd.f32 %v2983_v2, %v6349_v52 }
 0x3a0   : > { %v3592_v35 = vsel %vm3510_vm1, %v3469_v54, %v3551_v20  ;;  %v3470_v11 = vadd.f32 %v6383_v48, %v3422_v1  ;;  %v4775_v42 = vpop.f32.mrf.mxu1 }
 0x3a1   : > { %3633 = vst [vmem:[%s6391_s16 + $0xe8] sm:$0xff] %v3592_v35  ;;  %v3349_v5 = vpop.f32.mrf.mxu0 }
 0x3a2   : > { %vm3511_vm2 = vcmp.ge.f32.partialorder %v3470_v11, 0.0  ;;  %v3552_v0 = vmul.f32 0.2, %v3470_v11  ;;  %v2986_v39 = vpop.f32.mrf.mxu1  ;;  %v3423_v36 = vadd.f32 %v3349_v5, %v3052_v43 }
 0x3a3   : > { %v4858_v24 = vpop.f32.mrf.mxu0  ;;  %v3054_v23 = vadd.f32 %v2986_v39, %v6356_v17 }
 0x3a4   : > { %v3593_v51 = vsel %vm3511_vm2, %v3470_v11, %v3552_v0  ;;  %v3471_v62 = vadd.f32 %v6383_v48, %v3423_v36  ;;  %v4776_v18 = vpop.f32.mrf.mxu1 }
 0x3a5   : > { %3634 = vst [vmem:[%s6391_s16 + $0xf0] sm:$0xff] %v3593_v51  ;;  %v3354_v38 = vpop.f32.mrf.mxu0 }
 0x3a6   : > { %vm3512_vm3 = vcmp.ge.f32.partialorder %v3471_v62, 0.0  ;;  %v3553_v7 = vmul.f32 0.2, %v3471_v62  ;;  %v2991_v6 = vpop.f32.mrf.mxu1  ;;  %v3424_v15 = vadd.f32 %v3354_v38, %v3053_v19 }
 0x3a7   : > { %v4861_v49 = vpop.f32.mrf.mxu0  ;;  %v3055_v26 = vadd.f32 %v2991_v6, %v6360_v30 }
 0x3a8   : > { %v3594_v9 = vsel %vm3512_vm3, %v3471_v62, %v3553_v7  ;;  %v3472_v41 = vadd.f32 %v6383_v48, %v3424_v15  ;;  %v4779_v21 = vpop.f32.mrf.mxu1 }
 0x3a9   : > { %3635 = vst [vmem:[%s6391_s16 + $0xf8] sm:$0xff] %v3594_v9  ;;  %v3357_v52 = vpop.f32.mrf.mxu0 }
 0x3aa   : > { %vm3513_vm4 = vcmp.ge.f32.partialorder %v3472_v41, 0.0  ;;  %v3554_v8 = vmul.f32 0.2, %v3472_v41  ;;  %v2994_v14 = vpop.f32.mrf.mxu1  ;;  %v3425_v63 = vadd.f32 %v3357_v52, %v3054_v23 }
 0x3ab   : > { %v4862_v31 = vpop.f32.mrf.mxu0  ;;  %v3056_v32 = vadd.f32 %v2994_v14, %v6363_v4 }
 0x3ac   : > { %v3595_v33 = vsel %vm3513_vm4, %v3472_v41, %v3554_v8  ;;  %v3473_v47 = vadd.f32 %v6383_v48, %v3425_v63  ;;  %v4780_v12 = vpop.f32.mrf.mxu1 }
 0x3ad   : > { %3636 = vst [vmem:[%s6391_s16 + $0x100] sm:$0xff] %v3595_v33  ;;  %v3362_v17 = vpop.f32.mrf.mxu0 }
 0x3ae   : > { %vm3514_vm5 = vcmp.ge.f32.partialorder %v3473_v47, 0.0  ;;  %v3555_v22 = vmul.f32 0.2, %v3473_v47  ;;  %v2999_v29 = vpop.f32.mrf.mxu1  ;;  %v3426_v10 = vadd.f32 %v3362_v17, %v3055_v26 }
 0x3af   : > { %v4865_v25 = vpop.f32.mrf.mxu0  ;;  %v3057_v3 = vadd.f32 %v2999_v29, %v6366_v37 }
 0x3b0   : > { %v3596_v58 = vsel %vm3514_vm5, %v3473_v47, %v3555_v22  ;;  %v3474_v60 = vadd.f32 %v6383_v48, %v3426_v10  ;;  %v4783_v57 = vpop.f32.mrf.mxu1 }
 0x3b1   : > { %3637 = vst [vmem:[%s6391_s16 + $0x108] sm:$0xff] %v3596_v58  ;;  %v3365_v30 = vpop.f32.mrf.mxu0 }
 0x3b2   : > { %vm3515_vm6 = vcmp.ge.f32.partialorder %v3474_v60, 0.0  ;;  %v3556_v55 = vmul.f32 0.2, %v3474_v60  ;;  %v3002_v27 = vpop.f32.mrf.mxu1  ;;  %v3427_v50 = vadd.f32 %v3365_v30, %v3056_v32 }
 0x3b3   : > { %v4866_v44 = vpop.f32.mrf.mxu0  ;;  %v3058_v20 = vadd.f32 %v3002_v27, %v6369_v16 }
 0x3b4   : > { %v3597_v28 = vsel %vm3515_vm6, %v3474_v60, %v3556_v55  ;;  %v3475_v53 = vadd.f32 %v6383_v48, %v3427_v50  ;;  %v4784_v59 = vpop.f32.mrf.mxu1 }
 0x3b5   : > { %3638 = vst [vmem:[%s6391_s16 + $0x110] sm:$0xff] %v3597_v28  ;;  %v3370_v4 = vpop.f32.mrf.mxu0 }
 0x3b6   : > { %vm3516_vm7 = vcmp.ge.f32.partialorder %v3475_v53, 0.0  ;;  %v3557_v46 = vmul.f32 0.2, %v3475_v53  ;;  %v3007_v54 = vpop.f32.mrf.mxu1  ;;  %v3428_v56 = vadd.f32 %v3370_v4, %v3057_v3 }
 0x3b7   : > { %v4869_v40 = vpop.f32.mrf.mxu0  ;;  %v3059_v5 = vadd.f32 %v3007_v54, %v6372_v45 }
 0x3b8   : > { %v3598_v2 = vsel %vm3516_vm7, %v3475_v53, %v3557_v46  ;;  %v3476_v1 = vadd.f32 %v6383_v48, %v3428_v56  ;;  %v4787_v13 = vpop.f32.mrf.mxu1 }
 0x3b9   : > { %3639 = vst [vmem:[%s6391_s16 + $0x118] sm:$0xff] %v3598_v2  ;;  %v3373_v37 = vpop.f32.mrf.mxu0 }
 0x3ba   : > { %vm3517_vm8 = vcmp.ge.f32.partialorder %v3476_v1, 0.0  ;;  %v3558_v43 = vmul.f32 0.2, %v3476_v1  ;;  %v3010_v35 = vpop.f32.mrf.mxu1  ;;  %v3429_v11 = vadd.f32 %v3373_v37, %v3058_v20 }
 0x3bb   : > { %v4870_v42 = vpop.f32.mrf.mxu0  ;;  %v3060_v18 = vadd.f32 %v3010_v35, %v6375_v34 }
 0x3bc   : > { %v3599_v0 = vsel %vm3517_vm8, %v3476_v1, %v3558_v43  ;;  %v3477_v39 = vadd.f32 %v6383_v48, %v3429_v11  ;;  %v4788_v36 = vpop.f32.mrf.mxu1 }
 0x3bd   : > { %3640 = vst [vmem:[%s6391_s16 + $0x120] sm:$0xff] %v3599_v0  ;;  %v3378_v16 = vpop.f32.mrf.mxu0 }
 0x3be   : > { %vm3518_vm9 = vcmp.ge.f32.partialorder %v3477_v39, 0.0  ;;  %v3559_v24 = vmul.f32 0.2, %v3477_v39  ;;  %v3015_v19 = vpop.f32.mrf.mxu1  ;;  %v3430_v51 = vadd.f32 %v3378_v16, %v3059_v5 }
 0x3bf   : > { %v4873_v62 = vpop.f32.mrf.mxu0  ;;  %v3061_v41 = vadd.f32 %v3015_v19, %v6377_v61 }
 0x3c0   : > { %v3600_v38 = vsel %vm3518_vm9, %v3477_v39, %v3559_v24  ;;  %v3478_v7 = vadd.f32 %v6383_v48, %v3430_v51  ;;  %v4791_v6 = vpop.f32.mrf.mxu1 }
 0x3c1   : > { %3641 = vst [vmem:[%s6391_s16 + $0x128] sm:$0xff] %v3600_v38  ;;  %v3381_v45 = vpop.f32.mrf.mxu0 }
 0x3c2   : > { %vm3519_vm10 = vcmp.ge.f32.partialorder %v3478_v7, 0.0  ;;  %v3560_v15 = vmul.f32 0.2, %v3478_v7  ;;  %v3018_v49 = vpop.f32.mrf.mxu1  ;;  %v3431_v23 = vadd.f32 %v3381_v45, %v3060_v18 }
 0x3c3   : > { %v4874_v9 = vpop.f32.mrf.mxu0 }
 0x3c4   : > { %v3601_v21 = vsel %vm3519_vm10, %v3478_v7, %v3560_v15  ;;  %v3479_v52 = vadd.f32 %v6383_v48, %v3431_v23  ;;  %v4792_v8 = vpop.f32.mrf.mxu1 }
 0x3c5   : > { %3642 = vst [vmem:[%s6391_s16 + $0x130] sm:$0xff] %v3601_v21  ;;  %v3386_v34 = vpop.f32.mrf.mxu0 }
 0x3c6   : > { %vm3520_vm11 = vcmp.ge.f32.partialorder %v3479_v52, 0.0  ;;  %v3561_v14 = vmul.f32 0.2, %v3479_v52  ;;  %v3432_v63 = vadd.f32 %v3386_v34, %v3061_v41 }
 0x3c7   : > { %v4877_v31 = vpop.f32.mrf.mxu0 }
 0x3c8   : > { %v3602_v26 = vsel %vm3520_vm11, %v3479_v52, %v3561_v14  ;;  %v3480_v33 = vadd.f32 %v6383_v48, %v3432_v63 }
 0x3c9   : > { %3643 = vst [vmem:[%s6391_s16 + $0x138] sm:$0xff] %v3602_v26  ;;  %v3389_v47 = vpop.f32.mrf.mxu0 }
 0x3ca   : > { %vm3521_vm12 = vcmp.ge.f32.partialorder %v3480_v33, 0.0  ;;  %v3562_v12 = vmul.f32 0.2, %v3480_v33 }
 0x3cb   : > { %v4878_v17 = vpop.f32.mrf.mxu0 }
 0x3cc   : > { %v3603_v61 = vsel %vm3521_vm12, %v3480_v33, %v3562_v12 }
 0x3cd   : > { %3644 = vst [vmem:[%s6391_s16 + $0x140] sm:$0xff] %v3603_v61 }
 0x3ce PF: > { %s13_s12 = sadd.s32 1, %s4900_s12  }
 0x3cf   : > { %p10_p4 = scmp.ge.s32.totalorder %s13_s12, 4  }
 0x3d1   :  { %12 = sbr.rel (!%p10_p4) target bundleno = 1 (0x1), region = 70 }

</bundles_post_ra>
